<compile_context>
chip_gen: v5e
topology: v5e:2x2
jax: 0.10.0
libtpu: 0.0.40
codegen_flags: <defaults>
</compile_context>

<pallas_src>
import math

import numpy as np
import jax
import jax.numpy as jnp
from jax import lax
from jax.experimental import pallas as pl
from jax.experimental.pallas import tpu as pltpu


# ----------------------------- config helpers ------------------------------

KSIZE = {1: (1, 9), 2: (1, 5), 12: (1, 1)}
for _i in range(3, 12):
    KSIZE[_i] = (3, 3)

LANE = 128


def get_tfeb_pool_size_component(length):
    c = []
    index = 1
    while index <= 6:
        if length >= 2:
            if index == 6:
                c.append(length)
            else:
                c.append(2)
                length = length // 2
        else:
            c.append(1)
        index += 1
    return c


def get_tfeb_pool_sizes(conv2_ch, width):
    h = get_tfeb_pool_size_component(conv2_ch)
    w = get_tfeb_pool_size_component(width)
    return list(zip(h, w))


# ------------------------------ parameter init ------------------------------

def init_params(key, ch, n_class):
    """Deterministic parameter init mirroring the module's __init__ shapes."""
    params = {}
    in_out = {1: (1, ch[0]), 2: (ch[0], ch[1]), 3: (1, ch[2])}
    for i in range(4, 13):
        in_out[i] = (ch[i - 2], ch[i - 1])
    eps = 1e-5
    for i in range(1, 13):
        cin, cout = in_out[i]
        kh, kw = KSIZE[i]
        key, k_w, k_g, k_b, k_m, k_v = jax.random.split(key, 6)
        fan_in = cin * kh * kw
        std = math.sqrt(2.0 / fan_in)   # kaiming_normal_, nonlinearity='relu'
        w = std * jax.random.normal(k_w, (cout, cin, kh, kw), jnp.float32)
        gamma = 1.0 + 0.1 * jax.random.normal(k_g, (cout,), jnp.float32)
        beta = 0.1 * jax.random.normal(k_b, (cout,), jnp.float32)
        rmean = 0.1 * jax.random.normal(k_m, (cout,), jnp.float32)
        rvar = 1.0 + 0.1 * jnp.abs(jax.random.normal(k_v, (cout,), jnp.float32))
        scale = gamma / jnp.sqrt(rvar + eps)        # eval-mode BN fold
        bias = beta - rmean * scale
        params[f"conv{i}"] = dict(w=w, scale=scale, bias=bias)
    key, k_fw, k_fb = jax.random.split(key, 3)
    fan_in = ch[-1]
    fcn_w = (1.0 / math.sqrt(fan_in)) * jax.random.normal(
        k_fw, (n_class, ch[-1]), jnp.float32)
    bound = 1.0 / math.sqrt(fan_in)
    fcn_b = jax.random.uniform(k_fb, (n_class,), jnp.float32, -bound, bound)
    params["fcn"] = dict(w=fcn_w, b=fcn_b)
    return params


# --------------------------- fused forward builder ---------------------------

def build_acdnetv2(params, *, ch, sr, input_length, n_class, batch):
    # ---- static geometry (all Python ints at build time) ----
    stride1 = stride2 = 2
    n_frames = sr / 1000 * 10
    sfeb_pool = int(n_frames / (stride1 * stride2))
    tfeb_width = int(input_length / sr * 1000 / 10)
    pool_sizes = get_tfeb_pool_sizes(ch[1], tfeb_width)

    L = input_length
    L1 = (L - 9) // 2 + 1            # conv1 output length (stride 2, k=9)
    L2 = (L1 - 5) // 2 + 1           # conv2 output length (stride 2, k=5)
    n_even = (L1 + 1) // 2           # conv1 outputs at even time steps
    n_odd = L1 // 2                  # conv1 outputs at odd  time steps
    assert n_even >= L2 + 2 and n_odd >= L2 + 1
    P1 = L2 // sfeb_pool             # SFEB pooled length
    H0, W0 = ch[1], P1               # TFEB image after the permute

    f32, bf16 = jnp.float32, jnp.bfloat16

    # ---- BN-folded weights; all packed into one lane-aligned bf16 slab ----
    def fold(i):
        p = params[f"conv{i}"]
        w = (np.asarray(p["w"], np.float32)
             * np.asarray(p["scale"], np.float32)[:, None, None, None])
        b = np.asarray(p["bias"], np.float32)
        return w, b

    w_mats, w_off = {}, {}
    w_cols = 0

    def add_w(name, mat):
        nonlocal w_cols
        mat = np.asarray(mat, np.float32)
        w_mats[name] = mat
        w_off[name] = w_cols
        w_cols += mat.shape[1] + (-mat.shape[1] % LANE)   # 128-lane aligned slots

    w, b = fold(1)                                         # (C1,1,1,9)
    add_w("conv1", np.concatenate([w[:, 0, 0, :], b[:, None]], axis=1))
    w, b = fold(2)                                         # (C2,C1,1,5)
    add_w("conv2", np.concatenate([w[:, :, 0, k] for k in range(5)]
                                  + [b[:, None]], axis=1))

    # ---- TFEB plan (static list of ops) ----
    plan = []
    mask_res, m_entries = {}, []
    m_cols = 0

    def add_masks(Hc, Wc):
        nonlocal m_cols
        key = (Hc, Wc)
        if key not in mask_res:
            taps = ([(di, dj) for di in range(3) for dj in range(3)]
                    if Wc > 1 else [(di, 1) for di in range(3)])
            mask_res[key] = (m_cols, taps)
            m_entries.append((m_cols, Hc, Wc, taps))
            m_cols += Hc * Wc + (-(Hc * Wc) % LANE)
        return mask_res[key]

    def add_conv(i, Hc, Wc):
        w, b = fold(i)                                     # (cout,cin,3,3)
        cin = int(w.shape[1])
        moff, taps = add_masks(Hc, Wc)
        add_w(f"conv{i}", np.concatenate(
            [w[:, :, di, dj] for (di, dj) in taps] + [b[:, None]], axis=1))
        plan.append(dict(kind="conv", name=f"conv{i}", H=Hc, W=Wc,
                         cin=cin, taps=taps, moff=moff))

    pool_consts = {}
    H, W = H0, W0
    p_index = 0
    for i in [3, 4, 6, 8, 10]:
        add_conv(i, H, W)
        if i != 3:
            add_conv(i + 1, H, W)
        ph, pw = pool_sizes[p_index]
        if ph > 1 or pw > 1:
            assert ph in (1, 2) and pw in (1, 2)
            Ho, Wo = H // ph, W // pw
            P = np.zeros((H * W, Ho * Wo), np.float32)     # 0/1 column gather
            for k in range(Ho * Wo):
                P[ph * W * (k // Wo) + pw * (k % Wo), k] = 1.0
            pname = f"pool{p_index}"
            pool_consts[pname] = P
            plan.append(dict(kind="pool", name=pname, ph=ph, pw=pw, W=W))
            H, W = Ho, Wo
        p_index += 1

    # Dropout(0.2): identity at inference time.

    w, b = fold(12)
    add_w("conv12", np.concatenate([w[:, :, 0, 0], b[:, None]], axis=1))

    # Trailing AvgPool2d((h, w-1)) (linear) — inactive in the demo config.
    ph, pw = pool_sizes[-1]
    have_avg = ph > 1 or pw > 1
    if have_avg:
        kw_ = pw - 1
        assert kw_ >= 1
        Ho, Wo = H // ph, W // kw_
        A = np.zeros((H * W, Ho * Wo), np.float32)
        for k in range(Ho * Wo):
            h2, w2 = k // Wo, k % Wo
            for a in range(ph):
                for bb in range(kw_):
                    A[(ph * h2 + a) * W + (kw_ * w2 + bb), k] = 1.0 / (ph * kw_)
        pool_consts["avg"] = A
        H, W = Ho, Wo
    assert H * W == 1, "spatial extent must collapse to 1x1 before Flatten/fcn"

    add_w("fcn", np.concatenate(
        [np.asarray(params["fcn"]["w"], np.float32),
         np.asarray(params["fcn"]["b"], np.float32)[:, None]], axis=1))

    # ---- assemble the packed constants ----
    maxrows = max(m.shape[0] for m in w_mats.values())
    wpack = np.zeros((maxrows, w_cols), np.float32)
    for name, mat in w_mats.items():
        wpack[:mat.shape[0], w_off[name]:w_off[name] + mat.shape[1]] = mat

    mpack = np.zeros((9, max(m_cols, LANE)), np.float32)   # conv edge masks
    for off, Hc, Wc, taps in m_entries:
        for k, (di, dj) in enumerate(taps):
            for l in range(Hc * Wc):
                hh, ww = l // Wc, l % Wc
                if 0 <= hh + di - 1 < Hc and 0 <= ww + dj - 1 < Wc:
                    mpack[k, off + l] = 1.0

    # SFEB pool-column gather fused with the (0,2,1,3) permute.
    GR = np.zeros((L2, H0 * W0), np.float32)
    MROW = np.zeros((H0, H0 * W0), np.float32)
    for k in range(H0 * W0):
        GR[sfeb_pool * (k % W0), k] = 1.0
        MROW[k // W0, k] = 1.0

    names, consts = [], []

    def add_const(name, arr, dtype):
        names.append(name)
        consts.append(jnp.asarray(np.asarray(arr), dtype))

    add_const("wpack", wpack, bf16)
    add_const("mpack", mpack, f32)
    add_const("gr", GR, bf16)
    add_const("mrow", MROW, f32)
    for pname, P in pool_consts.items():
        add_const(pname, P, bf16)
    name_to_pos = {n: i for i, n in enumerate(names)}

    # ------------------------------ the kernel ------------------------------

    def kernel(a1_ref, *rest):
        out_ref = rest[-1]
        cref = {n: rest[name_to_pos[n]] for n in names}
        w_ref, m_ref = cref["wpack"], cref["mpack"]

        def wmat(name):
            off = w_off[name]
            rows, cols = w_mats[name].shape
            return w_ref[0:rows, off:off + cols]            # bf16, lane-aligned

        def lroll(x, s):
            # piece[:, l] = x[:, l + s]   (wrap-around; callers mask wraps)
            n = x.shape[-1]
            sh = (-s) % n
            if sh == 0:
                return x
            return pltpu.roll(x, shift=sh, axis=1)

        def smax(x, d):
            return jnp.maximum(x, lroll(x, d))

        def mxu(wname, xcol):
            return jnp.dot(wmat(wname), xcol.astype(bf16),
                           preferred_element_type=f32)

        # ---------------- SFEB ----------------
        # conv1: one (C1, 10) x (10, L1) matmul; trailing ones-row folds the bias.
        X1 = jnp.concatenate([a1_ref[0], jnp.ones((1, L1), bf16)], axis=0)
        y1 = jnp.maximum(mxu("conv1", X1), 0.0)             # (C1, L1) f32

        # conv2 (stride 2, k=5): taps are plain lane rolls thanks to the
        # even/odd column split of a1; fused into one (C2, 5*C1+1) matmul.
        shifts2 = [0, n_even, 1, n_even + 1, 2]
        X2 = jnp.concatenate(
            [lroll(y1, s)[:, 0:L2] for s in shifts2]
            + [jnp.ones((1, L2), f32)], axis=0)              # (5*C1+1, L2)
        y2 = jnp.maximum(mxu("conv2", X2), 0.0)              # (C2, L2)

        # MaxPool(1, sfeb_pool): VPU sliding max (log steps), then one gather
        # matmul fused with the channel<->height permute -> (1, C2*P1).
        sm, cov = y2, 1
        while cov * 2 <= sfeb_pool:
            sm = smax(sm, cov)
            cov *= 2
        if cov < sfeb_pool:
            sm = smax(sm, sfeb_pool - cov)
        rep = jnp.dot(sm.astype(bf16), cref["gr"][...],
                      preferred_element_type=f32)            # (C2, H0*W0)
        x = jnp.sum(rep * cref["mrow"][...], axis=0, keepdims=True)  # (1, H0*W0)

        # ---------------- TFEB ----------------
        for op in plan:
            if op["kind"] == "conv":
                Wc = op["W"]
                HW = op["H"] * Wc
                moff = op["moff"]
                pieces = []
                for k, (di, dj) in enumerate(op["taps"]):
                    s = (di - 1) * Wc + (dj - 1)
                    pieces.append(lroll(x, s)
                                  * m_ref[k:k + 1, moff:moff + HW])
                pieces.append(jnp.ones((1, HW), f32))        # bias row
                x = jnp.maximum(
                    mxu(op["name"], jnp.concatenate(pieces, axis=0)), 0.0)
            else:   # 2x2 / 2x1 max-pool: sliding maxes + one 0/1 gather matmul
                sm2 = x
                if op["pw"] == 2:
                    sm2 = smax(sm2, 1)
                if op["ph"] == 2:
                    sm2 = smax(sm2, op["W"])
                x = jnp.dot(sm2.astype(bf16), cref[op["name"]][...],
                            preferred_element_type=f32)

        # conv12 (1x1) + BN + ReLU, optional AvgPool, Linear, Softmax.
        x = jnp.maximum(
            mxu("conv12",
                jnp.concatenate([x, jnp.ones((1, x.shape[-1]), f32)], axis=0)),
            0.0)
        if have_avg:
            x = jnp.dot(x.astype(bf16), cref["avg"][...],
                        preferred_element_type=f32)
        logits_col = mxu("fcn",
                         jnp.concatenate([x, jnp.ones((1, 1), f32)], axis=0))
        # column -> row without a transpose (iota mask + sublane sum)
        eye = (lax.broadcasted_iota(jnp.int32, (n_class, n_class), 0) ==
               lax.broadcasted_iota(jnp.int32, (n_class, n_class), 1)).astype(f32)
        logits = jnp.sum(logits_col * eye, axis=0, keepdims=True)   # (1, n_class)
        z = logits - jnp.max(logits, axis=-1, keepdims=True)
        e = jnp.exp(z)
        out_ref[0] = e / jnp.sum(e, axis=-1, keepdims=True)

    # ----------------------------- pallas_call ------------------------------

    in_specs = [pl.BlockSpec((1, 9, L1), lambda b: (b, 0, 0))]
    in_specs += [pl.BlockSpec(tuple(int(d) for d in c.shape), lambda b: (0, 0))
                 for c in consts]

    call = pl.pallas_call(
        kernel,
        grid=(batch,),
        in_specs=in_specs,
        out_specs=pl.BlockSpec((1, 1, n_class), lambda b: (b, 0, 0)),
        out_shape=jax.ShapeDtypeStruct((batch, 1, n_class), jnp.float32),
        compiler_params=pltpu.CompilerParams(
            dimension_semantics=("parallel",)),
    )

    consts_t = tuple(consts)

    def forward(x):
        # x: (B, 1, 1, L) in PyTorch NCHW layout.
        xf = x.reshape(batch, L).astype(jnp.float32)

        # conv1 im2col, lane-dense (B, 9, L1): even conv1 output positions
        # first, then odd ones, so conv2's stride-2 taps are lane rolls.
        def win(start, count):
            cols = [xf[:, start + j: start + j + 4 * (count - 1) + 1: 4]
                    for j in range(9)]
            return jnp.stack(cols, axis=1)                   # (B, 9, count)

        a1 = jnp.concatenate([win(0, n_even), win(2, n_odd)],
                             axis=2).astype(jnp.bfloat16)    # (B, 9, L1)
        out = call(a1, *consts_t)                            # (B, 1, n_class)
        return out[:, 0, :]

    return jax.jit(forward)


# --------------------------------- main --------------------------------------

if __name__ == "__main__":
    # Small configuration consistent with ACDNetV2's constraints:
    #   sr=4000 -> sfeb_pool_size=10, input_length=480 -> tfeb_width=12,
    #   ch_conf[1]=32 -> TFEB height collapses to 1 after the pool chain.
    SR = 4000
    INPUT_LENGTH = 480
    N_CLASS = 10
    CH_CONF = [4, 32, 8, 8, 8, 16, 16, 16, 16, 32, 32, N_CLASS]
    B = 2

    key = jax.random.PRNGKey(0)
    key, pkey, xkey = jax.random.split(key, 3)
    params = init_params(pkey, CH_CONF, N_CLASS)
    x = jax.random.normal(xkey, (B, 1, 1, INPUT_LENGTH), jnp.float32)

    fwd = build_acdnetv2(params, ch=CH_CONF, sr=SR,
                         input_length=INPUT_LENGTH, n_class=N_CLASS, batch=B)

    y = jax.block_until_ready(fwd(x))

    assert y.shape == (B, N_CLASS), y.shape
    assert bool(jnp.all(jnp.isfinite(y)))
    assert bool(jnp.allclose(jnp.sum(y, axis=1), 1.0, atol=1e-5))
    print("KERNEL_OK")
</pallas_src>

<mosaic_0001>
module attributes {stable_mosaic.version = 11 : i64} {
  func.func @kernel(%arg0: i32, %arg1: memref<1x9x236xbf16, #tpu.memory_space<vmem>>, %arg2: memref<32x1792xbf16, #tpu.memory_space<vmem>>, %arg3: memref<9x896xf32, #tpu.memory_space<vmem>>, %arg4: memref<116x352xbf16, #tpu.memory_space<vmem>>, %arg5: memref<32x352xf32, #tpu.memory_space<vmem>>, %arg6: memref<352x80xbf16, #tpu.memory_space<vmem>>, %arg7: memref<80x16xbf16, #tpu.memory_space<vmem>>, %arg8: memref<16x4xbf16, #tpu.memory_space<vmem>>, %arg9: memref<4x2xbf16, #tpu.memory_space<vmem>>, %arg10: memref<2x1xbf16, #tpu.memory_space<vmem>>, %arg11: memref<1x1x10xf32, #tpu.memory_space<vmem>>) attributes {dimension_semantics = [#tpu.dimension_semantics<parallel>], iteration_bounds = array<i64: 2>, scalar_prefetch = 0 : i64, scratch_operands = 0 : i64, tpu.core_type = #tpu.core_type<tc>, window_params = [{transform_indices = @transform_0, window_bounds = array<i64: 1, 9, 236>}, {pipeline_mode = #tpu.pipeline_mode<synchronous>, transform_indices = @transform_1, window_bounds = array<i64: 32, 1792>}, {pipeline_mode = #tpu.pipeline_mode<synchronous>, transform_indices = @transform_2, window_bounds = array<i64: 9, 896>}, {pipeline_mode = #tpu.pipeline_mode<synchronous>, transform_indices = @transform_3, window_bounds = array<i64: 116, 352>}, {pipeline_mode = #tpu.pipeline_mode<synchronous>, transform_indices = @transform_4, window_bounds = array<i64: 32, 352>}, {pipeline_mode = #tpu.pipeline_mode<synchronous>, transform_indices = @transform_5, window_bounds = array<i64: 352, 80>}, {pipeline_mode = #tpu.pipeline_mode<synchronous>, transform_indices = @transform_6, window_bounds = array<i64: 80, 16>}, {pipeline_mode = #tpu.pipeline_mode<synchronous>, transform_indices = @transform_7, window_bounds = array<i64: 16, 4>}, {pipeline_mode = #tpu.pipeline_mode<synchronous>, transform_indices = @transform_8, window_bounds = array<i64: 4, 2>}, {pipeline_mode = #tpu.pipeline_mode<synchronous>, transform_indices = @transform_9, window_bounds = array<i64: 2, 1>}, {transform_indices = @transform_10, window_bounds = array<i64: 1, 1, 10>}]} {
    %c0 = arith.constant 0 : index
    %c0_0 = arith.constant 0 : index
    %c0_1 = arith.constant 0 : index
    %0 = vector.load %arg1[%c0, %c0_0, %c0_1] : memref<1x9x236xbf16, #tpu.memory_space<vmem>>, vector<1x9x236xbf16>
    %1 = vector.shape_cast %0 : vector<1x9x236xbf16> to vector<9x236xbf16>
    %cst = arith.constant 1.000000e+00 : bf16
    %2 = vector.broadcast %cst : bf16 to vector<1x236xbf16>
    %3 = tpu.concatenate %1, %2 in 0 : vector<9x236xbf16>, vector<1x236xbf16> -> vector<10x236xbf16>
    %c0_2 = arith.constant 0 : index
    %c0_3 = arith.constant 0 : index
    %4 = vector.load %arg2[%c0_2, %c0_3] : memref<32x1792xbf16, #tpu.memory_space<vmem>>, vector<4x10xbf16>
    %cst_4 = arith.constant dense<0.000000e+00> : vector<4x236xf32>
    %5 = tpu.matmul %4, %3, %cst_4 {dimension_numbers = #tpu.dot_dimension_numbers<[1], [0], [0], [1], [0, 0, 1, 1], [], []>} : vector<4x10xbf16>, vector<10x236xbf16>, vector<4x236xf32> -> vector<4x236xf32>
    %cst_5 = arith.constant 0.000000e+00 : f32
    %6 = vector.broadcast %cst_5 : f32 to vector<4x236xf32>
    %7 = arith.maximumf %5, %6 : vector<4x236xf32>
    %8 = vector.extract_strided_slice %7 {offsets = [0, 0], sizes = [4, 116], strides = [1, 1]} : vector<4x236xf32> to vector<4x116xf32>
    %c118_i32 = arith.constant 118 : i32
    %9 = tpu.dynamic_rotate %7 by %c118_i32 dim 1 : vector<4x236xf32>, i32 -> vector<4x236xf32>
    %10 = vector.extract_strided_slice %9 {offsets = [0, 0], sizes = [4, 116], strides = [1, 1]} : vector<4x236xf32> to vector<4x116xf32>
    %c235_i32 = arith.constant 235 : i32
    %11 = tpu.dynamic_rotate %7 by %c235_i32 dim 1 : vector<4x236xf32>, i32 -> vector<4x236xf32>
    %12 = vector.extract_strided_slice %11 {offsets = [0, 0], sizes = [4, 116], strides = [1, 1]} : vector<4x236xf32> to vector<4x116xf32>
    %c117_i32 = arith.constant 117 : i32
    %13 = tpu.dynamic_rotate %7 by %c117_i32 dim 1 : vector<4x236xf32>, i32 -> vector<4x236xf32>
    %14 = vector.extract_strided_slice %13 {offsets = [0, 0], sizes = [4, 116], strides = [1, 1]} : vector<4x236xf32> to vector<4x116xf32>
    %c234_i32 = arith.constant 234 : i32
    %15 = tpu.dynamic_rotate %7 by %c234_i32 dim 1 : vector<4x236xf32>, i32 -> vector<4x236xf32>
    %16 = vector.extract_strided_slice %15 {offsets = [0, 0], sizes = [4, 116], strides = [1, 1]} : vector<4x236xf32> to vector<4x116xf32>
    %cst_6 = arith.constant 1.000000e+00 : f32
    %17 = vector.broadcast %cst_6 : f32 to vector<1x116xf32>
    %18 = tpu.concatenate %8, %10, %12, %14, %16, %17 in 0 : vector<4x116xf32>, vector<4x116xf32>, vector<4x116xf32>, vector<4x116xf32>, vector<4x116xf32>, vector<1x116xf32> -> vector<21x116xf32>
    %c0_7 = arith.constant 0 : index
    %c128 = arith.constant 128 : index
    %19 = vector.load %arg2[%c0_7, %c128] : memref<32x1792xbf16, #tpu.memory_space<vmem>>, vector<32x21xbf16>
    %20 = arith.truncf %18 : vector<21x116xf32> to vector<21x116xbf16>
    %cst_8 = arith.constant dense<0.000000e+00> : vector<32x116xf32>
    %21 = tpu.matmul %19, %20, %cst_8 {dimension_numbers = #tpu.dot_dimension_numbers<[1], [0], [0], [1], [0, 0, 1, 1], [], []>} : vector<32x21xbf16>, vector<21x116xbf16>, vector<32x116xf32> -> vector<32x116xf32>
    %cst_9 = arith.constant 0.000000e+00 : f32
    %22 = vector.broadcast %cst_9 : f32 to vector<32x116xf32>
    %23 = arith.maximumf %21, %22 : vector<32x116xf32>
    %c115_i32 = arith.constant 115 : i32
    %24 = tpu.dynamic_rotate %23 by %c115_i32 dim 1 : vector<32x116xf32>, i32 -> vector<32x116xf32>
    %25 = arith.maximumf %23, %24 : vector<32x116xf32>
    %c114_i32 = arith.constant 114 : i32
    %26 = tpu.dynamic_rotate %25 by %c114_i32 dim 1 : vector<32x116xf32>, i32 -> vector<32x116xf32>
    %27 = arith.maximumf %25, %26 : vector<32x116xf32>
    %c112_i32 = arith.constant 112 : i32
    %28 = tpu.dynamic_rotate %27 by %c112_i32 dim 1 : vector<32x116xf32>, i32 -> vector<32x116xf32>
    %29 = arith.maximumf %27, %28 : vector<32x116xf32>
    %c114_i32_10 = arith.constant 114 : i32
    %30 = tpu.dynamic_rotate %29 by %c114_i32_10 dim 1 : vector<32x116xf32>, i32 -> vector<32x116xf32>
    %31 = arith.maximumf %29, %30 : vector<32x116xf32>
    %32 = arith.truncf %31 : vector<32x116xf32> to vector<32x116xbf16>
    %c0_11 = arith.constant 0 : index
    %c0_12 = arith.constant 0 : index
    %33 = vector.load %arg4[%c0_11, %c0_12] : memref<116x352xbf16, #tpu.memory_space<vmem>>, vector<116x352xbf16>
    %cst_13 = arith.constant dense<0.000000e+00> : vector<32x352xf32>
    %34 = tpu.matmul %32, %33, %cst_13 {dimension_numbers = #tpu.dot_dimension_numbers<[1], [0], [0], [1], [0, 0, 1, 1], [], []>} : vector<32x116xbf16>, vector<116x352xbf16>, vector<32x352xf32> -> vector<32x352xf32>
    %c0_14 = arith.constant 0 : index
    %c0_15 = arith.constant 0 : index
    %35 = vector.load %arg5[%c0_14, %c0_15] : memref<32x352xf32, #tpu.memory_space<vmem>>, vector<32x352xf32>
    %36 = arith.mulf %34, %35 : vector<32x352xf32>
    %cst_16 = arith.constant dense<0.000000e+00> : vector<352xf32>
    %37 = vector.multi_reduction <add>, %36, %cst_16 [0] : vector<32x352xf32> to vector<352xf32>
    %38 = vector.shape_cast %37 : vector<352xf32> to vector<1x352xf32>
    %c12_i32 = arith.constant 12 : i32
    %39 = tpu.dynamic_rotate %38 by %c12_i32 dim 1 : vector<1x352xf32>, i32 -> vector<1x352xf32>
    %c0_17 = arith.constant 0 : index
    %c0_18 = arith.constant 0 : index
    %40 = vector.load %arg3[%c0_17, %c0_18] : memref<9x896xf32, #tpu.memory_space<vmem>>, vector<1x352xf32>
    %41 = arith.mulf %39, %40 : vector<1x352xf32>
    %c11_i32 = arith.constant 11 : i32
    %42 = tpu.dynamic_rotate %38 by %c11_i32 dim 1 : vector<1x352xf32>, i32 -> vector<1x352xf32>
    %c1 = arith.constant 1 : index
    %c0_19 = arith.constant 0 : index
    %43 = vector.load %arg3[%c1, %c0_19] : memref<9x896xf32, #tpu.memory_space<vmem>>, vector<1x352xf32>
    %44 = arith.mulf %42, %43 : vector<1x352xf32>
    %c10_i32 = arith.constant 10 : i32
    %45 = tpu.dynamic_rotate %38 by %c10_i32 dim 1 : vector<1x352xf32>, i32 -> vector<1x352xf32>
    %c2 = arith.constant 2 : index
    %c0_20 = arith.constant 0 : index
    %46 = vector.load %arg3[%c2, %c0_20] : memref<9x896xf32, #tpu.memory_space<vmem>>, vector<1x352xf32>
    %47 = arith.mulf %45, %46 : vector<1x352xf32>
    %c1_i32 = arith.constant 1 : i32
    %48 = tpu.dynamic_rotate %38 by %c1_i32 dim 1 : vector<1x352xf32>, i32 -> vector<1x352xf32>
    %c3 = arith.constant 3 : index
    %c0_21 = arith.constant 0 : index
    %49 = vector.load %arg3[%c3, %c0_21] : memref<9x896xf32, #tpu.memory_space<vmem>>, vector<1x352xf32>
    %50 = arith.mulf %48, %49 : vector<1x352xf32>
    %c4 = arith.constant 4 : index
    %c0_22 = arith.constant 0 : index
    %51 = vector.load %arg3[%c4, %c0_22] : memref<9x896xf32, #tpu.memory_space<vmem>>, vector<1x352xf32>
    %52 = arith.mulf %38, %51 : vector<1x352xf32>
    %c351_i32 = arith.constant 351 : i32
    %53 = tpu.dynamic_rotate %38 by %c351_i32 dim 1 : vector<1x352xf32>, i32 -> vector<1x352xf32>
    %c5 = arith.constant 5 : index
    %c0_23 = arith.constant 0 : index
    %54 = vector.load %arg3[%c5, %c0_23] : memref<9x896xf32, #tpu.memory_space<vmem>>, vector<1x352xf32>
    %55 = arith.mulf %53, %54 : vector<1x352xf32>
    %c342_i32 = arith.constant 342 : i32
    %56 = tpu.dynamic_rotate %38 by %c342_i32 dim 1 : vector<1x352xf32>, i32 -> vector<1x352xf32>
    %c6 = arith.constant 6 : index
    %c0_24 = arith.constant 0 : index
    %57 = vector.load %arg3[%c6, %c0_24] : memref<9x896xf32, #tpu.memory_space<vmem>>, vector<1x352xf32>
    %58 = arith.mulf %56, %57 : vector<1x352xf32>
    %c341_i32 = arith.constant 341 : i32
    %59 = tpu.dynamic_rotate %38 by %c341_i32 dim 1 : vector<1x352xf32>, i32 -> vector<1x352xf32>
    %c7 = arith.constant 7 : index
    %c0_25 = arith.constant 0 : index
    %60 = vector.load %arg3[%c7, %c0_25] : memref<9x896xf32, #tpu.memory_space<vmem>>, vector<1x352xf32>
    %61 = arith.mulf %59, %60 : vector<1x352xf32>
    %c340_i32 = arith.constant 340 : i32
    %62 = tpu.dynamic_rotate %38 by %c340_i32 dim 1 : vector<1x352xf32>, i32 -> vector<1x352xf32>
    %c8 = arith.constant 8 : index
    %c0_26 = arith.constant 0 : index
    %63 = vector.load %arg3[%c8, %c0_26] : memref<9x896xf32, #tpu.memory_space<vmem>>, vector<1x352xf32>
    %64 = arith.mulf %62, %63 : vector<1x352xf32>
    %cst_27 = arith.constant 1.000000e+00 : f32
    %65 = vector.broadcast %cst_27 : f32 to vector<1x352xf32>
    %66 = tpu.concatenate %41, %44, %47, %50, %52, %55, %58, %61, %64, %65 in 0 : vector<1x352xf32>, vector<1x352xf32>, vector<1x352xf32>, vector<1x352xf32>, vector<1x352xf32>, vector<1x352xf32>, vector<1x352xf32>, vector<1x352xf32>, vector<1x352xf32>, vector<1x352xf32> -> vector<10x352xf32>
    %c0_28 = arith.constant 0 : index
    %c256 = arith.constant 256 : index
    %67 = vector.load %arg2[%c0_28, %c256] : memref<32x1792xbf16, #tpu.memory_space<vmem>>, vector<8x10xbf16>
    %68 = arith.truncf %66 : vector<10x352xf32> to vector<10x352xbf16>
    %cst_29 = arith.constant dense<0.000000e+00> : vector<8x352xf32>
    %69 = tpu.matmul %67, %68, %cst_29 {dimension_numbers = #tpu.dot_dimension_numbers<[1], [0], [0], [1], [0, 0, 1, 1], [], []>} : vector<8x10xbf16>, vector<10x352xbf16>, vector<8x352xf32> -> vector<8x352xf32>
    %cst_30 = arith.constant 0.000000e+00 : f32
    %70 = vector.broadcast %cst_30 : f32 to vector<8x352xf32>
    %71 = arith.maximumf %69, %70 : vector<8x352xf32>
    %c351_i32_31 = arith.constant 351 : i32
    %72 = tpu.dynamic_rotate %71 by %c351_i32_31 dim 1 : vector<8x352xf32>, i32 -> vector<8x352xf32>
    %73 = arith.maximumf %71, %72 : vector<8x352xf32>
    %c341_i32_32 = arith.constant 341 : i32
    %74 = tpu.dynamic_rotate %73 by %c341_i32_32 dim 1 : vector<8x352xf32>, i32 -> vector<8x352xf32>
    %75 = arith.maximumf %73, %74 : vector<8x352xf32>
    %76 = arith.truncf %75 : vector<8x352xf32> to vector<8x352xbf16>
    %c0_33 = arith.constant 0 : index
    %c0_34 = arith.constant 0 : index
    %77 = vector.load %arg6[%c0_33, %c0_34] : memref<352x80xbf16, #tpu.memory_space<vmem>>, vector<352x80xbf16>
    %cst_35 = arith.constant dense<0.000000e+00> : vector<8x80xf32>
    %78 = tpu.matmul %76, %77, %cst_35 {dimension_numbers = #tpu.dot_dimension_numbers<[1], [0], [0], [1], [0, 0, 1, 1], [], []>} : vector<8x352xbf16>, vector<352x80xbf16>, vector<8x80xf32> -> vector<8x80xf32>
    %c6_i32 = arith.constant 6 : i32
    %79 = tpu.dynamic_rotate %78 by %c6_i32 dim 1 : vector<8x80xf32>, i32 -> vector<8x80xf32>
    %c0_36 = arith.constant 0 : index
    %c384 = arith.constant 384 : index
    %80 = vector.load %arg3[%c0_36, %c384] : memref<9x896xf32, #tpu.memory_space<vmem>>, vector<1x80xf32>
    %81 = vector.broadcast %80 : vector<1x80xf32> to vector<8x80xf32>
    %82 = arith.mulf %79, %81 : vector<8x80xf32>
    %c5_i32 = arith.constant 5 : i32
    %83 = tpu.dynamic_rotate %78 by %c5_i32 dim 1 : vector<8x80xf32>, i32 -> vector<8x80xf32>
    %c1_37 = arith.constant 1 : index
    %c384_38 = arith.constant 384 : index
    %84 = vector.load %arg3[%c1_37, %c384_38] : memref<9x896xf32, #tpu.memory_space<vmem>>, vector<1x80xf32>
    %85 = vector.broadcast %84 : vector<1x80xf32> to vector<8x80xf32>
    %86 = arith.mulf %83, %85 : vector<8x80xf32>
    %c4_i32 = arith.constant 4 : i32
    %87 = tpu.dynamic_rotate %78 by %c4_i32 dim 1 : vector<8x80xf32>, i32 -> vector<8x80xf32>
    %c2_39 = arith.constant 2 : index
    %c384_40 = arith.constant 384 : index
    %88 = vector.load %arg3[%c2_39, %c384_40] : memref<9x896xf32, #tpu.memory_space<vmem>>, vector<1x80xf32>
    %89 = vector.broadcast %88 : vector<1x80xf32> to vector<8x80xf32>
    %90 = arith.mulf %87, %89 : vector<8x80xf32>
    %c1_i32_41 = arith.constant 1 : i32
    %91 = tpu.dynamic_rotate %78 by %c1_i32_41 dim 1 : vector<8x80xf32>, i32 -> vector<8x80xf32>
    %c3_42 = arith.constant 3 : index
    %c384_43 = arith.constant 384 : index
    %92 = vector.load %arg3[%c3_42, %c384_43] : memref<9x896xf32, #tpu.memory_space<vmem>>, vector<1x80xf32>
    %93 = vector.broadcast %92 : vector<1x80xf32> to vector<8x80xf32>
    %94 = arith.mulf %91, %93 : vector<8x80xf32>
    %c4_44 = arith.constant 4 : index
    %c384_45 = arith.constant 384 : index
    %95 = vector.load %arg3[%c4_44, %c384_45] : memref<9x896xf32, #tpu.memory_space<vmem>>, vector<1x80xf32>
    %96 = vector.broadcast %95 : vector<1x80xf32> to vector<8x80xf32>
    %97 = arith.mulf %78, %96 : vector<8x80xf32>
    %c79_i32 = arith.constant 79 : i32
    %98 = tpu.dynamic_rotate %78 by %c79_i32 dim 1 : vector<8x80xf32>, i32 -> vector<8x80xf32>
    %c5_46 = arith.constant 5 : index
    %c384_47 = arith.constant 384 : index
    %99 = vector.load %arg3[%c5_46, %c384_47] : memref<9x896xf32, #tpu.memory_space<vmem>>, vector<1x80xf32>
    %100 = vector.broadcast %99 : vector<1x80xf32> to vector<8x80xf32>
    %101 = arith.mulf %98, %100 : vector<8x80xf32>
    %c76_i32 = arith.constant 76 : i32
    %102 = tpu.dynamic_rotate %78 by %c76_i32 dim 1 : vector<8x80xf32>, i32 -> vector<8x80xf32>
    %c6_48 = arith.constant 6 : index
    %c384_49 = arith.constant 384 : index
    %103 = vector.load %arg3[%c6_48, %c384_49] : memref<9x896xf32, #tpu.memory_space<vmem>>, vector<1x80xf32>
    %104 = vector.broadcast %103 : vector<1x80xf32> to vector<8x80xf32>
    %105 = arith.mulf %102, %104 : vector<8x80xf32>
    %c75_i32 = arith.constant 75 : i32
    %106 = tpu.dynamic_rotate %78 by %c75_i32 dim 1 : vector<8x80xf32>, i32 -> vector<8x80xf32>
    %c7_50 = arith.constant 7 : index
    %c384_51 = arith.constant 384 : index
    %107 = vector.load %arg3[%c7_50, %c384_51] : memref<9x896xf32, #tpu.memory_space<vmem>>, vector<1x80xf32>
    %108 = vector.broadcast %107 : vector<1x80xf32> to vector<8x80xf32>
    %109 = arith.mulf %106, %108 : vector<8x80xf32>
    %c74_i32 = arith.constant 74 : i32
    %110 = tpu.dynamic_rotate %78 by %c74_i32 dim 1 : vector<8x80xf32>, i32 -> vector<8x80xf32>
    %c8_52 = arith.constant 8 : index
    %c384_53 = arith.constant 384 : index
    %111 = vector.load %arg3[%c8_52, %c384_53] : memref<9x896xf32, #tpu.memory_space<vmem>>, vector<1x80xf32>
    %112 = vector.broadcast %111 : vector<1x80xf32> to vector<8x80xf32>
    %113 = arith.mulf %110, %112 : vector<8x80xf32>
    %cst_54 = arith.constant 1.000000e+00 : f32
    %114 = vector.broadcast %cst_54 : f32 to vector<1x80xf32>
    %115 = tpu.concatenate %82, %86, %90, %94, %97, %101, %105, %109, %113, %114 in 0 : vector<8x80xf32>, vector<8x80xf32>, vector<8x80xf32>, vector<8x80xf32>, vector<8x80xf32>, vector<8x80xf32>, vector<8x80xf32>, vector<8x80xf32>, vector<8x80xf32>, vector<1x80xf32> -> vector<73x80xf32>
    %c0_55 = arith.constant 0 : index
    %c384_56 = arith.constant 384 : index
    %116 = vector.load %arg2[%c0_55, %c384_56] : memref<32x1792xbf16, #tpu.memory_space<vmem>>, vector<8x73xbf16>
    %117 = arith.truncf %115 : vector<73x80xf32> to vector<73x80xbf16>
    %cst_57 = arith.constant dense<0.000000e+00> : vector<8x80xf32>
    %118 = tpu.matmul %116, %117, %cst_57 {dimension_numbers = #tpu.dot_dimension_numbers<[1], [0], [0], [1], [0, 0, 1, 1], [], []>} : vector<8x73xbf16>, vector<73x80xbf16>, vector<8x80xf32> -> vector<8x80xf32>
    %cst_58 = arith.constant 0.000000e+00 : f32
    %119 = vector.broadcast %cst_58 : f32 to vector<8x80xf32>
    %120 = arith.maximumf %118, %119 : vector<8x80xf32>
    %c6_i32_59 = arith.constant 6 : i32
    %121 = tpu.dynamic_rotate %120 by %c6_i32_59 dim 1 : vector<8x80xf32>, i32 -> vector<8x80xf32>
    %c0_60 = arith.constant 0 : index
    %c384_61 = arith.constant 384 : index
    %122 = vector.load %arg3[%c0_60, %c384_61] : memref<9x896xf32, #tpu.memory_space<vmem>>, vector<1x80xf32>
    %123 = vector.broadcast %122 : vector<1x80xf32> to vector<8x80xf32>
    %124 = arith.mulf %121, %123 : vector<8x80xf32>
    %c5_i32_62 = arith.constant 5 : i32
    %125 = tpu.dynamic_rotate %120 by %c5_i32_62 dim 1 : vector<8x80xf32>, i32 -> vector<8x80xf32>
    %c1_63 = arith.constant 1 : index
    %c384_64 = arith.constant 384 : index
    %126 = vector.load %arg3[%c1_63, %c384_64] : memref<9x896xf32, #tpu.memory_space<vmem>>, vector<1x80xf32>
    %127 = vector.broadcast %126 : vector<1x80xf32> to vector<8x80xf32>
    %128 = arith.mulf %125, %127 : vector<8x80xf32>
    %c4_i32_65 = arith.constant 4 : i32
    %129 = tpu.dynamic_rotate %120 by %c4_i32_65 dim 1 : vector<8x80xf32>, i32 -> vector<8x80xf32>
    %c2_66 = arith.constant 2 : index
    %c384_67 = arith.constant 384 : index
    %130 = vector.load %arg3[%c2_66, %c384_67] : memref<9x896xf32, #tpu.memory_space<vmem>>, vector<1x80xf32>
    %131 = vector.broadcast %130 : vector<1x80xf32> to vector<8x80xf32>
    %132 = arith.mulf %129, %131 : vector<8x80xf32>
    %c1_i32_68 = arith.constant 1 : i32
    %133 = tpu.dynamic_rotate %120 by %c1_i32_68 dim 1 : vector<8x80xf32>, i32 -> vector<8x80xf32>
    %c3_69 = arith.constant 3 : index
    %c384_70 = arith.constant 384 : index
    %134 = vector.load %arg3[%c3_69, %c384_70] : memref<9x896xf32, #tpu.memory_space<vmem>>, vector<1x80xf32>
    %135 = vector.broadcast %134 : vector<1x80xf32> to vector<8x80xf32>
    %136 = arith.mulf %133, %135 : vector<8x80xf32>
    %c4_71 = arith.constant 4 : index
    %c384_72 = arith.constant 384 : index
    %137 = vector.load %arg3[%c4_71, %c384_72] : memref<9x896xf32, #tpu.memory_space<vmem>>, vector<1x80xf32>
    %138 = vector.broadcast %137 : vector<1x80xf32> to vector<8x80xf32>
    %139 = arith.mulf %120, %138 : vector<8x80xf32>
    %c79_i32_73 = arith.constant 79 : i32
    %140 = tpu.dynamic_rotate %120 by %c79_i32_73 dim 1 : vector<8x80xf32>, i32 -> vector<8x80xf32>
    %c5_74 = arith.constant 5 : index
    %c384_75 = arith.constant 384 : index
    %141 = vector.load %arg3[%c5_74, %c384_75] : memref<9x896xf32, #tpu.memory_space<vmem>>, vector<1x80xf32>
    %142 = vector.broadcast %141 : vector<1x80xf32> to vector<8x80xf32>
    %143 = arith.mulf %140, %142 : vector<8x80xf32>
    %c76_i32_76 = arith.constant 76 : i32
    %144 = tpu.dynamic_rotate %120 by %c76_i32_76 dim 1 : vector<8x80xf32>, i32 -> vector<8x80xf32>
    %c6_77 = arith.constant 6 : index
    %c384_78 = arith.constant 384 : index
    %145 = vector.load %arg3[%c6_77, %c384_78] : memref<9x896xf32, #tpu.memory_space<vmem>>, vector<1x80xf32>
    %146 = vector.broadcast %145 : vector<1x80xf32> to vector<8x80xf32>
    %147 = arith.mulf %144, %146 : vector<8x80xf32>
    %c75_i32_79 = arith.constant 75 : i32
    %148 = tpu.dynamic_rotate %120 by %c75_i32_79 dim 1 : vector<8x80xf32>, i32 -> vector<8x80xf32>
    %c7_80 = arith.constant 7 : index
    %c384_81 = arith.constant 384 : index
    %149 = vector.load %arg3[%c7_80, %c384_81] : memref<9x896xf32, #tpu.memory_space<vmem>>, vector<1x80xf32>
    %150 = vector.broadcast %149 : vector<1x80xf32> to vector<8x80xf32>
    %151 = arith.mulf %148, %150 : vector<8x80xf32>
    %c74_i32_82 = arith.constant 74 : i32
    %152 = tpu.dynamic_rotate %120 by %c74_i32_82 dim 1 : vector<8x80xf32>, i32 -> vector<8x80xf32>
    %c8_83 = arith.constant 8 : index
    %c384_84 = arith.constant 384 : index
    %153 = vector.load %arg3[%c8_83, %c384_84] : memref<9x896xf32, #tpu.memory_space<vmem>>, vector<1x80xf32>
    %154 = vector.broadcast %153 : vector<1x80xf32> to vector<8x80xf32>
    %155 = arith.mulf %152, %154 : vector<8x80xf32>
    %cst_85 = arith.constant 1.000000e+00 : f32
    %156 = vector.broadcast %cst_85 : f32 to vector<1x80xf32>
    %157 = tpu.concatenate %124, %128, %132, %136, %139, %143, %147, %151, %155, %156 in 0 : vector<8x80xf32>, vector<8x80xf32>, vector<8x80xf32>, vector<8x80xf32>, vector<8x80xf32>, vector<8x80xf32>, vector<8x80xf32>, vector<8x80xf32>, vector<8x80xf32>, vector<1x80xf32> -> vector<73x80xf32>
    %c0_86 = arith.constant 0 : index
    %c512 = arith.constant 512 : index
    %158 = vector.load %arg2[%c0_86, %c512] : memref<32x1792xbf16, #tpu.memory_space<vmem>>, vector<8x73xbf16>
    %159 = arith.truncf %157 : vector<73x80xf32> to vector<73x80xbf16>
    %cst_87 = arith.constant dense<0.000000e+00> : vector<8x80xf32>
    %160 = tpu.matmul %158, %159, %cst_87 {dimension_numbers = #tpu.dot_dimension_numbers<[1], [0], [0], [1], [0, 0, 1, 1], [], []>} : vector<8x73xbf16>, vector<73x80xbf16>, vector<8x80xf32> -> vector<8x80xf32>
    %cst_88 = arith.constant 0.000000e+00 : f32
    %161 = vector.broadcast %cst_88 : f32 to vector<8x80xf32>
    %162 = arith.maximumf %160, %161 : vector<8x80xf32>
    %c79_i32_89 = arith.constant 79 : i32
    %163 = tpu.dynamic_rotate %162 by %c79_i32_89 dim 1 : vector<8x80xf32>, i32 -> vector<8x80xf32>
    %164 = arith.maximumf %162, %163 : vector<8x80xf32>
    %c75_i32_90 = arith.constant 75 : i32
    %165 = tpu.dynamic_rotate %164 by %c75_i32_90 dim 1 : vector<8x80xf32>, i32 -> vector<8x80xf32>
    %166 = arith.maximumf %164, %165 : vector<8x80xf32>
    %167 = arith.truncf %166 : vector<8x80xf32> to vector<8x80xbf16>
    %c0_91 = arith.constant 0 : index
    %c0_92 = arith.constant 0 : index
    %168 = vector.load %arg7[%c0_91, %c0_92] : memref<80x16xbf16, #tpu.memory_space<vmem>>, vector<80x16xbf16>
    %cst_93 = arith.constant dense<0.000000e+00> : vector<8x16xf32>
    %169 = tpu.matmul %167, %168, %cst_93 {dimension_numbers = #tpu.dot_dimension_numbers<[1], [0], [0], [1], [0, 0, 1, 1], [], []>} : vector<8x80xbf16>, vector<80x16xbf16>, vector<8x16xf32> -> vector<8x16xf32>
    %c3_i32 = arith.constant 3 : i32
    %170 = tpu.dynamic_rotate %169 by %c3_i32 dim 1 : vector<8x16xf32>, i32 -> vector<8x16xf32>
    %c0_94 = arith.constant 0 : index
    %c512_95 = arith.constant 512 : index
    %171 = vector.load %arg3[%c0_94, %c512_95] : memref<9x896xf32, #tpu.memory_space<vmem>>, vector<1x16xf32>
    %172 = vector.broadcast %171 : vector<1x16xf32> to vector<8x16xf32>
    %173 = arith.mulf %170, %172 : vector<8x16xf32>
    %c2_i32 = arith.constant 2 : i32
    %174 = tpu.dynamic_rotate %169 by %c2_i32 dim 1 : vector<8x16xf32>, i32 -> vector<8x16xf32>
    %c1_96 = arith.constant 1 : index
    %c512_97 = arith.constant 512 : index
    %175 = vector.load %arg3[%c1_96, %c512_97] : memref<9x896xf32, #tpu.memory_space<vmem>>, vector<1x16xf32>
    %176 = vector.broadcast %175 : vector<1x16xf32> to vector<8x16xf32>
    %177 = arith.mulf %174, %176 : vector<8x16xf32>
    %c1_i32_98 = arith.constant 1 : i32
    %178 = tpu.dynamic_rotate %169 by %c1_i32_98 dim 1 : vector<8x16xf32>, i32 -> vector<8x16xf32>
    %c2_99 = arith.constant 2 : index
    %c512_100 = arith.constant 512 : index
    %179 = vector.load %arg3[%c2_99, %c512_100] : memref<9x896xf32, #tpu.memory_space<vmem>>, vector<1x16xf32>
    %180 = vector.broadcast %179 : vector<1x16xf32> to vector<8x16xf32>
    %181 = arith.mulf %178, %180 : vector<8x16xf32>
    %c1_i32_101 = arith.constant 1 : i32
    %182 = tpu.dynamic_rotate %169 by %c1_i32_101 dim 1 : vector<8x16xf32>, i32 -> vector<8x16xf32>
    %c3_102 = arith.constant 3 : index
    %c512_103 = arith.constant 512 : index
    %183 = vector.load %arg3[%c3_102, %c512_103] : memref<9x896xf32, #tpu.memory_space<vmem>>, vector<1x16xf32>
    %184 = vector.broadcast %183 : vector<1x16xf32> to vector<8x16xf32>
    %185 = arith.mulf %182, %184 : vector<8x16xf32>
    %c4_104 = arith.constant 4 : index
    %c512_105 = arith.constant 512 : index
    %186 = vector.load %arg3[%c4_104, %c512_105] : memref<9x896xf32, #tpu.memory_space<vmem>>, vector<1x16xf32>
    %187 = vector.broadcast %186 : vector<1x16xf32> to vector<8x16xf32>
    %188 = arith.mulf %169, %187 : vector<8x16xf32>
    %c15_i32 = arith.constant 15 : i32
    %189 = tpu.dynamic_rotate %169 by %c15_i32 dim 1 : vector<8x16xf32>, i32 -> vector<8x16xf32>
    %c5_106 = arith.constant 5 : index
    %c512_107 = arith.constant 512 : index
    %190 = vector.load %arg3[%c5_106, %c512_107] : memref<9x896xf32, #tpu.memory_space<vmem>>, vector<1x16xf32>
    %191 = vector.broadcast %190 : vector<1x16xf32> to vector<8x16xf32>
    %192 = arith.mulf %189, %191 : vector<8x16xf32>
    %c15_i32_108 = arith.constant 15 : i32
    %193 = tpu.dynamic_rotate %169 by %c15_i32_108 dim 1 : vector<8x16xf32>, i32 -> vector<8x16xf32>
    %c6_109 = arith.constant 6 : index
    %c512_110 = arith.constant 512 : index
    %194 = vector.load %arg3[%c6_109, %c512_110] : memref<9x896xf32, #tpu.memory_space<vmem>>, vector<1x16xf32>
    %195 = vector.broadcast %194 : vector<1x16xf32> to vector<8x16xf32>
    %196 = arith.mulf %193, %195 : vector<8x16xf32>
    %c14_i32 = arith.constant 14 : i32
    %197 = tpu.dynamic_rotate %169 by %c14_i32 dim 1 : vector<8x16xf32>, i32 -> vector<8x16xf32>
    %c7_111 = arith.constant 7 : index
    %c512_112 = arith.constant 512 : index
    %198 = vector.load %arg3[%c7_111, %c512_112] : memref<9x896xf32, #tpu.memory_space<vmem>>, vector<1x16xf32>
    %199 = vector.broadcast %198 : vector<1x16xf32> to vector<8x16xf32>
    %200 = arith.mulf %197, %199 : vector<8x16xf32>
    %c13_i32 = arith.constant 13 : i32
    %201 = tpu.dynamic_rotate %169 by %c13_i32 dim 1 : vector<8x16xf32>, i32 -> vector<8x16xf32>
    %c8_113 = arith.constant 8 : index
    %c512_114 = arith.constant 512 : index
    %202 = vector.load %arg3[%c8_113, %c512_114] : memref<9x896xf32, #tpu.memory_space<vmem>>, vector<1x16xf32>
    %203 = vector.broadcast %202 : vector<1x16xf32> to vector<8x16xf32>
    %204 = arith.mulf %201, %203 : vector<8x16xf32>
    %cst_115 = arith.constant 1.000000e+00 : f32
    %205 = vector.broadcast %cst_115 : f32 to vector<1x16xf32>
    %206 = tpu.concatenate %173, %177, %181, %185, %188, %192, %196, %200, %204, %205 in 0 : vector<8x16xf32>, vector<8x16xf32>, vector<8x16xf32>, vector<8x16xf32>, vector<8x16xf32>, vector<8x16xf32>, vector<8x16xf32>, vector<8x16xf32>, vector<8x16xf32>, vector<1x16xf32> -> vector<73x16xf32>
    %c0_116 = arith.constant 0 : index
    %c640 = arith.constant 640 : index
    %207 = vector.load %arg2[%c0_116, %c640] : memref<32x1792xbf16, #tpu.memory_space<vmem>>, vector<16x73xbf16>
    %208 = arith.truncf %206 : vector<73x16xf32> to vector<73x16xbf16>
    %cst_117 = arith.constant dense<0.000000e+00> : vector<16x16xf32>
    %209 = tpu.matmul %207, %208, %cst_117 {dimension_numbers = #tpu.dot_dimension_numbers<[1], [0], [0], [1], [0, 0, 1, 1], [], []>} : vector<16x73xbf16>, vector<73x16xbf16>, vector<16x16xf32> -> vector<16x16xf32>
    %cst_118 = arith.constant 0.000000e+00 : f32
    %210 = vector.broadcast %cst_118 : f32 to vector<16x16xf32>
    %211 = arith.maximumf %209, %210 : vector<16x16xf32>
    %c3_i32_119 = arith.constant 3 : i32
    %212 = tpu.dynamic_rotate %211 by %c3_i32_119 dim 1 : vector<16x16xf32>, i32 -> vector<16x16xf32>
    %c0_120 = arith.constant 0 : index
    %c512_121 = arith.constant 512 : index
    %213 = vector.load %arg3[%c0_120, %c512_121] : memref<9x896xf32, #tpu.memory_space<vmem>>, vector<1x16xf32>
    %214 = vector.broadcast %213 : vector<1x16xf32> to vector<16x16xf32>
    %215 = arith.mulf %212, %214 : vector<16x16xf32>
    %c2_i32_122 = arith.constant 2 : i32
    %216 = tpu.dynamic_rotate %211 by %c2_i32_122 dim 1 : vector<16x16xf32>, i32 -> vector<16x16xf32>
    %c1_123 = arith.constant 1 : index
    %c512_124 = arith.constant 512 : index
    %217 = vector.load %arg3[%c1_123, %c512_124] : memref<9x896xf32, #tpu.memory_space<vmem>>, vector<1x16xf32>
    %218 = vector.broadcast %217 : vector<1x16xf32> to vector<16x16xf32>
    %219 = arith.mulf %216, %218 : vector<16x16xf32>
    %c1_i32_125 = arith.constant 1 : i32
    %220 = tpu.dynamic_rotate %211 by %c1_i32_125 dim 1 : vector<16x16xf32>, i32 -> vector<16x16xf32>
    %c2_126 = arith.constant 2 : index
    %c512_127 = arith.constant 512 : index
    %221 = vector.load %arg3[%c2_126, %c512_127] : memref<9x896xf32, #tpu.memory_space<vmem>>, vector<1x16xf32>
    %222 = vector.broadcast %221 : vector<1x16xf32> to vector<16x16xf32>
    %223 = arith.mulf %220, %222 : vector<16x16xf32>
    %c1_i32_128 = arith.constant 1 : i32
    %224 = tpu.dynamic_rotate %211 by %c1_i32_128 dim 1 : vector<16x16xf32>, i32 -> vector<16x16xf32>
    %c3_129 = arith.constant 3 : index
    %c512_130 = arith.constant 512 : index
    %225 = vector.load %arg3[%c3_129, %c512_130] : memref<9x896xf32, #tpu.memory_space<vmem>>, vector<1x16xf32>
    %226 = vector.broadcast %225 : vector<1x16xf32> to vector<16x16xf32>
    %227 = arith.mulf %224, %226 : vector<16x16xf32>
    %c4_131 = arith.constant 4 : index
    %c512_132 = arith.constant 512 : index
    %228 = vector.load %arg3[%c4_131, %c512_132] : memref<9x896xf32, #tpu.memory_space<vmem>>, vector<1x16xf32>
    %229 = vector.broadcast %228 : vector<1x16xf32> to vector<16x16xf32>
    %230 = arith.mulf %211, %229 : vector<16x16xf32>
    %c15_i32_133 = arith.constant 15 : i32
    %231 = tpu.dynamic_rotate %211 by %c15_i32_133 dim 1 : vector<16x16xf32>, i32 -> vector<16x16xf32>
    %c5_134 = arith.constant 5 : index
    %c512_135 = arith.constant 512 : index
    %232 = vector.load %arg3[%c5_134, %c512_135] : memref<9x896xf32, #tpu.memory_space<vmem>>, vector<1x16xf32>
    %233 = vector.broadcast %232 : vector<1x16xf32> to vector<16x16xf32>
    %234 = arith.mulf %231, %233 : vector<16x16xf32>
    %c15_i32_136 = arith.constant 15 : i32
    %235 = tpu.dynamic_rotate %211 by %c15_i32_136 dim 1 : vector<16x16xf32>, i32 -> vector<16x16xf32>
    %c6_137 = arith.constant 6 : index
    %c512_138 = arith.constant 512 : index
    %236 = vector.load %arg3[%c6_137, %c512_138] : memref<9x896xf32, #tpu.memory_space<vmem>>, vector<1x16xf32>
    %237 = vector.broadcast %236 : vector<1x16xf32> to vector<16x16xf32>
    %238 = arith.mulf %235, %237 : vector<16x16xf32>
    %c14_i32_139 = arith.constant 14 : i32
    %239 = tpu.dynamic_rotate %211 by %c14_i32_139 dim 1 : vector<16x16xf32>, i32 -> vector<16x16xf32>
    %c7_140 = arith.constant 7 : index
    %c512_141 = arith.constant 512 : index
    %240 = vector.load %arg3[%c7_140, %c512_141] : memref<9x896xf32, #tpu.memory_space<vmem>>, vector<1x16xf32>
    %241 = vector.broadcast %240 : vector<1x16xf32> to vector<16x16xf32>
    %242 = arith.mulf %239, %241 : vector<16x16xf32>
    %c13_i32_142 = arith.constant 13 : i32
    %243 = tpu.dynamic_rotate %211 by %c13_i32_142 dim 1 : vector<16x16xf32>, i32 -> vector<16x16xf32>
    %c8_143 = arith.constant 8 : index
    %c512_144 = arith.constant 512 : index
    %244 = vector.load %arg3[%c8_143, %c512_144] : memref<9x896xf32, #tpu.memory_space<vmem>>, vector<1x16xf32>
    %245 = vector.broadcast %244 : vector<1x16xf32> to vector<16x16xf32>
    %246 = arith.mulf %243, %245 : vector<16x16xf32>
    %cst_145 = arith.constant 1.000000e+00 : f32
    %247 = vector.broadcast %cst_145 : f32 to vector<1x16xf32>
    %248 = tpu.concatenate %215, %219, %223, %227, %230, %234, %238, %242, %246, %247 in 0 : vector<16x16xf32>, vector<16x16xf32>, vector<16x16xf32>, vector<16x16xf32>, vector<16x16xf32>, vector<16x16xf32>, vector<16x16xf32>, vector<16x16xf32>, vector<16x16xf32>, vector<1x16xf32> -> vector<145x16xf32>
    %c0_146 = arith.constant 0 : index
    %c768 = arith.constant 768 : index
    %249 = vector.load %arg2[%c0_146, %c768] : memref<32x1792xbf16, #tpu.memory_space<vmem>>, vector<16x145xbf16>
    %250 = arith.truncf %248 : vector<145x16xf32> to vector<145x16xbf16>
    %cst_147 = arith.constant dense<0.000000e+00> : vector<16x16xf32>
    %251 = tpu.matmul %249, %250, %cst_147 {dimension_numbers = #tpu.dot_dimension_numbers<[1], [0], [0], [1], [0, 0, 1, 1], [], []>} : vector<16x145xbf16>, vector<145x16xbf16>, vector<16x16xf32> -> vector<16x16xf32>
    %cst_148 = arith.constant 0.000000e+00 : f32
    %252 = vector.broadcast %cst_148 : f32 to vector<16x16xf32>
    %253 = arith.maximumf %251, %252 : vector<16x16xf32>
    %c15_i32_149 = arith.constant 15 : i32
    %254 = tpu.dynamic_rotate %253 by %c15_i32_149 dim 1 : vector<16x16xf32>, i32 -> vector<16x16xf32>
    %255 = arith.maximumf %253, %254 : vector<16x16xf32>
    %c14_i32_150 = arith.constant 14 : i32
    %256 = tpu.dynamic_rotate %255 by %c14_i32_150 dim 1 : vector<16x16xf32>, i32 -> vector<16x16xf32>
    %257 = arith.maximumf %255, %256 : vector<16x16xf32>
    %258 = arith.truncf %257 : vector<16x16xf32> to vector<16x16xbf16>
    %c0_151 = arith.constant 0 : index
    %c0_152 = arith.constant 0 : index
    %259 = vector.load %arg8[%c0_151, %c0_152] : memref<16x4xbf16, #tpu.memory_space<vmem>>, vector<16x4xbf16>
    %cst_153 = arith.constant dense<0.000000e+00> : vector<16x4xf32>
    %260 = tpu.matmul %258, %259, %cst_153 {dimension_numbers = #tpu.dot_dimension_numbers<[1], [0], [0], [1], [0, 0, 1, 1], [], []>} : vector<16x16xbf16>, vector<16x4xbf16>, vector<16x4xf32> -> vector<16x4xf32>
    %c1_i32_154 = arith.constant 1 : i32
    %261 = tpu.dynamic_rotate %260 by %c1_i32_154 dim 1 : vector<16x4xf32>, i32 -> vector<16x4xf32>
    %c0_155 = arith.constant 0 : index
    %c640_156 = arith.constant 640 : index
    %262 = vector.load %arg3[%c0_155, %c640_156] : memref<9x896xf32, #tpu.memory_space<vmem>>, vector<1x4xf32>
    %263 = vector.broadcast %262 : vector<1x4xf32> to vector<16x4xf32>
    %264 = arith.mulf %261, %263 : vector<16x4xf32>
    %c1_157 = arith.constant 1 : index
    %c640_158 = arith.constant 640 : index
    %265 = vector.load %arg3[%c1_157, %c640_158] : memref<9x896xf32, #tpu.memory_space<vmem>>, vector<1x4xf32>
    %266 = vector.broadcast %265 : vector<1x4xf32> to vector<16x4xf32>
    %267 = arith.mulf %260, %266 : vector<16x4xf32>
    %c3_i32_159 = arith.constant 3 : i32
    %268 = tpu.dynamic_rotate %260 by %c3_i32_159 dim 1 : vector<16x4xf32>, i32 -> vector<16x4xf32>
    %c2_160 = arith.constant 2 : index
    %c640_161 = arith.constant 640 : index
    %269 = vector.load %arg3[%c2_160, %c640_161] : memref<9x896xf32, #tpu.memory_space<vmem>>, vector<1x4xf32>
    %270 = vector.broadcast %269 : vector<1x4xf32> to vector<16x4xf32>
    %271 = arith.mulf %268, %270 : vector<16x4xf32>
    %cst_162 = arith.constant 1.000000e+00 : f32
    %272 = vector.broadcast %cst_162 : f32 to vector<1x4xf32>
    %273 = tpu.concatenate %264, %267, %271, %272 in 0 : vector<16x4xf32>, vector<16x4xf32>, vector<16x4xf32>, vector<1x4xf32> -> vector<49x4xf32>
    %c0_163 = arith.constant 0 : index
    %c1024 = arith.constant 1024 : index
    %274 = vector.load %arg2[%c0_163, %c1024] : memref<32x1792xbf16, #tpu.memory_space<vmem>>, vector<16x49xbf16>
    %275 = arith.truncf %273 : vector<49x4xf32> to vector<49x4xbf16>
    %cst_164 = arith.constant dense<0.000000e+00> : vector<16x4xf32>
    %276 = tpu.matmul %274, %275, %cst_164 {dimension_numbers = #tpu.dot_dimension_numbers<[1], [0], [0], [1], [0, 0, 1, 1], [], []>} : vector<16x49xbf16>, vector<49x4xbf16>, vector<16x4xf32> -> vector<16x4xf32>
    %cst_165 = arith.constant 0.000000e+00 : f32
    %277 = vector.broadcast %cst_165 : f32 to vector<16x4xf32>
    %278 = arith.maximumf %276, %277 : vector<16x4xf32>
    %c1_i32_166 = arith.constant 1 : i32
    %279 = tpu.dynamic_rotate %278 by %c1_i32_166 dim 1 : vector<16x4xf32>, i32 -> vector<16x4xf32>
    %c0_167 = arith.constant 0 : index
    %c640_168 = arith.constant 640 : index
    %280 = vector.load %arg3[%c0_167, %c640_168] : memref<9x896xf32, #tpu.memory_space<vmem>>, vector<1x4xf32>
    %281 = vector.broadcast %280 : vector<1x4xf32> to vector<16x4xf32>
    %282 = arith.mulf %279, %281 : vector<16x4xf32>
    %c1_169 = arith.constant 1 : index
    %c640_170 = arith.constant 640 : index
    %283 = vector.load %arg3[%c1_169, %c640_170] : memref<9x896xf32, #tpu.memory_space<vmem>>, vector<1x4xf32>
    %284 = vector.broadcast %283 : vector<1x4xf32> to vector<16x4xf32>
    %285 = arith.mulf %278, %284 : vector<16x4xf32>
    %c3_i32_171 = arith.constant 3 : i32
    %286 = tpu.dynamic_rotate %278 by %c3_i32_171 dim 1 : vector<16x4xf32>, i32 -> vector<16x4xf32>
    %c2_172 = arith.constant 2 : index
    %c640_173 = arith.constant 640 : index
    %287 = vector.load %arg3[%c2_172, %c640_173] : memref<9x896xf32, #tpu.memory_space<vmem>>, vector<1x4xf32>
    %288 = vector.broadcast %287 : vector<1x4xf32> to vector<16x4xf32>
    %289 = arith.mulf %286, %288 : vector<16x4xf32>
    %cst_174 = arith.constant 1.000000e+00 : f32
    %290 = vector.broadcast %cst_174 : f32 to vector<1x4xf32>
    %291 = tpu.concatenate %282, %285, %289, %290 in 0 : vector<16x4xf32>, vector<16x4xf32>, vector<16x4xf32>, vector<1x4xf32> -> vector<49x4xf32>
    %c0_175 = arith.constant 0 : index
    %c1152 = arith.constant 1152 : index
    %292 = vector.load %arg2[%c0_175, %c1152] : memref<32x1792xbf16, #tpu.memory_space<vmem>>, vector<16x49xbf16>
    %293 = arith.truncf %291 : vector<49x4xf32> to vector<49x4xbf16>
    %cst_176 = arith.constant dense<0.000000e+00> : vector<16x4xf32>
    %294 = tpu.matmul %292, %293, %cst_176 {dimension_numbers = #tpu.dot_dimension_numbers<[1], [0], [0], [1], [0, 0, 1, 1], [], []>} : vector<16x49xbf16>, vector<49x4xbf16>, vector<16x4xf32> -> vector<16x4xf32>
    %cst_177 = arith.constant 0.000000e+00 : f32
    %295 = vector.broadcast %cst_177 : f32 to vector<16x4xf32>
    %296 = arith.maximumf %294, %295 : vector<16x4xf32>
    %c3_i32_178 = arith.constant 3 : i32
    %297 = tpu.dynamic_rotate %296 by %c3_i32_178 dim 1 : vector<16x4xf32>, i32 -> vector<16x4xf32>
    %298 = arith.maximumf %296, %297 : vector<16x4xf32>
    %299 = arith.truncf %298 : vector<16x4xf32> to vector<16x4xbf16>
    %c0_179 = arith.constant 0 : index
    %c0_180 = arith.constant 0 : index
    %300 = vector.load %arg9[%c0_179, %c0_180] : memref<4x2xbf16, #tpu.memory_space<vmem>>, vector<4x2xbf16>
    %cst_181 = arith.constant dense<0.000000e+00> : vector<16x2xf32>
    %301 = tpu.matmul %299, %300, %cst_181 {dimension_numbers = #tpu.dot_dimension_numbers<[1], [0], [0], [1], [0, 0, 1, 1], [], []>} : vector<16x4xbf16>, vector<4x2xbf16>, vector<16x2xf32> -> vector<16x2xf32>
    %c1_i32_182 = arith.constant 1 : i32
    %302 = tpu.dynamic_rotate %301 by %c1_i32_182 dim 1 : vector<16x2xf32>, i32 -> vector<16x2xf32>
    %c0_183 = arith.constant 0 : index
    %c768_184 = arith.constant 768 : index
    %303 = vector.load %arg3[%c0_183, %c768_184] : memref<9x896xf32, #tpu.memory_space<vmem>>, vector<1x2xf32>
    %304 = vector.broadcast %303 : vector<1x2xf32> to vector<16x2xf32>
    %305 = arith.mulf %302, %304 : vector<16x2xf32>
    %c1_185 = arith.constant 1 : index
    %c768_186 = arith.constant 768 : index
    %306 = vector.load %arg3[%c1_185, %c768_186] : memref<9x896xf32, #tpu.memory_space<vmem>>, vector<1x2xf32>
    %307 = vector.broadcast %306 : vector<1x2xf32> to vector<16x2xf32>
    %308 = arith.mulf %301, %307 : vector<16x2xf32>
    %c1_i32_187 = arith.constant 1 : i32
    %309 = tpu.dynamic_rotate %301 by %c1_i32_187 dim 1 : vector<16x2xf32>, i32 -> vector<16x2xf32>
    %c2_188 = arith.constant 2 : index
    %c768_189 = arith.constant 768 : index
    %310 = vector.load %arg3[%c2_188, %c768_189] : memref<9x896xf32, #tpu.memory_space<vmem>>, vector<1x2xf32>
    %311 = vector.broadcast %310 : vector<1x2xf32> to vector<16x2xf32>
    %312 = arith.mulf %309, %311 : vector<16x2xf32>
    %cst_190 = arith.constant 1.000000e+00 : f32
    %313 = vector.broadcast %cst_190 : f32 to vector<1x2xf32>
    %314 = tpu.concatenate %305, %308, %312, %313 in 0 : vector<16x2xf32>, vector<16x2xf32>, vector<16x2xf32>, vector<1x2xf32> -> vector<49x2xf32>
    %c0_191 = arith.constant 0 : index
    %c1280 = arith.constant 1280 : index
    %315 = vector.load %arg2[%c0_191, %c1280] : memref<32x1792xbf16, #tpu.memory_space<vmem>>, vector<32x49xbf16>
    %316 = arith.truncf %314 : vector<49x2xf32> to vector<49x2xbf16>
    %cst_192 = arith.constant dense<0.000000e+00> : vector<32x2xf32>
    %317 = tpu.matmul %315, %316, %cst_192 {dimension_numbers = #tpu.dot_dimension_numbers<[1], [0], [0], [1], [0, 0, 1, 1], [], []>} : vector<32x49xbf16>, vector<49x2xbf16>, vector<32x2xf32> -> vector<32x2xf32>
    %cst_193 = arith.constant 0.000000e+00 : f32
    %318 = vector.broadcast %cst_193 : f32 to vector<32x2xf32>
    %319 = arith.maximumf %317, %318 : vector<32x2xf32>
    %c1_i32_194 = arith.constant 1 : i32
    %320 = tpu.dynamic_rotate %319 by %c1_i32_194 dim 1 : vector<32x2xf32>, i32 -> vector<32x2xf32>
    %c0_195 = arith.constant 0 : index
    %c768_196 = arith.constant 768 : index
    %321 = vector.load %arg3[%c0_195, %c768_196] : memref<9x896xf32, #tpu.memory_space<vmem>>, vector<1x2xf32>
    %322 = vector.broadcast %321 : vector<1x2xf32> to vector<32x2xf32>
    %323 = arith.mulf %320, %322 : vector<32x2xf32>
    %c1_197 = arith.constant 1 : index
    %c768_198 = arith.constant 768 : index
    %324 = vector.load %arg3[%c1_197, %c768_198] : memref<9x896xf32, #tpu.memory_space<vmem>>, vector<1x2xf32>
    %325 = vector.broadcast %324 : vector<1x2xf32> to vector<32x2xf32>
    %326 = arith.mulf %319, %325 : vector<32x2xf32>
    %c1_i32_199 = arith.constant 1 : i32
    %327 = tpu.dynamic_rotate %319 by %c1_i32_199 dim 1 : vector<32x2xf32>, i32 -> vector<32x2xf32>
    %c2_200 = arith.constant 2 : index
    %c768_201 = arith.constant 768 : index
    %328 = vector.load %arg3[%c2_200, %c768_201] : memref<9x896xf32, #tpu.memory_space<vmem>>, vector<1x2xf32>
    %329 = vector.broadcast %328 : vector<1x2xf32> to vector<32x2xf32>
    %330 = arith.mulf %327, %329 : vector<32x2xf32>
    %cst_202 = arith.constant 1.000000e+00 : f32
    %331 = vector.broadcast %cst_202 : f32 to vector<1x2xf32>
    %332 = tpu.concatenate %323, %326, %330, %331 in 0 : vector<32x2xf32>, vector<32x2xf32>, vector<32x2xf32>, vector<1x2xf32> -> vector<97x2xf32>
    %c0_203 = arith.constant 0 : index
    %c1408 = arith.constant 1408 : index
    %333 = vector.load %arg2[%c0_203, %c1408] : memref<32x1792xbf16, #tpu.memory_space<vmem>>, vector<32x97xbf16>
    %334 = arith.truncf %332 : vector<97x2xf32> to vector<97x2xbf16>
    %cst_204 = arith.constant dense<0.000000e+00> : vector<32x2xf32>
    %335 = tpu.matmul %333, %334, %cst_204 {dimension_numbers = #tpu.dot_dimension_numbers<[1], [0], [0], [1], [0, 0, 1, 1], [], []>} : vector<32x97xbf16>, vector<97x2xbf16>, vector<32x2xf32> -> vector<32x2xf32>
    %cst_205 = arith.constant 0.000000e+00 : f32
    %336 = vector.broadcast %cst_205 : f32 to vector<32x2xf32>
    %337 = arith.maximumf %335, %336 : vector<32x2xf32>
    %c1_i32_206 = arith.constant 1 : i32
    %338 = tpu.dynamic_rotate %337 by %c1_i32_206 dim 1 : vector<32x2xf32>, i32 -> vector<32x2xf32>
    %339 = arith.maximumf %337, %338 : vector<32x2xf32>
    %340 = arith.truncf %339 : vector<32x2xf32> to vector<32x2xbf16>
    %c0_207 = arith.constant 0 : index
    %c0_208 = arith.constant 0 : index
    %341 = vector.load %arg10[%c0_207, %c0_208] : memref<2x1xbf16, #tpu.memory_space<vmem>>, vector<2x1xbf16>
    %cst_209 = arith.constant dense<0.000000e+00> : vector<32x1xf32>
    %342 = tpu.matmul %340, %341, %cst_209 {dimension_numbers = #tpu.dot_dimension_numbers<[1], [0], [0], [1], [0, 0, 1, 1], [], []>} : vector<32x2xbf16>, vector<2x1xbf16>, vector<32x1xf32> -> vector<32x1xf32>
    %cst_210 = arith.constant 1.000000e+00 : f32
    %343 = vector.broadcast %cst_210 : f32 to vector<1x1xf32>
    %344 = tpu.concatenate %342, %343 in 0 : vector<32x1xf32>, vector<1x1xf32> -> vector<33x1xf32>
    %c0_211 = arith.constant 0 : index
    %c1536 = arith.constant 1536 : index
    %345 = vector.load %arg2[%c0_211, %c1536] : memref<32x1792xbf16, #tpu.memory_space<vmem>>, vector<10x33xbf16>
    %346 = arith.truncf %344 : vector<33x1xf32> to vector<33x1xbf16>
    %cst_212 = arith.constant dense<0.000000e+00> : vector<10x1xf32>
    %347 = tpu.matmul %345, %346, %cst_212 {dimension_numbers = #tpu.dot_dimension_numbers<[1], [0], [0], [1], [0, 0, 1, 1], [], []>} : vector<10x33xbf16>, vector<33x1xbf16>, vector<10x1xf32> -> vector<10x1xf32>
    %cst_213 = arith.constant 0.000000e+00 : f32
    %348 = vector.broadcast %cst_213 : f32 to vector<10x1xf32>
    %349 = arith.maximumf %347, %348 : vector<10x1xf32>
    %cst_214 = arith.constant 1.000000e+00 : f32
    %350 = vector.broadcast %cst_214 : f32 to vector<1x1xf32>
    %351 = tpu.concatenate %349, %350 in 0 : vector<10x1xf32>, vector<1x1xf32> -> vector<11x1xf32>
    %c0_215 = arith.constant 0 : index
    %c1664 = arith.constant 1664 : index
    %352 = vector.load %arg2[%c0_215, %c1664] : memref<32x1792xbf16, #tpu.memory_space<vmem>>, vector<10x11xbf16>
    %353 = arith.truncf %351 : vector<11x1xf32> to vector<11x1xbf16>
    %cst_216 = arith.constant dense<0.000000e+00> : vector<10x1xf32>
    %354 = tpu.matmul %352, %353, %cst_216 {dimension_numbers = #tpu.dot_dimension_numbers<[1], [0], [0], [1], [0, 0, 1, 1], [], []>} : vector<10x11xbf16>, vector<11x1xbf16>, vector<10x1xf32> -> vector<10x1xf32>
    %355 = tpu.iota {dimensions = array<i32: 0>} : vector<10x10xi32>
    %356 = tpu.iota {dimensions = array<i32: 1>} : vector<10x10xi32>
    %357 = arith.cmpi eq, %355, %356 : vector<10x10xi32>
    %358 = arith.extui %357 : vector<10x10xi1> to vector<10x10xi32>
    %359 = arith.sitofp %358 : vector<10x10xi32> to vector<10x10xf32>
    %360 = vector.broadcast %354 : vector<10x1xf32> to vector<10x10xf32>
    %361 = arith.mulf %360, %359 : vector<10x10xf32>
    %cst_217 = arith.constant dense<0.000000e+00> : vector<10xf32>
    %362 = vector.multi_reduction <add>, %361, %cst_217 [0] : vector<10x10xf32> to vector<10xf32>
    %363 = vector.shape_cast %362 : vector<10xf32> to vector<1x10xf32>
    %cst_218 = arith.constant dense<0xFF800000> : vector<1xf32>
    %364 = vector.multi_reduction <maximumf>, %363, %cst_218 [1] : vector<1x10xf32> to vector<1xf32>
    %365 = vector.shape_cast %364 : vector<1xf32> to vector<1x1xf32>
    %366 = vector.broadcast %365 : vector<1x1xf32> to vector<1x10xf32>
    %367 = arith.subf %363, %366 : vector<1x10xf32>
    %368 = math.exp %367 : vector<1x10xf32>
    %cst_219 = arith.constant dense<0.000000e+00> : vector<1xf32>
    %369 = vector.multi_reduction <add>, %368, %cst_219 [1] : vector<1x10xf32> to vector<1xf32>
    %370 = vector.shape_cast %369 : vector<1xf32> to vector<1x1xf32>
    %371 = vector.broadcast %370 : vector<1x1xf32> to vector<1x10xf32>
    %372 = arith.divf %368, %371 : vector<1x10xf32>
    %c0_220 = arith.constant 0 : index
    %c0_221 = arith.constant 0 : index
    %c0_222 = arith.constant 0 : index
    %373 = vector.load %arg11[%c0_220, %c0_221, %c0_222] : memref<1x1x10xf32, #tpu.memory_space<vmem>>, vector<1x1x10xf32>
    %374 = vector.shape_cast %373 : vector<1x1x10xf32> to vector<1x10xf32>
    %375 = vector.shape_cast %372 : vector<1x10xf32> to vector<1x1x10xf32>
    tpu.vector_store %arg11[%c0_220, %c0_221, %c0_222], %375 {strides = array<i32>} : memref<1x1x10xf32, #tpu.memory_space<vmem>>, vector<1x1x10xf32>,
    return
  }
  func.func @transform_0(%arg0: i32) -> (i32, i32, i32) {
    %c0_i32 = arith.constant 0 : i32
    %c0_i32_0 = arith.constant 0 : i32
    %c0_i32_1 = arith.constant 0 : i32
    return %arg0, %c0_i32, %c0_i32_0 : i32, i32, i32
  }
  func.func @transform_1(%arg0: i32) -> (i32, i32) {
    %c0_i32 = arith.constant 0 : i32
    %c0_i32_0 = arith.constant 0 : i32
    %c0_i32_1 = arith.constant 0 : i32
    return %c0_i32, %c0_i32_0 : i32, i32
  }
  func.func @transform_2(%arg0: i32) -> (i32, i32) {
    %c0_i32 = arith.constant 0 : i32
    %c0_i32_0 = arith.constant 0 : i32
    %c0_i32_1 = arith.constant 0 : i32
    return %c0_i32, %c0_i32_0 : i32, i32
  }
  func.func @transform_3(%arg0: i32) -> (i32, i32) {
    %c0_i32 = arith.constant 0 : i32
    %c0_i32_0 = arith.constant 0 : i32
    %c0_i32_1 = arith.constant 0 : i32
    return %c0_i32, %c0_i32_0 : i32, i32
  }
  func.func @transform_4(%arg0: i32) -> (i32, i32) {
    %c0_i32 = arith.constant 0 : i32
    %c0_i32_0 = arith.constant 0 : i32
    %c0_i32_1 = arith.constant 0 : i32
    return %c0_i32, %c0_i32_0 : i32, i32
  }
  func.func @transform_5(%arg0: i32) -> (i32, i32) {
    %c0_i32 = arith.constant 0 : i32
    %c0_i32_0 = arith.constant 0 : i32
    %c0_i32_1 = arith.constant 0 : i32
    return %c0_i32, %c0_i32_0 : i32, i32
  }
  func.func @transform_6(%arg0: i32) -> (i32, i32) {
    %c0_i32 = arith.constant 0 : i32
    %c0_i32_0 = arith.constant 0 : i32
    %c0_i32_1 = arith.constant 0 : i32
    return %c0_i32, %c0_i32_0 : i32, i32
  }
  func.func @transform_7(%arg0: i32) -> (i32, i32) {
    %c0_i32 = arith.constant 0 : i32
    %c0_i32_0 = arith.constant 0 : i32
    %c0_i32_1 = arith.constant 0 : i32
    return %c0_i32, %c0_i32_0 : i32, i32
  }
  func.func @transform_8(%arg0: i32) -> (i32, i32) {
    %c0_i32 = arith.constant 0 : i32
    %c0_i32_0 = arith.constant 0 : i32
    %c0_i32_1 = arith.constant 0 : i32
    return %c0_i32, %c0_i32_0 : i32, i32
  }
  func.func @transform_9(%arg0: i32) -> (i32, i32) {
    %c0_i32 = arith.constant 0 : i32
    %c0_i32_0 = arith.constant 0 : i32
    %c0_i32_1 = arith.constant 0 : i32
    return %c0_i32, %c0_i32_0 : i32, i32
  }
  func.func @transform_10(%arg0: i32) -> (i32, i32, i32) {
    %c0_i32 = arith.constant 0 : i32
    %c0_i32_0 = arith.constant 0 : i32
    %c0_i32_1 = arith.constant 0 : i32
    return %arg0, %c0_i32, %c0_i32_0 : i32, i32, i32
  }
}

</mosaic_0001>

<bundles_post_ra>
// kernel: forward.1
= control target key start
LH: loop header
LB: loop body
LE: loop exit
PB: predicated region body
PF: predicated region fallthrough
CT: control target
= control target key end

     0   :  { %s5553_s0 = inlined_call_operand.vmem [shape: bf16[2,9,236], index: 0, kind: input, shape index: {}]   ;;  %s5554_s1 = inlined_call_operand.hbm [shape: bf16[32,1792], index: 1, kind: input, shape index: {}]   ;;  %s5555_s2 = inlined_call_operand.hbm [shape: f32[9,896], index: 2, kind: input, shape index: {}]   ;;  %s5556_s3 = inlined_call_operand.vmem [shape: bf16[116,352], index: 3, kind: input, shape index: {}]   ;;  %s5557_s4 = inlined_call_operand.hbm [shape: f32[32,352], index: 4, kind: input, shape index: {}]   ;;  %s5558_s5 = inlined_call_operand.hbm [shape: bf16[352,80], index: 5, kind: input, shape index: {}]   ;;  %s5559_s6 = inlined_call_operand.hbm [shape: bf16[80,16], index: 6, kind: input, shape index: {}]   ;;  %s5560_s7 = inlined_call_operand.vmem [shape: bf16[16,4], index: 7, kind: input, shape index: {}]   ;;  %s5561_s8 = inlined_call_operand.vmem [shape: bf16[4,2], index: 8, kind: input, shape index: {}]   ;;  %s5562_s9 = inlined_call_operand.vmem [shape: bf16[2,1], index: 9, kind: input, shape index: {}]   ;;  %s5563_s10 = inlined_call_operand.hbm [shape: f32[2,1,10], index: 10, kind: output, shape index: {}]  }
   0x1   :  { %5573 = sst [smem:[#allocation22_spill]] %s5554_s1 }
   0x2   :  { %5574 = sst [smem:[#allocation23_spill]] %s5555_s2 }
   0x3   :  { %5575 = sst [smem:[#allocation24_spill]] %s5558_s5 }
   0x4   :  { %15 = vsyncpa [#allocation3], 0 }
   0x5   :  { %16 = vsyncpa [#allocation6], 0 }
   0x6   :  { %17 = vsyncpa [#allocation9], 0 }
   0x7   :  { %18 = vsyncpa [#allocation4], 0 }
   0x8   :  { %20 = vsyncpa [#allocation4 + $0x1], 0  ;;  %s4533_s13 = smov 0   ;;  %s4535_s14 = smov 0  }
   0x9   :  { %s4537_s15 = smov 0   ;;  %s4539_s16 = smov 0  }
   0xa LB: > { %5576 = sst [smem:[#allocation16_spill]] %s4408_s13  ;;  %s4554_s17 = sadd.s32 4294967295, %s4420_s16   ;;  %s4420_s16 = sphi %s4539_s16, %s5596_s16   ;;  %s4416_s15 = sphi %s4537_s15, %s5598_s15   ;;  %s4412_s14 = sphi %s4535_s14, %s5600_s14   ;;  %s4408_s13 = sphi %s4533_s13, %s5599_s13  }
   0xb   : > { %5577 = sst [smem:[#allocation17_spill]] %s4416_s15  ;;  %s3301_s18 = sadd.s32 4294967294, %s4420_s16  }
   0xc   : > { %5578 = sst [smem:[#allocation18_spill]] %s4420_s16  ;;  %s4558_s19 = sadd.s32 1, %s4420_s16  }
   0xd   : > { %5579 = sst [smem:[#allocation19_spill]] %s4558_s19  ;;  %s248_s20 = sadd.s32 1, %s4416_s15 }
   0xe   : > { %s245_s21 = ssub.s32 %s4420_s16, %s4558_s19  ;;  %p258_p0 = scmp.ne.s32.totalorder %s4416_s15, %s4412_s14 }
   0xf   : > { %p246_p1 = scmp.eq.s32.totalorder %s245_s21, 0  ;;  %p259_p2 = scmp.eq.s32.totalorder %s4554_s17, 1 }
  0x10   : > { %p264_p3 = scmp.ne.s32.totalorder %s4412_s14, %s4408_s13  ;;  %p265_p4 = scmp.eq.s32.totalorder %s3301_s18, 1 }
  0x11   : > { %s4569_s22 = scalar_select %p246_p1, %s4416_s15, %s248_s20  }
  0x12   : > { %p4571_p5 = por %p259_p2, %p258_p0  ;;  %p4575_p6 = por %p265_p4, %p264_p3 }
  0x13   : > { %5580 = sst [smem:[#allocation20_spill]] %s4569_s22  ;;  %p3302_p7 = scmp.ge.s32.totalorder %s4420_s16, 1 }
  0x14   : > { %s5582_s24 = scalar_select %p4575_p6, 1, 0 }
  0x15   : > { %p272_p8 = scmp.lt.s32.totalorder %s4420_s16, 3  ;;  %p3715_p9 = scmp.eq.s32.totalorder %s4554_s17, 0 }
  0x16   : > { %5583 = sst [smem:[#allocation21_spill]] %s5582_s24  ;;  %s4422_s18 = smov [#allocation5]  }
  0x17   : > { %p4582_p10 = pnand %p3302_p7, %p272_p8  ;;  %s5585_s2 = sld [smem:[#allocation23_spill]] }
  0x18   : > { %s5586_s5 = sld [smem:[#allocation24_spill]]  ;;  %s299_s20 = sshll.u32 %s4422_s18, 4  ;;  %s300_s20 = int_to_ptr.vmem [resolvable:$true] %s299_s20 }
  0x19   : > { %p3695_p11 = pneg %p4582_p10  ;;  %s4423_s21 = smov 896  }
  0x1a   : > { %s4424_s26 = smov 56   ;;  %s4425_s27 = smov [#allocation8]  }
  0x1b   : > { %p4596_p12 = pnand %p3715_p9, %p3695_p11  ;;  %s4426_s29 = smov 64  }
  0x1c   : > { %s4427_s30 = smov 4   ;;  %s5588_s1 = sld [smem:[#allocation22_spill]] }
  0x1d   : > { %s297_s28 = sshll.u32 %s5585_s2, 4  ;;  %s330_s2 = sshll.u32 %s4425_s27, 4  ;;  %s298_s28 = int_to_ptr.hbm [resolvable:$true] %s297_s28  ;;  %s331_s2 = int_to_ptr.vmem [resolvable:$true] %s330_s2 }
  0x1e   : > { %s328_s11 = sshll.u32 %s5586_s5, 4  ;;  %s4428_s18 = smov [#allocation2]   ;;  %s329_s11 = int_to_ptr.hbm [resolvable:$true] %s328_s11 }
  0x1f   : > { %3701 = dma.hbm_to_vmem [thread:$0]  (!%p4596_p12), %s298_s28, 1792, %s300_s20, [#allocation6], %s4423_s21, %s4423_s21, %s4424_s26  }
  0x20   : > { %3707 = dma.hbm_to_vmem [thread:$0]  (!%p4596_p12), %s329_s11, 2816, %s331_s2, [#allocation9], %s4426_s29, %s4426_s29, %s4427_s30  }
  0x21   : > { %s285_s19 = sshll.u32 %s4428_s18, 4  ;;  %s314_s28 = sshll.u32 %s5557_s4, 4  ;;  %s286_s19 = int_to_ptr.vmem [resolvable:$true] %s285_s19  ;;  %s315_s28 = int_to_ptr.hbm [resolvable:$true] %s314_s28 }
  0x22   : > { %s283_s15 = sshll.u32 %s5588_s1, 4  ;;  %s4429_s20 = smov [#allocation7]   ;;  %s284_s15 = int_to_ptr.hbm [resolvable:$true] %s283_s15 }
  0x23   : > { %3698 = dma.hbm_to_vmem [thread:$0]  (!%p4596_p12), %s284_s15, 3584, %s286_s19, [#allocation3], %s4423_s21, %s4423_s21, %s4424_s26  }
  0x24   : > { %s316_s27 = sshll.u32 %s4429_s20, 4  ;;  %s4430_s2 = smov 384   ;;  %s317_s27 = int_to_ptr.vmem [resolvable:$true] %s316_s27 }
  0x25   : > { %s4431_s11 = smov 24   ;;  %s342_s18 = sshll.u32 %s5559_s6, 4  ;;  %s343_s18 = int_to_ptr.hbm [resolvable:$true] %s342_s18 }
  0x26   : > { %3704 = dma.hbm_to_vmem [thread:$0]  (!%p4596_p12), %s315_s28, 1536, %s317_s27, [#allocation6], %s4430_s2, %s4430_s2, %s4431_s11  }
  0x27   : > { %s4432_s1 = smov [#allocation10]   ;;  %377 = sbr.rel (%p4582_p10) target bundleno = 11169 (0x2ba1), region = 60 }
  0x28   : > { %s344_s16 = sshll.u32 %s4432_s1, 4  ;;  %s345_s16 = int_to_ptr.vmem [resolvable:$true] %s344_s16 }
  0x29   : > { %3710 = dma.hbm_to_vmem [thread:$0]  (!%p4596_p12), %s343_s18, 640, %s345_s16, [#allocation9], %s4426_s29, %s4426_s29, %s4427_s30  }
  0x2c   : > { %4391 = dma.done.wait (%p3715_p9), [#allocation3], 3584  }
  0x2d   : > { %4393 = vsyncadd (%p3715_p9), [#allocation3], 4294963712 }
  0x2e   : > { %4395 = dma.done.wait (%p3715_p9), [#allocation6], 3328  }
  0x2f   : > { %4397 = vsyncadd (%p3715_p9), [#allocation6], 4294963968 }
  0x30   : > { %4399 = dma.done.wait (%p3715_p9), [#allocation9], 3456  }
  0x31   : > { %4401 = vsyncadd (%p3715_p9), [#allocation9], 4294963840  ;;  %p435_p13 = scmp.lt.s32.totalorder %s4554_s17, 1  ;;  %vm454_vm0 = vcmask 1044480   ;;  %vm455_vm1 = vsmask.f32 4352 }
  0x32   : > { %vm456_vm2 = vmand %vm454_vm0, %vm455_vm1  ;;  %v459_v9 = vld [vmem:[#allocation2] sm:$0x3]  ;;  %vm460_vm3 = vcmask 80896   ;;  %s4433_s24 = smov 127   ;;  %s4434_s25 = smov 108   ;;  %vm499_vm4 = vcmask 1048416  }
  0x33   : > { %s436_s1 = scalar_select %p435_p13, %s4554_s17, 1  ;;  %vm553_vm5 = vcmask 1041408   ;;  %vm526_vm6 = vcmask 1043456   ;;  %vm554_vm7 = vcmask 1042432   ;;  %v4437_v22 = vmov 65535  }
  0x34   : > { %s4435_s12 = smov 126   ;;  %s4436_s21 = smov 10   ;;  %v555_v23 = vsel %vm553_vm5, 4294967295, %v4437_v22  ;;  %vm520_vm8 = vcmask 72704   ;;  %v3329_v38 = vld [vmem:[#allocation2 + $0x4] sm:$0xf] }
  0x35   : > { %s3608_s13 = sshll.u32 %s436_s1, 4  ;;  %v556_v26 = vsel %vm554_vm7, %v555_v23, 0  ;;  %s4438_s26 = smov 9   ;;  %v3611_v39 = vld [vmem:[#allocation2 + $0x38] sm:$0xf0]  ;;  %vm546_vm9 = vcmask 171008  }
  0x36   : > { %s439_s19 = scalar_lea.vmem %s5553_s0, %s3608_s13  ;;  %v3330_v43 = vor.u32 %v3611_v39, %v3329_v38  ;;  %v3333_v44 = vld [vmem:[#allocation2 + $0x74] sm:$0xf]  ;;  %v3612_v45 = vld [vmem:[#allocation2 + $0xa8] sm:$0xf0]  ;;  %s4439_s29 = smov 116   ;;  %vm583_vm10 = vcmask 1048480  }
  0x37   : > { %v3319_v0 = vld [vmem:[%s439_s19] sm:$0xf]  ;;  %v3610_v1 = vld [vmem:[%s439_s19 + $0x4] sm:$0x10]  ;;  %v3609_v3 = vld [vmem:[%s439_s19 + $0x4] sm:$0xf]  ;;  %v3334_v46 = vor.u32 %v3612_v45, %v3333_v44 }
  0x38   : > { %v3320_v2 = vor.u32 %v3610_v1, %v3319_v0  ;;  %v3321_v4 = vld [vmem:[%s439_s19 + $0x8] sm:$0x10]  ;;  %s4440_s30 = smov 124   ;;  %s4441_s2 = smov 85   ;;  %vm912_vm11 = vcmask 949248   ;;  %vm5571_vm12 = vcmask 785408  }
  0x39   : > { %v3324_v5 = vor.u32 %v3609_v3, %v3321_v4  ;;  %s4442_s11 = smov 86   ;;  %s4443_s5 = smov 95   ;;  %vm5572_vm13 = vcmask 1048320   ;;  %vm1108_vm14 = vcmask 703488   ;;  %vm1166_vm15 = vcmask 7168  }
  0x3a   : > { %v457_v6 = vsel %vm456_vm2, %v3320_v2, 1065369472  ;;  %s4444_s22 = smov 96   ;;  %s4445_s18 = smov 11   ;;  %vm1131_vm1 = vcmask 777216  }
  0x3b   : > { %v466_v7 = vsel %vm454_vm0, %v457_v6, 0  ;;  %v458_v8 = vsel %vm456_vm2, %v3324_v5, 1065369472  ;;  %s4446_s1 = smov 1   ;;  %s4447_s13 = smov 12   ;;  %vm5570_vm2 = vcmask 89088  }
  0x3c   : > { %478 = vmatpush.bf16.msra.mxu0 %v466_v7  ;;  %v469_v10 = vsel %vm454_vm0, %v458_v8, 0  ;;  %s4448_s15 = smov 84   ;;  %s4449_s16 = smov 74  }
  0x3d   : > { %491 = vmatpush.bf16.msra.mxu1 %v469_v10  ;;  %s4450_s19 = smov 83   ;;  %s4455_s28 = smov 80  }
  0x3e   : > { %s4456_s20 = smov 4   ;;  %s4457_s27 = smov 76  }
  0x3f   : > { %3325 = vmatmul.msk.bf16.vlgmr.msra.gmra.mxu0 %vm460_vm3, %v459_v9 }
  0x40   : > { %3326 = vmatmul.msk.bf16.vlgmr.msra.gmra.mxu1 %vm460_vm3, %v459_v9 }
  0xbc   : > { %v480_v11 = vpop.f32.mrf.mxu0 }
  0xbd   : > { %v497_v12 = vmax.f32 %v480_v11, 0.0  ;;  %v493_v14 = vpop.f32.mrf.mxu1 }
  0xbe   : > { %v498_v16 = vmax.f32 %v493_v14, 0.0 }
  0xbf   : > { %513 = vrot.lane.b32.xlu2 %v497_v12, %s4433_s24  ;;  %500 = vrot.lane.b32.xlu0 %v497_v12, %s4434_s25  ;;  %v505_v20 = vrot.slane %v497_v12, 4  ;;  %s4451_s25 = smov 73  }
  0xc4   : > { %v482_v13 = vpop.f32.mrf.mxu0 }
  0xc5   : > { %v495_v15 = vpop.f32.mrf.mxu1 }
  0xc7   : > { %523 = vrot.lane.b32.xlu0 %v497_v12, %s4435_s12 }
 0x119   : > { %v514_v36 = vpop.permute.xlu2 %513 }
 0x131   : > { %v501_v17 = vpop.permute.xlu0 %500 }
 0x132   : > { %v502_v18 = vsel %vm499_vm4, %v501_v17, %v498_v16  ;;  %vm1085_vm4 = vcmask 695296  }
 0x133   : > { %v506_v19 = vrot.slane %v502_v18, 4 }
 0x135   : > { %v3814_v21 = vpack.i.bf16 %v506_v19, %v505_v20 }
 0x137   : > { %3815 = vrot.lane.b32.xlu1 %v3814_v21, %s4436_s21 }
 0x139   : > { %v524_v24 = vpop.permute.xlu0 %523 }
 0x13a   : > { %v529_v25 = vsel %vm526_vm6, %v524_v24, 1.0 }
 0x13b   : > { %v535_v27 = vpack.c.bf16 %v529_v25, %v529_v25 }
 0x13d   : > { %v558_v28 = vand.u32 %v556_v26, %v535_v27 }
 0x13f   : > { %566 = vmatpush.bf16.msra.mxu2 %v558_v28  ;;  %3820 = vrot.lane.b32.xlu1 %v3814_v21, %s4438_s26  ;;  %s4452_s26 = smov 117  }
 0x1a9   : > { %v3816_v29 = vpop.permute.xlu1 %3815 }
 0x1aa   : > { %v3818_v30 = vunpack.i.h.bf16 %v3816_v29  ;;  %v3817_v31 = vunpack.i.l.bf16 %v3816_v29 }
 0x1ac   : > { %v511_v35 = vsel %vm460_vm3, %v3817_v31, %v3818_v30 }
 0x1ad   : > { %v527_v40 = vsel %vm526_vm6, %v497_v12, %v511_v35 }
 0x1b1   : > { %v3821_v32 = vpop.permute.xlu1 %3820 }
 0x1b2   : > { %v3823_v33 = vunpack.i.h.bf16 %v3821_v32  ;;  %v3822_v34 = vunpack.i.l.bf16 %v3821_v32 }
 0x1b4   : > { %v521_v37 = vsel %vm520_vm8, %v3822_v34, %v3823_v33  ;;  %vm1228_vm8 = vcmask 97280  }
 0x1b5   : > { %v528_v41 = vsel %vm526_vm6, %v514_v36, %v521_v37 }
 0x1b6   : > { %v534_v42 = vpack.c.bf16 %v528_v41, %v527_v40 }
 0x1b8   : > { %567 = vmatpush.bf16.msra.mxu2 %v534_v42 }
 0x1bb   : > { %3335 = vmatmul.msk.bf16.vlgmr.msra.gmra.mxu2 %vm546_vm9, %v3330_v43 }
 0x1cb   : > { %3336 = vmatmul.msk.bf16.gmra.mxu2 %vm546_vm9, %v3334_v46  ;;  %vm1253_vm9 = vcmask 1039360  }
 0x23e   : > { %v569_v47 = vpop.f32.mrf.mxu2 }
 0x23f   : > { %v579_v49 = vmax.f32 %v569_v47, 0.0 }
 0x246   : > { %v571_v48 = vpop.f32.mrf.mxu2 }
 0x247   : > { %v580_v50 = vmax.f32 %v571_v48, 0.0 }
 0x249   : > { %v3824_v51 = vpack.i.bf16 %v580_v50, %v579_v49 }
 0x24b   : > { %3825 = vrot.lane.b32.xlu2 %v3824_v51, %s4439_s29 }
 0x24e   : > { %v574_v52 = vpop.f32.mrf.mxu2 }
 0x24f   : > { %v581_v54 = vmax.f32 %v574_v52, 0.0 }
 0x256   : > { %v576_v53 = vpop.f32.mrf.mxu2 }
 0x257   : > { %v582_v55 = vmax.f32 %v576_v53, 0.0 }
 0x259   : > { %v3829_v56 = vpack.i.bf16 %v582_v55, %v581_v54 }
 0x25b   : > { %3830 = vrot.lane.b32.xlu0 %v3829_v56, %s4439_s29 }
 0x2a5   : > { %v3826_v57 = vpop.permute.xlu2 %3825 }
 0x2a6   : > { %v3828_v58 = vunpack.i.h.bf16 %v3826_v57  ;;  %v3827_v59 = vunpack.i.l.bf16 %v3826_v57 }
 0x2a8   : > { %v586_v60 = vsel %vm583_vm10, %v3827_v59, %v579_v49  ;;  %v589_v61 = vsel %vm583_vm10, %v3828_v58, %v580_v50 }
 0x2a9   : > { %v3834_v62 = vpack.i.bf16 %v589_v61, %v586_v60 }
 0x2ab   : > { %3835 = vrot.lane.b32.xlu1 %v3834_v62, %s4439_s29 }
 0x2cd   : > { %v3831_v63 = vpop.permute.xlu0 %3830 }
 0x2ce   : > { %v3833_v0 = vunpack.i.h.bf16 %v3831_v63  ;;  %v3832_v1 = vunpack.i.l.bf16 %v3831_v63 }
 0x2d0   : > { %v592_v2 = vsel %vm583_vm10, %v3832_v1, %v581_v54  ;;  %v595_v3 = vsel %vm583_vm10, %v3833_v0, %v582_v55 }
 0x2d1   : > { %v3839_v4 = vpack.i.bf16 %v595_v3, %v592_v2 }
 0x2d3   : > { %3840 = vrot.lane.b32.xlu2 %v3839_v4, %s4439_s29 }
 0x31d   : > { %v3836_v5 = vpop.permute.xlu1 %3835 }
 0x31e   : > { %v3838_v6 = vunpack.i.h.bf16 %v3836_v5  ;;  %v3837_v7 = vunpack.i.l.bf16 %v3836_v5 }
 0x320   : > { %v604_v8 = vsel %vm583_vm10, %v3837_v7, %v579_v49  ;;  %v605_v9 = vsel %vm583_vm10, %v3838_v6, %v580_v50 }
 0x321   : > { %v3844_v10 = vpack.i.bf16 %v605_v9, %v604_v8 }
 0x323   : > { %3845 = vrot.lane.b32.xlu0 %v3844_v10, %s4433_s24 }
 0x32d   : > { %v3841_v11 = vpop.permute.xlu2 %3840 }
 0x32e   : > { %v3843_v12 = vunpack.i.h.bf16 %v3841_v11  ;;  %v3842_v13 = vunpack.i.l.bf16 %v3841_v11 }
 0x330   : > { %v606_v14 = vsel %vm583_vm10, %v3842_v13, %v581_v54  ;;  %v607_v15 = vsel %vm583_vm10, %v3843_v12, %v582_v55 }
 0x331   : > { %v3849_v16 = vpack.i.bf16 %v607_v15, %v606_v14 }
 0x333   : > { %3850 = vrot.lane.b32.xlu1 %v3849_v16, %s4433_s24 }
 0x395   : > { %v3846_v17 = vpop.permute.xlu0 %3845 }
 0x396   : > { %v3848_v18 = vunpack.i.h.bf16 %v3846_v17  ;;  %v3847_v19 = vunpack.i.l.bf16 %v3846_v17 }
 0x398   : > { %v625_v20 = vmax.f32 %v580_v50, %v3848_v18  ;;  %v624_v21 = vmax.f32 %v579_v49, %v3847_v19 }
 0x39a   : > { %v3854_v23 = vpack.i.bf16 %v625_v20, %v624_v21 }
 0x39c   : > { %3855 = vrot.lane.b32.xlu2 %v3854_v23, %s4439_s29 }
 0x3a5   : > { %v3851_v24 = vpop.permute.xlu1 %3850 }
 0x3a6   : > { %v3853_v25 = vunpack.i.h.bf16 %v3851_v24  ;;  %v3852_v26 = vunpack.i.l.bf16 %v3851_v24 }
 0x3a8   : > { %v627_v27 = vmax.f32 %v582_v55, %v3853_v25  ;;  %v626_v28 = vmax.f32 %v581_v54, %v3852_v26 }
 0x3aa   : > { %v3859_v29 = vpack.i.bf16 %v627_v27, %v626_v28 }
 0x3ac   : > { %3860 = vrot.lane.b32.xlu0 %v3859_v29, %s4439_s29 }
 0x3f6   : > { %v3856_v30 = vpop.permute.xlu2 %3855 }
 0x3f7   : > { %v3858_v31 = vunpack.i.h.bf16 %v3856_v30  ;;  %v3857_v32 = vunpack.i.l.bf16 %v3856_v30 }
 0x3f9   : > { %v630_v33 = vsel %vm583_vm10, %v3857_v32, %v624_v21  ;;  %v633_v34 = vsel %vm583_vm10, %v3858_v31, %v625_v20 }
 0x3fa   : > { %v3864_v35 = vpack.i.bf16 %v633_v34, %v630_v33 }
 0x3fc   : > { %3865 = vrot.lane.b32.xlu1 %v3864_v35, %s4439_s29 }
 0x41e   : > { %v3861_v36 = vpop.permute.xlu0 %3860 }
 0x41f   : > { %v3863_v37 = vunpack.i.h.bf16 %v3861_v36  ;;  %v3862_v38 = vunpack.i.l.bf16 %v3861_v36 }
 0x421   : > { %v636_v39 = vsel %vm583_vm10, %v3862_v38, %v626_v28  ;;  %v639_v40 = vsel %vm583_vm10, %v3863_v37, %v627_v27 }
 0x422   : > { %v3869_v41 = vpack.i.bf16 %v639_v40, %v636_v39 }
 0x424   : > { %3870 = vrot.lane.b32.xlu2 %v3869_v41, %s4439_s29 }
 0x46e   : > { %v3866_v42 = vpop.permute.xlu1 %3865 }
 0x46f   : > { %v3868_v43 = vunpack.i.h.bf16 %v3866_v42  ;;  %v3867_v44 = vunpack.i.l.bf16 %v3866_v42 }
 0x471   : > { %v648_v45 = vsel %vm583_vm10, %v3867_v44, %v624_v21  ;;  %v649_v46 = vsel %vm583_vm10, %v3868_v43, %v625_v20 }
 0x472   : > { %v3874_v47 = vpack.i.bf16 %v649_v46, %v648_v45 }
 0x474   : > { %3875 = vrot.lane.b32.xlu0 %v3874_v47, %s4435_s12 }
 0x47e   : > { %v3871_v48 = vpop.permute.xlu2 %3870 }
 0x47f   : > { %v3873_v49 = vunpack.i.h.bf16 %v3871_v48  ;;  %v3872_v50 = vunpack.i.l.bf16 %v3871_v48 }
 0x481   : > { %v650_v51 = vsel %vm583_vm10, %v3872_v50, %v626_v28  ;;  %v651_v52 = vsel %vm583_vm10, %v3873_v49, %v627_v27 }
 0x482   : > { %v3879_v53 = vpack.i.bf16 %v651_v52, %v650_v51  ;;  %v790_v51 = vld [vmem:[%s5556_s3 + $0xa8] sm:$0x33]  ;;  %v791_v52 = vld [vmem:[%s5556_s3 + $0xb0] sm:$0x3] }
 0x484   : > { %3880 = vrot.lane.b32.xlu1 %v3879_v53, %s4435_s12  ;;  %v864_v53 = vunpack.c.l.b16 %v790_v51 }
 0x4e6   : > { %v3876_v54 = vpop.permute.xlu0 %3875 }
 0x4e7   : > { %v3878_v55 = vunpack.i.h.bf16 %v3876_v54  ;;  %v3877_v56 = vunpack.i.l.bf16 %v3876_v54  ;;  %v865_v54 = vunpack.c.h.b16 %v790_v51 }
 0x4e9   : > { %v669_v57 = vmax.f32 %v625_v20, %v3878_v55  ;;  %v668_v58 = vmax.f32 %v624_v21, %v3877_v56  ;;  %v866_v55 = vunpack.c.l.b16 %v791_v52  ;;  %v3411_v56 = vld [vmem:[%s5556_s3 + $0x90] sm:$0xf] }
 0x4eb   : > { %v3884_v59 = vpack.i.bf16 %v669_v57, %v668_v58 }
 0x4ed   : > { %3885 = vrot.lane.b32.xlu2 %v3884_v59, %s4439_s29  ;;  %v890_v59 = vpack.c.b16 %v866_v55, %v866_v55  ;;  %v3617_v55 = vld [vmem:[%s5556_s3 + $0x20] sm:$0xf0] }
 0x4f6   : > { %v3881_v60 = vpop.permute.xlu1 %3880 }
 0x4f7   : > { %v3883_v61 = vunpack.i.h.bf16 %v3881_v60  ;;  %v3882_v62 = vunpack.i.l.bf16 %v3881_v60  ;;  %v3632_v60 = vld [vmem:[%s5556_s3 + $0x98] sm:$0xf0] }
 0x4f9   : > { %v671_v63 = vmax.f32 %v627_v27, %v3883_v61  ;;  %v670_v0 = vmax.f32 %v626_v28, %v3882_v62  ;;  %v3631_v61 = vld [vmem:[%s5556_s3 + $0x94] sm:$0xf]  ;;  %v3413_v62 = vld [vmem:[%s5556_s3 + $0x9c] sm:$0xf0] }
 0x4fb   : > { %v3889_v1 = vpack.i.bf16 %v671_v63, %v670_v0 }
 0x4fd   : > { %3890 = vrot.lane.b32.xlu0 %v3889_v1, %s4439_s29 }
 0x547   : > { %v3886_v2 = vpop.permute.xlu2 %3885 }
 0x548   : > { %v3888_v3 = vunpack.i.h.bf16 %v3886_v2  ;;  %v3887_v4 = vunpack.i.l.bf16 %v3886_v2 }
 0x54a   : > { %v674_v5 = vsel %vm583_vm10, %v3887_v4, %v668_v58  ;;  %v677_v6 = vsel %vm583_vm10, %v3888_v3, %v669_v57  ;;  %v926_v3 = vsel %vm553_vm5, %v890_v59, 0  ;;  %v3412_v4 = vor.u32 %v3632_v60, %v3411_v56  ;;  %v3616_v56 = vld [vmem:[%s5556_s3 + $0x1c] sm:$0xf]  ;;  %v3618_v59 = vld [vmem:[%s5556_s3 + $0x28] sm:$0xf0] }
 0x54b   : > { %v3894_v7 = vpack.i.bf16 %v677_v6, %v674_v5  ;;  %v3416_v5 = vor.u32 %v3631_v61, %v3413_v62  ;;  %v3399_v6 = vld [vmem:[%s5556_s3 + $0x78] sm:$0xf]  ;;  %966 = vmatpush.bf16.msrb.mxu1 %v926_v3 }
 0x54d   : > { %3895 = vrot.lane.b32.xlu1 %v3894_v7, %s4439_s29 }
 0x56f   : > { %v3891_v8 = vpop.permute.xlu0 %3890 }
 0x570   : > { %v3893_v9 = vunpack.i.h.bf16 %v3891_v8  ;;  %v3892_v10 = vunpack.i.l.bf16 %v3891_v8  ;;  %v3629_v8 = vld [vmem:[%s5556_s3 + $0x80] sm:$0xf0] }
 0x572   : > { %v680_v11 = vsel %vm583_vm10, %v3892_v10, %v670_v0  ;;  %v683_v12 = vsel %vm583_vm10, %v3893_v9, %v671_v63  ;;  %v3628_v9 = vld [vmem:[%s5556_s3 + $0x7c] sm:$0xf]  ;;  %v3401_v10 = vld [vmem:[%s5556_s3 + $0x84] sm:$0xf0] }
 0x573   : > { %v3899_v13 = vpack.i.bf16 %v683_v12, %v680_v11  ;;  %v3407_v11 = vld [vmem:[%s5556_s3 + $0x80] sm:$0xf]  ;;  %v3630_v12 = vld [vmem:[%s5556_s3 + $0x88] sm:$0xf0] }
 0x575   : > { %3900 = vrot.lane.b32.xlu2 %v3899_v13, %s4439_s29 }
 0x5bf   : > { %v3896_v14 = vpop.permute.xlu1 %3895 }
 0x5c0   : > { %v3898_v15 = vunpack.i.h.bf16 %v3896_v14  ;;  %v3897_v16 = vunpack.i.l.bf16 %v3896_v14  ;;  %v3400_v14 = vor.u32 %v3629_v8, %v3399_v6  ;;  %v3614_v6 = vld [vmem:[%s5556_s3 + $0x8] sm:$0xf0] }
 0x5c2   : > { %v692_v17 = vsel %vm583_vm10, %v3897_v16, %v668_v58  ;;  %v693_v18 = vsel %vm583_vm10, %v3898_v15, %v669_v57  ;;  %v3404_v15 = vor.u32 %v3628_v9, %v3401_v10  ;;  %v3387_v16 = vld [vmem:[%s5556_s3 + $0x60] sm:$0xf]  ;;  %v3341_v9 = vld [vmem:[%s5556_s3 + $0xc] sm:$0xf0]  ;;  %v3347_v10 = vld [vmem:[%s5556_s3 + $0x8] sm:$0xf] }
 0x5c3   : > { %v3904_v19 = vpack.i.bf16 %v693_v18, %v692_v17 }
 0x5c5   : > { %3905 = vrot.lane.b32.xlu0 %v3904_v19, %s4440_s30  ;;  %v3408_v19 = vor.u32 %v3630_v12, %v3407_v11  ;;  %v3615_v11 = vld [vmem:[%s5556_s3 + $0x10] sm:$0xf0] }
 0x5cf   : > { %v3901_v20 = vpop.permute.xlu2 %3900 }
 0x5d0   : > { %v3903_v21 = vunpack.i.h.bf16 %v3901_v20  ;;  %v3902_v23 = vunpack.i.l.bf16 %v3901_v20  ;;  %v3626_v20 = vld [vmem:[%s5556_s3 + $0x68] sm:$0xf0] }
 0x5d2   : > { %v694_v24 = vsel %vm583_vm10, %v3902_v23, %v670_v0  ;;  %v695_v25 = vsel %vm583_vm10, %v3903_v21, %v671_v63  ;;  %v3625_v21 = vld [vmem:[%s5556_s3 + $0x64] sm:$0xf]  ;;  %v3389_v23 = vld [vmem:[%s5556_s3 + $0x6c] sm:$0xf0] }
 0x5d3   : > { %v3909_v26 = vpack.i.bf16 %v695_v25, %v694_v24  ;;  %v3395_v24 = vld [vmem:[%s5556_s3 + $0x68] sm:$0xf]  ;;  %v3627_v25 = vld [vmem:[%s5556_s3 + $0x70] sm:$0xf0] }
 0x5d5   : > { %3910 = vrot.lane.b32.xlu1 %v3909_v26, %s4440_s30  ;;  %s4454_s30 = smov 44  }
 0x637   : > { %v3906_v27 = vpop.permute.xlu0 %3905 }
 0x638   : > { %v3908_v28 = vunpack.i.h.bf16 %v3906_v27  ;;  %v3907_v29 = vunpack.i.l.bf16 %v3906_v27 }
 0x63a   : > { %v4693_v30 = vmax.f32 %v669_v57, %v3908_v28  ;;  %v4695_v31 = vmax.f32 %v668_v58, %v3907_v29  ;;  %v888_v57 = vpack.c.b16 %v864_v53, %v864_v53  ;;  %v889_v58 = vpack.c.b16 %v865_v54, %v865_v54  ;;  %v3351_v53 = vld [vmem:[%s5556_s3 + $0x18] sm:$0xf] }
 0x63b   : > { %v3388_v29 = vor.u32 %v3626_v20, %v3387_v16  ;;  %v3352_v61 = vor.u32 %v3617_v55, %v3351_v53  ;;  %v4866_v16 = vld [vmem:[#allocation5 + $0x2] ss:$8 sm:$0x7] }
 0x63c   : > { %v3914_v32 = vpack.i.bf16 %v4693_v30, %v4695_v31  ;;  %v920_v1 = vsel %vm553_vm5, %v888_v57, 0  ;;  %v923_v2 = vsel %vm553_vm5, %v889_v58, 0  ;;  %v3353_v57 = vld [vmem:[%s5556_s3 + $0x24] sm:$0xf0]  ;;  %v3359_v58 = vld [vmem:[%s5556_s3 + $0x20] sm:$0xf] }
 0x63d   : > { %928 = vmatpush.bf16.msra.mxu3 %v920_v1  ;;  %947 = vmatpush.bf16.msrb.mxu0 %v923_v2  ;;  %v3356_v62 = vor.u32 %v3616_v56, %v3353_v57  ;;  %v3360_v1 = vor.u32 %v3618_v59, %v3359_v58  ;;  %v994_v59 = vld [vmem:[#allocation7 + $0x48] sm:$0xff] }
 0x63e   : > { %3915 = vrot.lane.b32.xlu2 %v3914_v32, %s4439_s29  ;;  %v3392_v32 = vor.u32 %v3625_v21, %v3389_v23 }
 0x641   : > { %929 = vmatpush.bf16.msra.mxu3 %v3412_v4  ;;  %948 = vmatpush.bf16.msrb.mxu0 %v3416_v5  ;;  %v3339_v5 = vld [vmem:[%s5556_s3] sm:$0xf] }
 0x642   : > { %v3340_v8 = vor.u32 %v3614_v6, %v3339_v5 }
 0x645   : > { %930 = vmatpush.bf16.msra.mxu3 %v3400_v14  ;;  %949 = vmatpush.bf16.msrb.mxu0 %v3404_v15  ;;  %v4862_v14 = vld [vmem:[#allocation5 + $0x1] ss:$8 sm:$0x7] }
 0x646   : > { %v1078_v15 = vperm.slane %v4862_v14, 2 }
 0x647   : > { %v3911_v33 = vpop.permute.xlu1 %3910 }
 0x648   : > { %v3913_v34 = vunpack.i.h.bf16 %v3911_v33  ;;  %v3912_v35 = vunpack.i.l.bf16 %v3911_v33  ;;  %v3375_v33 = vld [vmem:[%s5556_s3 + $0x48] sm:$0xf] }
 0x649   : > { %931 = vmatpush.bf16.msra.mxu3 %v3388_v29  ;;  %950 = vmatpush.bf16.msrb.mxu0 %v3392_v32 }
 0x64a   : > { %v4700_v36 = vmax.f32 %v671_v63, %v3913_v34  ;;  %v4702_v37 = vmax.f32 %v670_v0, %v3912_v35  ;;  %v3419_v63 = vld [vmem:[%s5556_s3 + $0x98] sm:$0xf]  ;;  %v3633_v0 = vld [vmem:[%s5556_s3 + $0xa0] sm:$0xf0]  ;;  %v3396_v34 = vor.u32 %v3627_v25, %v3395_v24  ;;  %v3623_v35 = vld [vmem:[%s5556_s3 + $0x50] sm:$0xf0] }
 0x64b   : > { %v3420_v7 = vor.u32 %v3633_v0, %v3419_v63  ;;  %v4872_v24 = vld [vmem:[#allocation5 + $0x3] ss:$8 sm:$0x7] }
 0x64c   : > { %v3919_v38 = vpack.i.bf16 %v4700_v36, %v4702_v37 }
 0x64d   : > { %967 = vmatpush.bf16.msrb.mxu1 %v3420_v7  ;;  %v3613_v7 = vld [vmem:[%s5556_s3 + $0x4] sm:$0xf] }
 0x64e   : > { %3920 = vrot.lane.b32.xlu0 %v3919_v38, %s4439_s29  ;;  %v3622_v38 = vld [vmem:[%s5556_s3 + $0x4c] sm:$0xf]  ;;  %v3344_v12 = vor.u32 %v3613_v7, %v3341_v9 }
 0x651   : > { %968 = vmatpush.bf16.msrb.mxu1 %v3408_v19 }
 0x655   : > { %969 = vmatpush.bf16.msrb.mxu1 %v3396_v34 }
 0x698   : > { %v3916_v39 = vpop.permute.xlu2 %3915 }
 0x699   : > { %v3918_v40 = vunpack.i.h.bf16 %v3916_v39  ;;  %v3917_v41 = vunpack.i.l.bf16 %v3916_v39  ;;  %v3377_v39 = vld [vmem:[%s5556_s3 + $0x54] sm:$0xf0] }
 0x69b   : > { %v718_v42 = vsel %vm583_vm10, %v3917_v41, %v4695_v31  ;;  %v721_v43 = vsel %vm583_vm10, %v3918_v40, %v4693_v30  ;;  %v3383_v40 = vld [vmem:[%s5556_s3 + $0x50] sm:$0xf]  ;;  %v3624_v41 = vld [vmem:[%s5556_s3 + $0x58] sm:$0xf0] }
 0x69c   : > { %v3924_v44 = vpack.i.bf16 %v721_v43, %v718_v42  ;;  %v3376_v42 = vor.u32 %v3623_v35, %v3375_v33  ;;  %v3380_v43 = vor.u32 %v3622_v38, %v3377_v39 }
 0x69e   : > { %3925 = vrot.lane.b32.xlu1 %v3924_v44, %s4439_s29  ;;  %v3363_v44 = vld [vmem:[%s5556_s3 + $0x30] sm:$0xf]  ;;  %932 = vmatpush.bf16.msra.mxu3 %v3376_v42 }
 0x69f   : > { %951 = vmatpush.bf16.msrb.mxu0 %v3380_v43  ;;  %v986_v43 = vld [vmem:[#allocation7 + $0x8] sm:$0xff] }
 0x6c0   : > { %v3921_v45 = vpop.permute.xlu0 %3920 }
 0x6c1   : > { %v3923_v46 = vunpack.i.h.bf16 %v3921_v45  ;;  %v3922_v47 = vunpack.i.l.bf16 %v3921_v45  ;;  %v3384_v45 = vor.u32 %v3624_v41, %v3383_v40  ;;  %v989_v41 = vld [vmem:[#allocation7 + $0x20] sm:$0xff] }
 0x6c3   : > { %v724_v48 = vsel %vm583_vm10, %v3922_v47, %v4702_v37  ;;  %v727_v49 = vsel %vm583_vm10, %v3923_v46, %v4700_v36  ;;  %v3620_v46 = vld [vmem:[%s5556_s3 + $0x38] sm:$0xf0]  ;;  %v3619_v47 = vld [vmem:[%s5556_s3 + $0x34] sm:$0xf]  ;;  %970 = vmatpush.bf16.msrb.mxu1 %v3384_v45 }
 0x6c4   : > { %v3929_v50 = vpack.i.bf16 %v727_v49, %v724_v48  ;;  %v3365_v48 = vld [vmem:[%s5556_s3 + $0x3c] sm:$0xf0]  ;;  %v3371_v49 = vld [vmem:[%s5556_s3 + $0x38] sm:$0xf]  ;;  %v3364_v51 = vor.u32 %v3620_v46, %v3363_v44  ;;  %v992_v44 = vld [vmem:[#allocation7 + $0x38] sm:$0xff] }
 0x6c5   : > { %v3368_v52 = vor.u32 %v3619_v47, %v3365_v48  ;;  %v988_v46 = vld [vmem:[#allocation7 + $0x18] sm:$0xff]  ;;  %v995_v48 = vld [vmem:[#allocation7 + $0x50] sm:$0xff] }
 0x6c6   : > { %3930 = vrot.lane.b32.xlu2 %v3929_v50, %s4439_s29  ;;  %v3621_v50 = vld [vmem:[%s5556_s3 + $0x40] sm:$0xf0]  ;;  %933 = vmatpush.bf16.msra.mxu3 %v3364_v51  ;;  %s4453_s29 = smov 72  }
 0x6c7   : > { %v3372_v54 = vor.u32 %v3621_v50, %v3371_v49  ;;  %952 = vmatpush.bf16.msrb.mxu0 %v3368_v52  ;;  %v985_v50 = vld [vmem:[#allocation7] sm:$0xff]  ;;  %v991_v51 = vld [vmem:[#allocation7 + $0x30] sm:$0xff] }
 0x6c9   : > { %971 = vmatpush.bf16.msrb.mxu1 %v3372_v54 }
 0x6ca   : > { %934 = vmatpush.bf16.msra.mxu3 %v3352_v61 }
 0x6cb   : > { %953 = vmatpush.bf16.msrb.mxu0 %v3356_v62 }
 0x6cd   : > { %972 = vmatpush.bf16.msrb.mxu1 %v3360_v1 }
 0x6ce   : > { %935 = vmatpush.bf16.msra.mxu3 %v3340_v8 }
 0x6cf   : > { %954 = vmatpush.bf16.msrb.mxu0 %v3344_v12 }
 0x710   : > { %v3926_v13 = vpop.permute.xlu1 %3925 }
 0x711   : > { %v3928_v17 = vunpack.i.h.bf16 %v3926_v13  ;;  %v3927_v18 = vunpack.i.l.bf16 %v3926_v13  ;;  %v3348_v13 = vor.u32 %v3615_v11, %v3347_v10 }
 0x713   : > { %v736_v26 = vsel %vm583_vm10, %v3927_v18, %v4695_v31  ;;  %v737_v27 = vsel %vm583_vm10, %v3928_v17, %v4693_v30  ;;  %973 = vmatpush.bf16.msrb.mxu1 %v3348_v13  ;;  %v1101_v17 = vperm.slane %v4866_v16, 2  ;;  %v1077_v13 = vperm.slane %v4862_v14, 1 }
 0x714   : > { %v3934_v28 = vpack.i.bf16 %v737_v27, %v736_v26  ;;  %v1124_v26 = vperm.slane %v4872_v24, 2 }
 0x716   : > { %3935 = vrot.lane.b32.xlu0 %v3934_v28, %s4435_s12 }
 0x720   : > { %v3931_v60 = vpop.permute.xlu2 %3930 }
 0x721   : > { %v3933_v63 = vunpack.i.h.bf16 %v3931_v60  ;;  %v3932_v0 = vunpack.i.l.bf16 %v3931_v60 }
 0x723   : > { %v738_v2 = vsel %vm583_vm10, %v3932_v0, %v4702_v37  ;;  %v739_v3 = vsel %vm583_vm10, %v3933_v63, %v4700_v36  ;;  %vm1400_vm10 = vcmask 1040384  }
 0x724   : > { %v3939_v4 = vpack.i.bf16 %v739_v3, %v738_v2 }
 0x726   : > { %3940 = vrot.lane.b32.xlu1 %v3939_v4, %s4435_s12 }
 0x72e   : > { %1083 = vrot.lane.b32.xlu1 %v1078_v15, %s4441_s2  ;;  %v1196_v15 = vld [vmem:[#allocation5 + $0x7] ss:$8 sm:$0x7] }
 0x736   : > { %1106 = vrot.lane.b32.xlu1 %v1101_v17, %s4442_s11  ;;  %v1199_v17 = vperm.slane %v1196_v15, 1 }
 0x73e   : > { %1129 = vrot.lane.b32.xlu1 %v1124_v26, %s4443_s5 }
 0x788   : > { %v3936_v18 = vpop.permute.xlu0 %3935 }
 0x789   : > { %v3938_v19 = vunpack.i.h.bf16 %v3936_v18  ;;  %v3937_v20 = vunpack.i.l.bf16 %v3936_v18  ;;  %v1076_v18 = vperm.slane %v4862_v14, 0 }
 0x78b   : > { %v757_v21 = vmax.f32 %v4693_v30, %v3938_v19  ;;  %v756_v23 = vmax.f32 %v4695_v31, %v3937_v20  ;;  %v4879_v30 = vld [vmem:[#allocation5 + $0x6] ss:$8 sm:$0x7]  ;;  %v1100_v19 = vperm.slane %v4866_v16, 1  ;;  %v1099_v20 = vperm.slane %v4866_v16, 0 }
 0x78c   : > { %v1178_v31 = vperm.slane %v4879_v30, 0 }
 0x78d   : > { %v760_v25 = vpack.c.bf16 %v757_v21, %v756_v23  ;;  %v1123_v21 = vperm.slane %v4872_v24, 1  ;;  %v1155_v23 = vld [vmem:[#allocation5 + $0x5] ss:$8 sm:$0x7] }
 0x78e   : > { %1181 = vrot.lane.b32.xlu1 %v1178_v31, %s4436_s21  ;;  %v1158_v26 = vperm.slane %v1155_v23, 1  ;;  %v1157_v31 = vperm.slane %v1155_v23, 0 }
 0x78f   : > { %3421 = vmatmul.msk.bf16.vlgmr.msra.gmra.mxu3 %vm912_vm11, %v760_v25  ;;  %3423 = vmatmul.msk.bf16.vlgmr.msrb.gmra.mxu0 %vm912_vm11, %v760_v25 }
 0x790   : > { %3425 = vmatmul.msk.bf16.vlgmr.msrb.gmra.mxu1 %vm912_vm11, %v760_v25  ;;  %v1122_v25 = vperm.slane %v4872_v24, 0 }
 0x796   : > { %1203 = vrot.lane.b32.xlu1 %v1199_v17, %s4445_s18 }
 0x798   : > { %v3941_v27 = vpop.permute.xlu1 %3940 }
 0x799   : > { %v3943_v28 = vunpack.i.h.bf16 %v3941_v27  ;;  %v3942_v29 = vunpack.i.l.bf16 %v3941_v27  ;;  %v1198_v27 = vperm.slane %v1196_v15, 0 }
 0x79b   : > { %v759_v32 = vmax.f32 %v4700_v36, %v3943_v28  ;;  %v758_v33 = vmax.f32 %v4702_v37, %v3942_v29  ;;  %v1217_v28 = vld [vmem:[#allocation5 + $0x38] ss:$8 sm:$0x7]  ;;  %v1179_v29 = vperm.slane %v4879_v30, 1 }
 0x79c   : > { %v1219_v24 = vperm.slane %v1217_v28, 0 }
 0x79d   : > { %v761_v34 = vpack.c.bf16 %v759_v32, %v758_v33  ;;  %v1220_v32 = vperm.slane %v1217_v28, 1 }
 0x79f   : > { %3422 = vmatmul.msk.bf16.gmra.mxu3 %vm912_vm11, %v761_v34  ;;  %3424 = vmatmul.msk.bf16.gmra.mxu0 %vm912_vm11, %v761_v34 }
 0x7a0   : > { %3426 = vmatmul.msk.bf16.gmra.mxu1 %vm912_vm11, %v761_v34  ;;  %v1200_v34 = vperm.slane %v1196_v15, 2  ;;  %vm1277_vm11 = vcmask 1031168  }
 0x80c   : > { %v956_v35 = vpop.f32.mrf.mxu0 }
 0x80d   : > { %v998_v45 = vmul.f32 %v986_v43, %v956_v35  ;;  %v975_v14 = vpop.f32.mrf.mxu1  ;;  %v990_v35 = vld [vmem:[#allocation7 + $0x28] sm:$0xff] }
 0x812   : > { %v937_v38 = vpop.f32.mrf.mxu3 }
 0x813   : > { %v997_v56 = vmul.f32 %v985_v50, %v937_v38  ;;  %v4917_v38 = vld [vmem:[#allocation5] ss:$8 sm:$0x7] }
 0x814   : > { %v958_v39 = vpop.f32.mrf.mxu0  ;;  %v1054_v43 = vperm.slane %v4917_v38, 1 }
 0x815   : > { %v1001_v36 = vmul.f32 %v989_v41, %v958_v39  ;;  %v977_v16 = vpop.f32.mrf.mxu1  ;;  %v1180_v39 = vperm.slane %v4879_v30, 2  ;;  %v993_v41 = vld [vmem:[#allocation7 + $0x40] sm:$0xff] }
 0x817   : > { %v1018_v49 = vadd.f32 %v1001_v36, %v998_v45  ;;  %v996_v36 = vld [vmem:[#allocation7 + $0x58] sm:$0xff] }
 0x81a   : > { %v939_v40 = vpop.f32.mrf.mxu3 }
 0x81b   : > { %v1000_v53 = vmul.f32 %v988_v46, %v939_v40  ;;  %v987_v40 = vld [vmem:[#allocation7 + $0x10] sm:$0xff] }
 0x81c   : > { %v961_v42 = vpop.f32.mrf.mxu0  ;;  %v999_v45 = vmul.f32 %v987_v40, %v975_v14 }
 0x81d   : > { %v1004_v37 = vmul.f32 %v992_v44, %v961_v42  ;;  %v1009_v60 = vadd.f32 %v1000_v53, %v997_v56  ;;  %v980_v33 = vpop.f32.mrf.mxu1  ;;  %v1002_v42 = vmul.f32 %v990_v35, %v977_v16 }
 0x81e   : > { %v1028_v30 = vsel %vm5571_vm12, %v999_v45, 0.0 }
 0x81f   : > { %v1019_v54 = vadd.f32 %v1018_v49, %v1004_v37  ;;  %v1005_v37 = vmul.f32 %v993_v41, %v980_v33  ;;  %v1029_v46 = vsel %vm5571_vm12, %v1002_v42, 0.0  ;;  %v1053_v49 = vperm.slane %v4917_v38, 0 }
 0x820   : > { %v1030_v50 = vadd.f32 %v1029_v46, %v1028_v30 }
 0x822   : > { %v942_v47 = vpop.f32.mrf.mxu3 }
 0x823   : > { %v1003_v57 = vmul.f32 %v991_v51, %v942_v47 }
 0x824   : > { %v963_v52 = vpop.f32.mrf.mxu0 }
 0x825   : > { %v1007_v55 = vmul.f32 %v995_v48, %v963_v52  ;;  %v1010_v63 = vadd.f32 %v1009_v60, %v1003_v57  ;;  %v982_v44 = vpop.f32.mrf.mxu1  ;;  %v1031_v48 = vsel %vm5571_vm12, %v1005_v37, 0.0 }
 0x826   : > { %v1008_v47 = vmul.f32 %v996_v36, %v982_v44  ;;  %v1032_v52 = vadd.f32 %v1031_v48, %v1030_v50 }
 0x827   : > { %v1020_v58 = vadd.f32 %v1019_v54, %v1007_v55 }
 0x828   : > { %v1033_v51 = vsel %vm5571_vm12, %v1008_v47, 0.0  ;;  %vm1358_vm12 = vcmask 605184  }
 0x829   : > { %v1021_v61 = vrot.slane %v1020_v58, 4  ;;  %v1034_v53 = vadd.f32 %v1033_v51, %v1032_v52 }
 0x82a   : > { %v944_v62 = vpop.f32.mrf.mxu3 }
 0x82b   : > { %v1022_v0 = vadd.f32 %v1021_v61, %v1020_v58  ;;  %v1006_v1 = vmul.f32 %v994_v59, %v944_v62  ;;  %v1035_v54 = vrot.slane %v1034_v53, 4  ;;  %v1159_v62 = vperm.slane %v1155_v23, 2 }
 0x82d   : > { %v1023_v2 = vrot.slane %v1022_v0, 2  ;;  %v1011_v3 = vadd.f32 %v1010_v63, %v1006_v1  ;;  %v1036_v55 = vadd.f32 %v1035_v54, %v1034_v53  ;;  %v4937_v63 = vpop.permute.xlu1 %1083  ;;  %v4942_v1 = vld [vmem:[#allocation5 + $0x4] ss:$8 sm:$0x7] }
 0x82f   : > { %v1024_v4 = vadd.f32 %v1023_v2, %v1022_v0  ;;  %v1012_v5 = vrot.slane %v1011_v3, 4  ;;  %v1037_v56 = vrot.slane %v1036_v55, 2  ;;  %v1145_v2 = vperm.slane %v4942_v1, 0 }
 0x831   : > { %v1025_v6 = vrot.slane %v1024_v4, 1  ;;  %v1013_v7 = vadd.f32 %v1012_v5, %v1011_v3  ;;  %v1038_v57 = vadd.f32 %v1037_v56, %v1036_v55  ;;  %v1221_v3 = vperm.slane %v1217_v28, 2 }
 0x833   : > { %v4888_v8 = vadd.f32 %v1025_v6, %v1024_v4  ;;  %v1014_v9 = vrot.slane %v1013_v7, 2  ;;  %v1039_v58 = vrot.slane %v1038_v57, 1  ;;  %v1146_v4 = vperm.slane %v4942_v1, 1 }
 0x835   : > { %v1015_v10 = vadd.f32 %v1014_v9, %v1013_v7  ;;  %1045 = vrot.lane.b32.xlu0 %v4888_v8, %s4444_s22  ;;  %v4929_v59 = vadd.f32 %v1039_v58, %v1038_v57  ;;  %v4947_v7 = vpop.permute.xlu1 %1106 }
 0x837   : > { %v1016_v11 = vrot.slane %v1015_v10, 1 }
 0x839   : > { %v4892_v12 = vadd.f32 %v1016_v11, %v1015_v10  ;;  %v1152_v10 = vmul.f32 %v1146_v4, %v4888_v8 }
 0x83b   : > { %1042 = vrot.lane.b32.xlu2 %v4892_v12, %s4444_s22  ;;  %v1151_v6 = vmul.f32 %v1145_v2, %v4892_v12 }
 0x83d   : > { %1081 = vrot.lane.b32.xlu0 %v1077_v13, %s4441_s2  ;;  %v1312_v11 = vrot.slane %v1151_v6, 4  ;;  %v1313_v13 = vrot.slane %v1152_v10, 4 }
 0x83f   : > { %v3944_v17 = vpack.i.bf16 %v1313_v13, %v1312_v11 }
 0x843   : > { %1079 = vrot.lane.b32.xlu2 %v1076_v18, %s4441_s2  ;;  %s4458_s2 = smov 6  }
 0x845   : > { %1104 = vrot.lane.b32.xlu0 %v1100_v19, %s4442_s11  ;;  %v4956_v19 = vpop.permute.xlu1 %1129 }
 0x84b   : > { %1102 = vrot.lane.b32.xlu2 %v1099_v20, %s4442_s11  ;;  %s4459_s11 = smov 75  }
 0x84d   : > { %1127 = vrot.lane.b32.xlu0 %v1123_v21, %s4443_s5  ;;  %v1182_v23 = vpop.permute.xlu1 %1181 }
 0x853   : > { %1125 = vrot.lane.b32.xlu2 %v1122_v25, %s4443_s5  ;;  %v1192_v25 = vmul.f32 %v1182_v23, %v4892_v12  ;;  %s4460_s5 = smov 5  }
 0x855   : > { %1162 = vrot.lane.b32.xlu0 %v1158_v26, %s4446_s1  ;;  %v1349_v28 = vrot.slane %v1192_v25, 2  ;;  %v4981_v47 = vpop.permute.xlu1 %1203 }
 0x85b   : > { %1160 = vrot.lane.b32.xlu2 %v1157_v31, %s4446_s1 }
 0x85d   : > { %1201 = vrot.lane.b32.xlu0 %v1198_v27, %s4445_s18 }
 0x863   : > { %1183 = vrot.lane.b32.xlu2 %v1179_v29, %s4436_s21 }
 0x865   : > { %1224 = vrot.lane.b32.xlu0 %v1220_v32, %s4447_s13 }
 0x86b   : > { %1222 = vrot.lane.b32.xlu2 %v1219_v24, %s4447_s13 }
 0x86d   : > { %1205 = vrot.lane.b32.xlu0 %v1200_v34, %s4445_s18 }
 0x873   : > { %1185 = vrot.lane.b32.xlu2 %v1180_v39, %s4436_s21 }
 0x875   : > { %1058 = vrot.lane.b32.xlu0 %v1054_v43, %s4448_s15 }
 0x87b   : > { %1056 = vrot.lane.b32.xlu2 %v1053_v49, %s4448_s15 }
 0x895   : > { %v1043_v60 = vpop.permute.xlu2 %1042 }
 0x896   : > { %v4933_v61 = vsel %vm5572_vm13, %v1043_v60, %v4929_v59 }
 0x897   : > { %1047 = vrot.lane.b32.xlu1 %v4933_v61, %s4444_s22 }
 0x89d   : > { %v4939_v0 = vpop.permute.xlu2 %1079 }
 0x89e   : > { %v1092_v2 = vmul.f32 %v4939_v0, %v4933_v61 }
 0x89f   : > { %1164 = vrot.lane.b32.xlu1 %v1159_v62, %s4446_s1 }
 0x8a0   : > { %v1241_v4 = vrot.slane %v1092_v2, 7 }
 0x8a5   : > { %v1103_v5 = vpop.permute.xlu2 %1102 }
 0x8a6   : > { %v1115_v34 = vmul.f32 %v1103_v5, %v4933_v61 }
 0x8a7   : > { %v4949_v9 = vpop.permute.xlu0 %1045  ;;  %1226 = vrot.lane.b32.xlu1 %v1221_v3, %s4447_s13 }
 0x8a8   : > { %v4967_v32 = vsel %vm5572_vm13, %v4949_v9, %v1043_v60  ;;  %v1265_v42 = vrot.slane %v1115_v34, 6 }
 0x8ad   : > { %v1126_v15 = vpop.permute.xlu2 %1125 }
 0x8ae   : > { %v1138_v48 = vmul.f32 %v1126_v15, %v4933_v61 }
 0x8af   : > { %v4953_v18 = vpop.permute.xlu0 %1081  ;;  %3945 = vrot.lane.b32.xlu1 %v3944_v17, %s4448_s15 }
 0x8b0   : > { %v1086_v54 = vsel %vm1085_vm4, %v4939_v0, %v4953_v18  ;;  %v1289_v56 = vrot.slane %v1138_v48, 5  ;;  %v1087_v6 = vsel %vm1085_vm4, %v4953_v18, %v4937_v63  ;;  %vm1062_vm4 = vcmask 687104  }
 0x8b1   : > { %v1093_v58 = vmul.f32 %v1086_v54, %v4967_v32 }
 0x8b3   : > { %v1242_v3 = vrot.slane %v1093_v58, 7 }
 0x8b5   : > { %v1161_v20 = vpop.permute.xlu2 %1160 }
 0x8b6   : > { %v1172_v35 = vmul.f32 %v1161_v20, %v4892_v12 }
 0x8b7   : > { %v1105_v21 = vpop.permute.xlu0 %1104 }
 0x8b8   : > { %v1109_v16 = vsel %vm1108_vm14, %v1103_v5, %v1105_v21  ;;  %v1330_v36 = vrot.slane %v1172_v35, 3  ;;  %v3964_v5 = vpack.i.bf16 %v1242_v3, %v1241_v4  ;;  %v1110_v0 = vsel %vm1108_vm14, %v1105_v21, %v4947_v7 }
 0x8b9   : > { %v1116_v24 = vmul.f32 %v1109_v16, %v4967_v32  ;;  %v1147_v35 = vperm.slane %v4942_v1, 2  ;;  %vm1301_vm14 = vcmask 957440  }
 0x8bb   : > { %v1266_v39 = vrot.slane %v1116_v24, 6  ;;  %v1055_v24 = vperm.slane %v4917_v38, 2 }
 0x8bd   : > { %v4959_v26 = vpop.permute.xlu2 %1183  ;;  %v3969_v37 = vpack.i.bf16 %v1266_v39, %v1265_v42 }
 0x8be   : > { %v1187_v14 = vsel %vm460_vm3, %v1182_v23, %v4959_v26 }
 0x8bf   : > { %v1193_v31 = vmul.f32 %v1187_v14, %v4888_v8  ;;  %v1128_v27 = vpop.permute.xlu0 %1127 }
 0x8c0   : > { %v1132_v44 = vsel %vm1131_vm1, %v1126_v15, %v1128_v27  ;;  %v1133_v11 = vsel %vm1131_vm1, %v1128_v27, %v4956_v19  ;;  %vm1426_vm1 = vcmask 1046528  }
 0x8c1   : > { %v1350_v29 = vrot.slane %v1193_v31, 2  ;;  %v1139_v46 = vmul.f32 %v1132_v44, %v4967_v32 }
 0x8c3   : > { %v3954_v33 = vpack.i.bf16 %v1350_v29, %v1349_v28  ;;  %v1290_v52 = vrot.slane %v1139_v46, 5 }
 0x8c5   : > { %3955 = vrot.lane.b32.xlu0 %v3954_v33, %s4449_s16  ;;  %v3974_v62 = vpack.i.bf16 %v1290_v52, %v1289_v56  ;;  %v1223_v27 = vpop.permute.xlu2 %1222 }
 0x8c6   : > { %v1234_v33 = vmul.f32 %v1223_v27, %v4892_v12 }
 0x8c7   : > { %v4973_v40 = vpop.permute.xlu0 %1162 }
 0x8c8   : > { %v1167_v41 = vsel %vm1166_vm15, %v1161_v20, %v4973_v40 }
 0x8c9   : > { %v1173_v43 = vmul.f32 %v1167_v41, %v4888_v8 }
 0x8cb   : > { %v1331_v45 = vrot.slane %v1173_v43, 3 }
 0x8cd   : > { %3970 = vrot.lane.b32.xlu0 %v3969_v37, %s4435_s12  ;;  %v3949_v30 = vpack.i.bf16 %v1331_v45, %v1330_v36  ;;  %v1186_v42 = vpop.permute.xlu2 %1185 }
 0x8ce   : > { %v1188_v45 = vsel %vm460_vm3, %v4959_v26, %v1186_v42 }
 0x8cf   : > { %v1202_v49 = vpop.permute.xlu0 %1201  ;;  %3950 = vrot.lane.b32.xlu2 %v3949_v30, %s4450_s19  ;;  %v1194_v37 = vmul.f32 %v1188_v45, %v4933_v61 }
 0x8d0   : > { %v1208_v50 = vsel %vm5570_vm2, %v1202_v49, %v4981_v47  ;;  %v1213_v51 = vmul.f32 %v1202_v49, %v4892_v12 }
 0x8d1   : > { %v1214_v53 = vmul.f32 %v1208_v50, %v4888_v8  ;;  %v1351_v30 = vrot.slane %v1194_v37, 2 }
 0x8d2   : > { %v1368_v55 = vrot.slane %v1213_v51, 1 }
 0x8d3   : > { %v1369_v57 = vrot.slane %v1214_v53, 1 }
 0x8d5   : > { %v3959_v60 = vpack.i.bf16 %v1369_v57, %v1368_v55  ;;  %v1057_v49 = vpop.permute.xlu2 %1056 }
 0x8d6   : > { %v1069_v58 = vmul.f32 %v1057_v49, %v4933_v61 }
 0x8d7   : > { %3960 = vrot.lane.b32.xlu1 %v3959_v60, %s4451_s25  ;;  %3975 = vrot.lane.b32.xlu2 %v3974_v62, %s4452_s26  ;;  %v1225_v21 = vpop.permute.xlu0 %1224 }
 0x8df   : > { %3965 = vrot.lane.b32.xlu1 %v3964_v5, %s4433_s24  ;;  %v1206_v38 = vpop.permute.xlu0 %1205 }
 0x8e7   : > { %v5050_v26 = vpop.permute.xlu0 %1058 }
 0x909   : > { %v5001_v10 = vpop.permute.xlu1 %1047 }
 0x90a   : > { %v5010_v13 = vsel %vm5572_vm13, %v5001_v10, %v4949_v9  ;;  %v1095_v15 = vmul.f32 %v4937_v63, %v5001_v10  ;;  %v1229_v63 = vsel %vm1228_vm8, %v1223_v27, %v1225_v21  ;;  %v1118_v16 = vmul.f32 %v4947_v7, %v5001_v10 }
 0x90b   : > { %v1140_v17 = vmul.f32 %v1133_v11, %v5010_v13  ;;  %v1117_v18 = vmul.f32 %v1110_v0, %v5010_v13  ;;  %v1094_v20 = vmul.f32 %v1087_v6, %v5010_v13  ;;  %v1235_v28 = vmul.f32 %v1229_v63, %v4888_v8 }
 0x90c   : > { %v1244_v23 = vrot.slane %v1095_v15, 7  ;;  %v1268_v34 = vrot.slane %v1118_v16, 6  ;;  %v1153_v8 = vmul.f32 %v1147_v35, %v4929_v59  ;;  %v1141_v12 = vmul.f32 %v4956_v19, %v5001_v10 }
 0x90d   : > { %v1291_v25 = vrot.slane %v1140_v17, 5  ;;  %v1267_v14 = vrot.slane %v1117_v18, 6  ;;  %v1243_v31 = vrot.slane %v1094_v20, 7  ;;  %v3984_v41 = vpack.i.bf16 %v1235_v28, %v1234_v33 }
 0x90e   : > { %v1314_v43 = vrot.slane %v1153_v8, 4  ;;  %v1292_v36 = vrot.slane %v1141_v12, 5  ;;  %vm1377_vm13 = vcmask 596992  }
 0x90f   : > { %1297 = vrot.lane.b32.xlu0 %v1291_v25, %s4452_s26  ;;  %1273 = vrot.lane.b32.xlu1 %v1267_v14, %s4435_s12  ;;  %v3979_v9 = vpack.i.bf16 %v1244_v23, %v1243_v31 }
 0x911   : > { %3980 = vrot.lane.b32.xlu2 %v3979_v9, %s4433_s24  ;;  %v1165_v29 = vpop.permute.xlu1 %1164 }
 0x912   : > { %v1168_v39 = vsel %vm1166_vm15, %v4973_v40, %v1165_v29  ;;  %v1209_v40 = vsel %vm5570_vm2, %v4981_v47, %v1206_v38  ;;  %vm1421_vm15 = vcmask 1045504   ;;  %v1063_v29 = vsel %vm1062_vm4, %v1057_v49, %v5050_v26 }
 0x913   : > { %v1174_v7 = vmul.f32 %v1168_v39, %v4933_v61  ;;  %v1215_v59 = vmul.f32 %v1209_v40, %v4933_v61  ;;  %v1070_v33 = vmul.f32 %v1063_v29, %v4967_v32  ;;  %vm1393_vm2 = vcmask 588800  }
 0x915   : > { %v1332_v1 = vrot.slane %v1174_v7, 3  ;;  %v1370_v46 = vrot.slane %v1215_v59, 1 }
 0x917   : > { %1060 = vrot.lane.b32.xlu0 %v1055_v24, %s4448_s15  ;;  %1275 = vrot.lane.b32.xlu1 %v1268_v34, %s4435_s12 }
 0x919   : > { %3985 = vrot.lane.b32.xlu2 %v3984_v41, %s4453_s29  ;;  %v1227_v44 = vpop.permute.xlu1 %1226 }
 0x91a   : > { %v1230_v19 = vsel %vm1228_vm8, %v1225_v21, %v1227_v44  ;;  %vm1339_vm8 = vcmask 678912  }
 0x91b   : > { %v1236_v47 = vmul.f32 %v1230_v19, %v4933_v61 }
 0x91f   : > { %1319 = vrot.lane.b32.xlu0 %v1314_v43, %s4448_s15  ;;  %1337 = vrot.lane.b32.xlu1 %v1332_v1, %s4450_s19  ;;  %s4462_s15 = smov 70   ;;  %s4463_s19 = smov 68  }
 0x921   : > { %1299 = vrot.lane.b32.xlu2 %v1292_v36, %s4452_s26  ;;  %v5048_v48 = vpop.permute.xlu1 %3945 }
 0x922   : > { %v3947_v17 = vunpack.i.l.bf16 %v5048_v48  ;;  %v3948_v34 = vunpack.i.h.bf16 %v5048_v48 }
 0x924   : > { %v1321_v43 = vsel %vm1062_vm4, %v3947_v17, %v3948_v34 }
 0x927   : > { %1375 = vrot.lane.b32.xlu0 %v1370_v46, %s4451_s25  ;;  %1391 = vrot.lane.b32.xlu1 %v1236_v47, %s4453_s29  ;;  %s4465_s29 = smov 123  }
 0x929   : > { %1356 = vrot.lane.b32.xlu2 %v1351_v30, %s4449_s16  ;;  %v5056_v52 = vpop.permute.xlu2 %3950 }
 0x92a   : > { %v3952_v20 = vunpack.i.l.bf16 %v5056_v52  ;;  %v3953_v35 = vunpack.i.h.bf16 %v5056_v52 }
 0x92c   : > { %v1340_v44 = vsel %vm1339_vm8, %v3952_v20, %v3953_v35 }
 0x931   : > { %v3976_v60 = vpop.permute.xlu2 %3975 }
 0x932   : > { %v3978_v4 = vunpack.i.h.bf16 %v3976_v60  ;;  %v3977_v5 = vunpack.i.l.bf16 %v3976_v60 }
 0x934   : > { %v1302_v11 = vsel %vm1301_vm14, %v3977_v5, %v3978_v4 }
 0x937   : > { %v5054_v51 = vpop.permute.xlu0 %3955 }
 0x938   : > { %v3957_v21 = vunpack.i.l.bf16 %v5054_v51  ;;  %v3958_v39 = vunpack.i.h.bf16 %v5054_v51 }
 0x93a   : > { %v1359_v59 = vsel %vm1358_vm12, %v3957_v21, %v3958_v39 }
 0x93f   : > { %v3971_v56 = vpop.permute.xlu0 %3970 }
 0x940   : > { %v3973_v62 = vunpack.i.h.bf16 %v3971_v56  ;;  %v3972_v2 = vunpack.i.l.bf16 %v3971_v56 }
 0x942   : > { %v1278_v6 = vsel %vm1277_vm11, %v3972_v2, %v3973_v62 }
 0x949   : > { %v5052_v50 = vpop.permute.xlu1 %3960 }
 0x94a   : > { %v3962_v31 = vunpack.i.l.bf16 %v5052_v50  ;;  %v3963_v32 = vunpack.i.h.bf16 %v5052_v50 }
 0x94c   : > { %v1378_v37 = vsel %vm1377_vm13, %v3962_v31, %v3963_v32 }
 0x951   : > { %v3966_v53 = vpop.permute.xlu1 %3965 }
 0x952   : > { %v3968_v54 = vunpack.i.h.bf16 %v3966_v53  ;;  %v3967_v55 = vunpack.i.l.bf16 %v3966_v53 }
 0x954   : > { %v1254_v57 = vsel %vm1253_vm9, %v3967_v55, %v3968_v54 }
 0x955   : > { %v1401_v3 = vsel %vm1400_vm10, %v1069_v58, %v1254_v57 }
 0x956   : > { %v1405_v0 = vsel %vm553_vm5, %v1401_v3, %v1278_v6 }
 0x957   : > { %v1409_v15 = vsel %vm554_vm7, %v1405_v0, %v1302_v11 }
 0x958   : > { %v1413_v18 = vsel %vm526_vm6, %v1409_v15, %v3947_v17 }
 0x959   : > { %v1417_v23 = vsel %vm454_vm0, %v1413_v18, %v3952_v20 }
 0x95a   : > { %v1422_v14 = vsel %vm1421_vm15, %v1417_v23, %v3957_v21 }
 0x95b   : > { %v1427_v9 = vsel %vm1426_vm1, %v1422_v14, %v3962_v31 }
 0x96b   : > { %v3981_v61 = vpop.permute.xlu2 %3980 }
 0x96c   : > { %v3982_v28 = vunpack.i.l.bf16 %v3981_v61  ;;  %v3983_v47 = vunpack.i.h.bf16 %v3981_v61 }
 0x96e   : > { %v1255_v24 = vsel %vm1253_vm9, %v3968_v54, %v3982_v28  ;;  %v1256_v56 = vsel %vm1253_vm9, %v3982_v28, %v3983_v47 }
 0x96f   : > { %v1402_v42 = vsel %vm1400_vm10, %v1070_v33, %v1255_v24 }
 0x973   : > { %v5070_v25 = vpop.permute.xlu2 %3985 }
 0x974   : > { %v3987_v27 = vunpack.i.l.bf16 %v5070_v25  ;;  %v3988_v41 = vunpack.i.h.bf16 %v5070_v25 }
 0x976   : > { %v1431_v63 = vsel %vm1400_vm10, %v3987_v27, 1.0  ;;  %v1394_v45 = vsel %vm1393_vm2, %v3987_v27, %v3988_v41 }
 0x977   : > { %v1436_v16 = vpack.c.bf16 %v1431_v63, %v1427_v9  ;;  %v1432_v48 = vsel %vm1400_vm10, %v1394_v45, 1.0 }
 0x979   : > { %1444 = vrot.lane.b32.xlu2 %v1436_v16, %s4454_s30 }
 0x97b   : > { %v1300_v54 = vpop.permute.xlu2 %1299 }
 0x981   : > { %v1298_v7 = vpop.permute.xlu0 %1297  ;;  %v1274_v8 = vpop.permute.xlu1 %1273 }
 0x982   : > { %v1303_v38 = vsel %vm1301_vm14, %v3978_v4, %v1298_v7  ;;  %v1279_v12 = vsel %vm1277_vm11, %v3973_v62, %v1274_v8 }
 0x983   : > { %v1406_v1 = vsel %vm553_vm5, %v1402_v42, %v1279_v12  ;;  %v1357_v15 = vpop.permute.xlu2 %1356 }
 0x984   : > { %v1410_v40 = vsel %vm554_vm7, %v1406_v1, %v1303_v38  ;;  %v1360_v18 = vsel %vm1358_vm12, %v3958_v39, %v1357_v15  ;;  %v1435_v39 = vld [vmem:[#allocation2 + $0x8] sm:$0xf]  ;;  %vm5589_vm12 = vcmask 1048320  }
 0x985   : > { %v1414_v36 = vsel %vm526_vm6, %v1410_v40, %v1321_v43 }
 0x986   : > { %v1418_v19 = vsel %vm454_vm0, %v1414_v36, %v1340_v44 }
 0x987   : > { %v1423_v46 = vsel %vm1421_vm15, %v1418_v19, %v1359_v59 }
 0x988   : > { %v1428_v30 = vsel %vm1426_vm1, %v1423_v46, %v1378_v37 }
 0x989   : > { %v1061_v49 = vpop.permute.xlu0 %1060  ;;  %v1276_v50 = vpop.permute.xlu1 %1275  ;;  %v1437_v51 = vpack.c.bf16 %v1432_v48, %v1428_v30 }
 0x98a   : > { %v1064_v52 = vsel %vm1062_vm4, %v5050_v26, %v1061_v49  ;;  %v1072_v53 = vmul.f32 %v1061_v49, %v5001_v10  ;;  %v1280_v60 = vsel %vm1277_vm11, %v1274_v8, %v1276_v50  ;;  %v1304_v26 = vsel %vm1301_vm14, %v1298_v7, %v1300_v54 }
 0x98b   : > { %v1071_v55 = vmul.f32 %v1064_v52, %v5010_v13  ;;  %1446 = vrot.lane.b32.xlu0 %v1437_v51, %s4454_s30 }
 0x98c   : > { %v1404_v57 = vsel %vm1400_vm10, %v1072_v53, %v3983_v47 }
 0x98d   : > { %v1403_v58 = vsel %vm1400_vm10, %v1071_v55, %v1256_v56  ;;  %v1408_v2 = vsel %vm553_vm5, %v1404_v57, %v1276_v50 }
 0x98e   : > { %v1407_v62 = vsel %vm553_vm5, %v1403_v58, %v1280_v60  ;;  %v1412_v5 = vsel %vm554_vm7, %v1408_v2, %v1300_v54  ;;  %v3641_v60 = vld [vmem:[#allocation8 + $0x38] sm:$0xff]  ;;  %v3655_v2 = vld [vmem:[#allocation8 + $0xa8] sm:$0xff] }
 0x98f   : > { %v1411_v4 = vsel %vm554_vm7, %v1407_v62, %v1304_v26  ;;  %vm1452_vm7 = vcmask 359424   ;;  %v3649_v62 = vld [vmem:[#allocation8 + $0x78] sm:$0xff]  ;;  %1732 = vmatpush.bf16.msra.mxu0 %v3641_v60  ;;  %v3640_v26 = vld [vmem:[#allocation8 + $0x30] sm:$0xff] }
 0x990   : > { %1745 = vmatpush.bf16.msra.mxu1 %v3649_v62 }
 0x991   : > { %v1320_v10 = vpop.permute.xlu0 %1319  ;;  %v1338_v3 = vpop.permute.xlu1 %1337 }
 0x992   : > { %v1322_v13 = vsel %vm1062_vm4, %v3948_v34, %v1320_v10  ;;  %v1416_v0 = vsel %vm526_vm6, %v1412_v5, %v1320_v10  ;;  %v1341_v11 = vsel %vm1339_vm8, %v3953_v35, %v1338_v3  ;;  %v3648_v10 = vld [vmem:[#allocation8 + $0x70] sm:$0xff]  ;;  %v3653_v5 = vld [vmem:[#allocation8 + $0x98] sm:$0xff]  ;;  %vm1856_vm4 = vcmask 1006592  }
 0x993   : > { %v1415_v6 = vsel %vm526_vm6, %v1411_v4, %v1322_v13  ;;  %v1420_v61 = vsel %vm454_vm0, %v1416_v0, %v1338_v3  ;;  %v3654_v3 = vld [vmem:[#allocation8 + $0xa0] sm:$0xff]  ;;  %1733 = vmatpush.bf16.msra.mxu0 %v3640_v26  ;;  %v3639_v13 = vld [vmem:[#allocation8 + $0x28] sm:$0xff]  ;;  %vm1909_vm8 = vcmask 441344  }
 0x994   : > { %v1419_v17 = vsel %vm454_vm0, %v1415_v6, %v1341_v11  ;;  %v1425_v23 = vsel %vm1421_vm15, %v1420_v61, %v1357_v15  ;;  %1746 = vmatpush.bf16.msra.mxu1 %v3648_v10  ;;  %v3647_v4 = vld [vmem:[#allocation8 + $0x68] sm:$0xff]  ;;  %v3638_v6 = vld [vmem:[#allocation8 + $0x20] sm:$0xff]  ;;  %v3652_v11 = vld [vmem:[#allocation8 + $0x90] sm:$0xff] }
 0x995   : > { %v1424_v25 = vsel %vm1421_vm15, %v1419_v17, %v1360_v18  ;;  %v3646_v0 = vld [vmem:[#allocation8 + $0x60] sm:$0xff]  ;;  %v3637_v15 = vld [vmem:[#allocation8 + $0x18] sm:$0xff]  ;;  %v3651_v61 = vld [vmem:[#allocation8 + $0x88] sm:$0xff] }
 0x996   : > { %v3645_v17 = vld [vmem:[#allocation8 + $0x58] sm:$0xff]  ;;  %v3636_v18 = vld [vmem:[#allocation8 + $0x10] sm:$0xff] }
 0x997   : > { %1734 = vmatpush.bf16.msra.mxu0 %v3639_v13 }
 0x998   : > { %1747 = vmatpush.bf16.msra.mxu1 %v3647_v4 }
 0x999   : > { %v1376_v20 = vpop.permute.xlu0 %1375  ;;  %v1392_v21 = vpop.permute.xlu1 %1391 }
 0x99a   : > { %v1379_v14 = vsel %vm1377_vm13, %v3963_v32, %v1376_v20  ;;  %v1430_v31 = vsel %vm1426_vm1, %v1425_v23, %v1376_v20  ;;  %v1395_v27 = vsel %vm1393_vm2, %v3988_v41, %v1392_v21  ;;  %v1434_v9 = vsel %vm1400_vm10, %v1392_v21, 1.0  ;;  %vm5590_vm2 = vmmov %vm5589_vm12  ;;  %v3644_v20 = vld [vmem:[#allocation8 + $0x50] sm:$0xff]  ;;  %v3635_v23 = vld [vmem:[#allocation8 + $0x8] sm:$0xff] }
 0x99b   : > { %v1433_v63 = vsel %vm1400_vm10, %v1395_v27, 1.0  ;;  %v1439_v16 = vpack.c.bf16 %v1434_v9, %v1430_v31  ;;  %v1429_v28 = vsel %vm1426_vm1, %v1424_v25, %v1379_v14  ;;  %1735 = vmatpush.bf16.msra.mxu0 %v3638_v6  ;;  %v3643_v21 = vld [vmem:[#allocation8 + $0x48] sm:$0xff]  ;;  %v3650_v25 = vld [vmem:[#allocation8 + $0x80] sm:$0xff]  ;;  %vm5591_vm1 = vcmask 785408  }
 0x99c   : > { %v1438_v29 = vpack.c.bf16 %v1433_v63, %v1429_v28  ;;  %1748 = vmatpush.bf16.msra.mxu1 %v3646_v0  ;;  %v3634_v14 = vld [vmem:[#allocation8] sm:$0xff] }
 0x99d   : > { %1450 = vrot.lane.b32.xlu2 %v1439_v16, %s4454_s30  ;;  %v3642_v31 = vld [vmem:[#allocation8 + $0x40] sm:$0xff] }
 0x99e   : > { %1448 = vrot.lane.b32.xlu1 %v1438_v29, %s4454_s30  ;;  %s4466_s30 = smov 54  }
 0x99f   : > { %1736 = vmatpush.bf16.msra.mxu0 %v3637_v15 }
 0x9a0   : > { %1749 = vmatpush.bf16.msra.mxu1 %v3645_v17 }
 0x9a3   : > { %1737 = vmatpush.bf16.msra.mxu0 %v3636_v18 }
 0x9a4   : > { %1750 = vmatpush.bf16.msra.mxu1 %v3644_v20 }
 0x9a7   : > { %1738 = vmatpush.bf16.msra.mxu0 %v3635_v23 }
 0x9a8   : > { %1751 = vmatpush.bf16.msra.mxu1 %v3643_v21 }
 0x9ab   : > { %1739 = vmatpush.bf16.msra.mxu0 %v3634_v14 }
 0x9ac   : > { %1752 = vmatpush.bf16.msra.mxu1 %v3642_v31 }
 0x9d3   : > { %v1445_v24 = vpop.permute.xlu2 %1444 }
 0x9f7   : > { %v1451_v41 = vpop.permute.xlu2 %1450 }
 0x9fd   : > { %v1447_v33 = vpop.permute.xlu0 %1446 }
 0x9fe   : > { %v1453_v34 = vsel %vm1452_vm7, %v1445_v24, %v1447_v33 }
 0x9ff   : > { %v1460_v35 = vsel %vm454_vm0, %v1453_v34, 0 }
 0xa00   : > { %1475 = vmatpush.bf16.msrb.mxu2 %v1460_v35 }
 0xa03   : > { %3427 = vmatmul.msk.bf16.vlgmr.msrb.gmra.mxu2 %vm460_vm3, %v1435_v39 }
 0xa10   : > { %v1449_v7 = vpop.permute.xlu1 %1448 }
 0xa11   : > { %v1454_v8 = vsel %vm1452_vm7, %v1447_v33, %v1449_v7  ;;  %v1455_v38 = vsel %vm1452_vm7, %v1449_v7, %v1451_v41  ;;  %vm2545_vm7 = vcmask 1047584  }
 0xa12   : > { %v1463_v12 = vsel %vm454_vm0, %v1454_v8, 0  ;;  %v1466_v42 = vsel %vm454_vm0, %v1455_v38, 0 }
 0xa13   : > { %1488 = vmatpush.bf16.msra.mxu2 %v1463_v12  ;;  %1501 = vmatpush.bf16.msrb.mxu3 %v1466_v42 }
 0xa16   : > { %3428 = vmatmul.msk.bf16.vlgmr.msra.gmra.mxu2 %vm460_vm3, %v1435_v39  ;;  %3429 = vmatmul.msk.bf16.vlgmr.msrb.gmra.mxu3 %vm460_vm3, %v1435_v39 }
 0xa17   : > { %1760 = vmatpush.bf16.msrb.mxu2 %v3655_v2 }
 0xa1b   : > { %1761 = vmatpush.bf16.msrb.mxu2 %v3654_v3  ;;  %v1778_v3 = vld [vmem:[#allocation5 + $0x18] ss:$0 sm:$0xff] }
 0xa1f   : > { %1762 = vmatpush.bf16.msrb.mxu2 %v3653_v5 }
 0xa23   : > { %1763 = vmatpush.bf16.msrb.mxu2 %v3652_v11 }
 0xa27   : > { %1764 = vmatpush.bf16.msrb.mxu2 %v3651_v61 }
 0xa2b   : > { %1765 = vmatpush.bf16.msrb.mxu2 %v3650_v25 }
 0xa86   : > { %v1477_v32 = vpop.f32.mrf.mxu2 }
 0xa87   : > { %v1507_v1 = vmax.f32 %v1477_v32, 0.0 }
 0xa89   : > { %1510 = vrot.lane.b32.xlu0 %v1507_v1, %s4444_s22 }
 0xa8e   : > { %v1479_v43 = vpop.f32.mrf.mxu2 }
 0xa99   : > { %v1490_v40 = vpop.f32.mrf.mxu2  ;;  %v1503_v44 = vpop.f32.mrf.mxu3 }
 0xa9a   : > { %v1508_v36 = vmax.f32 %v1490_v40, 0.0  ;;  %v1509_v37 = vmax.f32 %v1503_v44, 0.0  ;;  %v1814_v40 = vld [vmem:[#allocation5 + $0x1e] ss:$0 sm:$0xff]  ;;  %v1792_v44 = vld [vmem:[#allocation5 + $0x1a] ss:$0 sm:$0xff] }
 0xa9c   : > { %v3989_v45 = vpack.i.bf16 %v1508_v36, %v1507_v1 }
 0xa9e   : > { %3990 = vrot.lane.b32.xlu1 %v3989_v45, %s4433_s24  ;;  %v1808_v45 = vld [vmem:[#allocation5 + $0x1d] ss:$0 sm:$0xff] }
 0xaa1   : > { %v1492_v59 = vpop.f32.mrf.mxu2  ;;  %v1505_v19 = vpop.f32.mrf.mxu3 }
 0xaa2   : > { %v1785_v59 = vld [vmem:[#allocation5 + $0x19] ss:$0 sm:$0xff] }
 0xafb   : > { %v1511_v46 = vpop.permute.xlu0 %1510 }
 0xafc   : > { %v1512_v47 = vsel %vm5589_vm12, %v1511_v46, %v1509_v37  ;;  %v1820_v46 = vld [vmem:[#allocation5 + $0x1f] ss:$0 sm:$0xff]  ;;  %vm2615_vm12 = vcmask 400384  }
 0xafd   : > { %1520 = vrot.lane.b32.xlu2 %v1512_v47, %s4433_s24  ;;  %v1799_v47 = vld [vmem:[#allocation5 + $0x1b] ss:$0 sm:$0xff] }
 0xb10   : > { %v3991_v30 = vpop.permute.xlu1 %3990 }
 0xb11   : > { %v3993_v48 = vunpack.i.h.bf16 %v3991_v30  ;;  %v3992_v49 = vunpack.i.l.bf16 %v3991_v30 }
 0xb13   : > { %v1522_v50 = vsel %vm1253_vm9, %v3992_v49, %v3993_v48 }
 0xb14   : > { %v1527_v51 = vmax.f32 %v1507_v1, %v1522_v50 }
 0xb16   : > { %1530 = vrot.lane.b32.xlu0 %v1527_v51, %s4444_s22  ;;  %s4461_s22 = smov 79  }
 0xb57   : > { %v1521_v52 = vpop.permute.xlu2 %1520 }
 0xb58   : > { %v1523_v53 = vsel %vm1253_vm9, %v3993_v48, %v1521_v52  ;;  %v1529_v55 = vmax.f32 %v1509_v37, %v1521_v52 }
 0xb59   : > { %v1528_v54 = vmax.f32 %v1508_v36, %v1523_v53  ;;  %v1826_v36 = vld [vmem:[#allocation5 + $0x50] ss:$0 sm:$0xff]  ;;  %v5169_v53 = vld [vmem:[#allocation5 + $0x1c] ss:$0 sm:$0xff] }
 0xb5b   : > { %1538 = vrot.lane.b32.xlu2 %v1528_v54, %s4452_s26 }
 0xb63   : > { %1828 = vrot.lane.b32.xlu2 %v1826_v36, %s4458_s2  ;;  %s4471_s2 = smov 2  }
 0xb6b   : > { %1810 = vrot.lane.b32.xlu2 %v1808_v45, %s4446_s1 }
 0xb73   : > { %1787 = vrot.lane.b32.xlu2 %v1785_v59, %s4459_s11  ;;  %s4472_s11 = smov 13  }
 0xb88   : > { %v1531_v56 = vpop.permute.xlu0 %1530 }
 0xb89   : > { %v1532_v57 = vsel %vm5590_vm2, %v1531_v56, %v1529_v55  ;;  %vm2737_vm2 = vcmask 31744  }
 0xb8a   : > { %v3994_v58 = vpack.i.bf16 %v1527_v51, %v1532_v57 }
 0xb8c   : > { %3995 = vrot.lane.b32.xlu1 %v3994_v58, %s4452_s26  ;;  %s4464_s26 = smov 69  }
 0xbb5   : > { %v1539_v16 = vpop.permute.xlu2 %1538 }
 0xbbd   : > { %v5157_v30 = vpop.permute.xlu2 %1828 }
 0xbfe   : > { %v3996_v27 = vpop.permute.xlu1 %3995 }
 0xbff   : > { %v3998_v9 = vunpack.i.h.bf16 %v3996_v27  ;;  %v3997_v63 = vunpack.i.l.bf16 %v3996_v27 }
 0xc01   : > { %v1542_v28 = vsel %vm1301_vm14, %v3998_v9, %v1539_v16  ;;  %v1543_v29 = vsel %vm1301_vm14, %v1539_v16, %v3997_v63  ;;  %v1549_v24 = vmax.f32 %v1529_v55, %v3997_v63  ;;  %vm1771_vm14 = vcmask 1048192  }
 0xc02   : > { %v1547_v33 = vmax.f32 %v1527_v51, %v1542_v28  ;;  %v1548_v34 = vmax.f32 %v1528_v54, %v1543_v29  ;;  %v5171_v54 = vpop.permute.xlu2 %1810 }
 0xc03   : > { %v1552_v35 = vpack.c.bf16 %v1549_v24, %v1549_v24 }
 0xc04   : > { %v1550_v39 = vpack.c.bf16 %v1547_v33, %v1547_v33  ;;  %v1551_v41 = vpack.c.bf16 %v1548_v34, %v1548_v34 }
 0xc05   : > { %3518 = vmatmul.msk.bf16.vlgmr.msrb.gmra.mxu2 %vm5591_vm1, %v1552_v35  ;;  %vm2758_vm1 = vcmask 1047568  }
 0xc06   : > { %1740 = vmatmul.bf16.vlgmr.msra.gmra.mxu0 %v1550_v39  ;;  %1753 = vmatmul.bf16.vlgmr.msra.gmra.mxu1 %v1551_v41 }
 0xc0a   : > { %v5191_v5 = vpop.permute.xlu2 %1787 }
 0xc83   : > { %v1741_v7 = vpop.f32.mrf.mxu0  ;;  %v1754_v8 = vpop.f32.mrf.mxu1 }
 0xc84   : > { %v1755_v38 = vadd.f32 %v1754_v8, %v1741_v7 }
 0xc88   : > { %v1767_v12 = vpop.f32.mrf.mxu2 }
 0xc89   : > { %v1768_v42 = vadd.f32 %v1767_v12, %v1755_v38 }
 0xc8b   : > { %v1756_v32 = vpop.f32.mrf.mxu1  ;;  %1772 = vrot.lane.b32.xlu0 %v1768_v42, %s4455_s28  ;;  %v1743_v1 = vpop.f32.mrf.mxu0  ;;  %v1807_v58 = vmul.f32 %v5169_v53, %v1768_v42 }
 0xc8c   : > { %v1919_v1 = vsel %vm526_vm6, 4294967295, %v4437_v22  ;;  %vm2122_vm6 = vcmask 654336  }
 0xc90   : > { %v1769_v43 = vpop.f32.mrf.mxu2 }
 0xc91   : > { %v5218_v43 = vsel %vm454_vm0, %v1919_v1, 0 }
 0xc93   : > { %1816 = vrot.lane.b32.xlu0 %v1814_v40, %s4456_s20 }
 0xc9b   : > { %1794 = vrot.lane.b32.xlu0 %v1792_v44, %s4457_s27  ;;  %s4470_s27 = smov 14  }
 0xcfd   : > { %v1773_v19 = vpop.permute.xlu0 %1772 }
 0xcfe   : > { %v1774_v37 = vsel %vm1771_vm14, %v1773_v19, %v1768_v42 }
 0xcff   : > { %1775 = vrot.lane.b32.xlu1 %v1774_v37, %s4455_s28 }
 0xd05   : > { %v5159_v48 = vpop.permute.xlu0 %1816 }
 0xd07   : > { %1822 = vrot.lane.b32.xlu1 %v1820_v46, %s4460_s5  ;;  %s4473_s5 = smov 115  }
 0xd0d   : > { %v5176_v57 = vpop.permute.xlu0 %1794 }
 0xd0f   : > { %1801 = vrot.lane.b32.xlu1 %v1799_v47, %s4461_s22 }
 0xd71   : > { %v5161_v49 = vpop.permute.xlu1 %1775 }
 0xd72   : > { %v1777_v50 = vsel %vm1771_vm14, %v5161_v49, %v1768_v42  ;;  %v1798_v2 = vmul.f32 %v5176_v57, %v5161_v49  ;;  %v1791_v11 = vmul.f32 %v5191_v5, %v5161_v49 }
 0xd73   : > { %v1819_v51 = vmul.f32 %v5159_v48, %v1777_v50  ;;  %v1831_v52 = vmul.f32 %v5157_v30, %v1777_v50  ;;  %v1813_v60 = vmul.f32 %v5171_v54, %v1777_v50  ;;  %v1797_v62 = vmul.f32 %v5176_v57, %v1777_v50 }
 0xd74   : > { %v1790_v0 = vmul.f32 %v5191_v5, %v1777_v50 }
 0xd75   : > { %1869 = vrot.lane.b32.xlu1 %v1819_v51, %s4462_s15  ;;  %1877 = vrot.lane.b32.xlu0 %v1831_v52, %s4463_s19  ;;  %v3999_v10 = vpack.i.bf16 %v1798_v2, %v1797_v62 }
 0xd76   : > { %v4009_v15 = vpack.i.bf16 %v1791_v11, %v1790_v0 }
 0xd79   : > { %v5173_v55 = vpop.permute.xlu1 %1822 }
 0xd7a   : > { %v1825_v56 = vmul.f32 %v5173_v55, %v1777_v50 }
 0xd7c   : > { %1873 = vrot.lane.b32.xlu2 %v1825_v56, %s4464_s26 }
 0xd7d   : > { %1861 = vrot.lane.b32.xlu0 %v1807_v58, %s4449_s16  ;;  %1865 = vrot.lane.b32.xlu1 %v1813_v60, %s4451_s25 }
 0xd81   : > { %v5186_v26 = vpop.permute.xlu1 %1801 }
 0xd82   : > { %v1804_v13 = vmul.f32 %v5186_v26, %v1777_v50  ;;  %v1805_v4 = vmul.f32 %v5186_v26, %v5161_v49 }
 0xd84   : > { %4000 = vrot.lane.b32.xlu2 %v3999_v10, %s4435_s12  ;;  %v4004_v6 = vpack.i.bf16 %v1805_v4, %v1804_v13 }
 0xd85   : > { %1780 = vrot.lane.b32.xlu1 %v1778_v3, %s4449_s16 }
 0xd86   : > { %4005 = vrot.lane.b32.xlu0 %v4004_v6, %s4465_s29 }
 0xd8c   : > { %4010 = vrot.lane.b32.xlu2 %v4009_v15, %s4433_s24 }
 0xdd6   : > { %v1874_v17 = vpop.permute.xlu2 %1873 }
 0xdde   : > { %v4001_v20 = vpop.permute.xlu2 %4000 }
 0xddf   : > { %v4003_v16 = vunpack.i.h.bf16 %v4001_v20  ;;  %v4002_v28 = vunpack.i.l.bf16 %v4001_v20 }
 0xde1   : > { %v1847_v8 = vsel %vm1277_vm11, %v4002_v28, %v4003_v16 }
 0xde6   : > { %v4011_v27 = vpop.permute.xlu2 %4010 }
 0xde7   : > { %v1870_v61 = vpop.permute.xlu1 %1869  ;;  %v1878_v18 = vpop.permute.xlu0 %1877  ;;  %v4013_v9 = vunpack.i.h.bf16 %v4011_v27  ;;  %v4012_v63 = vunpack.i.l.bf16 %v4011_v27 }
 0xde8   : > { %v1886_v23 = vpack.c.bf16 %v1874_v17, %v1870_v61  ;;  %v1887_v21 = vpack.c.bf16 1.0, %v1878_v18 }
 0xde9   : > { %v1838_v39 = vsel %vm1253_vm9, %v4012_v63, %v4013_v9 }
 0xdea   : > { %1907 = vrot.lane.b32.xlu0 %v1887_v21, %s4466_s30  ;;  %1905 = vrot.lane.b32.xlu1 %v1886_v23, %s4466_s30 }
 0xdef   : > { %v1862_v25 = vpop.permute.xlu0 %1861  ;;  %v1866_v14 = vpop.permute.xlu1 %1865 }
 0xdf0   : > { %v1885_v31 = vpack.c.bf16 %v1866_v14, %v1862_v25 }
 0xdf2   : > { %1903 = vrot.lane.b32.xlu2 %v1885_v31, %s4466_s30 }
 0xdf7   : > { %v5203_v29 = vpop.permute.xlu1 %1780 }
 0xdf8   : > { %v1783_v24 = vmul.f32 %v5203_v29, %v1777_v50  ;;  %v4006_v33 = vpop.permute.xlu0 %4005  ;;  %v1784_v42 = vmul.f32 %v5203_v29, %v5161_v49  ;;  %v1880_v50 = vld [vmem:[#allocation2 + $0xc] sm:$0xf] }
 0xdf9   : > { %v4008_v34 = vunpack.i.h.bf16 %v4006_v33  ;;  %v4007_v35 = vunpack.i.l.bf16 %v4006_v33 }
 0xdfa   : > { %v1881_v41 = vpack.c.bf16 %v1838_v39, %v1783_v24  ;;  %v1882_v32 = vpack.c.bf16 %v4013_v9, %v1784_v42 }
 0xdfb   : > { %v1884_v7 = vpack.c.bf16 %v4008_v34, %v4003_v16  ;;  %v1857_v38 = vsel %vm1856_vm4, %v4007_v35, %v4008_v34 }
 0xdfc   : > { %1895 = vrot.lane.b32.xlu2 %v1881_v41, %s4466_s30  ;;  %v1883_v12 = vpack.c.bf16 %v1857_v38, %v1847_v8 }
 0xdfd   : > { %1901 = vrot.lane.b32.xlu1 %v1884_v7, %s4466_s30 }
 0xdfe   : > { %1899 = vrot.lane.b32.xlu0 %v1883_v12, %s4466_s30 }
 0xe06   : > { %1897 = vrot.lane.b32.xlu0 %v1882_v32, %s4466_s30 }
 0xe4c   : > { %v1904_v45 = vpop.permute.xlu2 %1903 }
 0xe56   : > { %v1896_v46 = vpop.permute.xlu2 %1895 }
 0xe5c   : > { %v1908_v40 = vpop.permute.xlu0 %1907  ;;  %v1906_v36 = vpop.permute.xlu1 %1905 }
 0xe5d   : > { %v1922_v44 = vand.u32 %v5218_v43, %v1908_v40 }
 0xe5f   : > { %1927 = vmatpush.bf16.msra.mxu3 %v1922_v44 }
 0xe63   : > { %1928 = vmatpush.bf16.msra.mxu3 %v1906_v36 }
 0xe67   : > { %1929 = vmatpush.bf16.msra.mxu3 %v1904_v45 }
 0xe6f   : > { %v1902_v59 = vpop.permute.xlu1 %1901 }
 0xe70   : > { %v1900_v19 = vpop.permute.xlu0 %1899 }
 0xe71   : > { %v1911_v37 = vsel %vm1909_vm8, %v1900_v19, %v1902_v59 }
 0xe72   : > { %1930 = vmatpush.bf16.msra.mxu3 %v1911_v37  ;;  %v2004_v37 = vld [vmem:[#allocation2 + $0x10] sm:$0xf] }
 0xe78   : > { %v1898_v47 = vpop.permute.xlu0 %1897 }
 0xe79   : > { %v1910_v49 = vsel %vm1909_vm8, %v1896_v46, %v1898_v47 }
 0xe7a   : > { %1931 = vmatpush.bf16.msra.mxu3 %v1910_v49 }
 0xe7d   : > { %3519 = vmatmul.msk.bf16.vlgmr.msra.gmra.mxu3 %vm1377_vm13, %v1880_v50 }
 0xf00   : > { %v1933_v51 = vpop.f32.mrf.mxu3 }
 0xf01   : > { %v1937_v52 = vmax.f32 %v1933_v51, 0.0 }
 0xf03   : > { %1938 = vrot.lane.b32.xlu1 %v1937_v52, %s4455_s28  ;;  %v1952_v11 = vmul.f32 %v1937_v52, %v5169_v53 }
 0xf08   : > { %v1935_v56 = vpop.f32.mrf.mxu3 }
 0xf75   : > { %v1939_v58 = vpop.permute.xlu1 %1938 }
 0xf76   : > { %v1940_v60 = vsel %vm1771_vm14, %v1939_v58, %v1937_v52 }
 0xf77   : > { %1941 = vrot.lane.b32.xlu2 %v1940_v60, %s4455_s28 }
 0xfd1   : > { %v1942_v62 = vpop.permute.xlu2 %1941 }
 0xfd2   : > { %v1943_v2 = vsel %vm1771_vm14, %v1942_v62, %v1937_v52  ;;  %v1949_v6 = vmul.f32 %v1942_v62, %v5176_v57  ;;  %v1947_v17 = vmul.f32 %v1942_v62, %v5191_v5  ;;  %v1945_v38 = vmul.f32 %v1942_v62, %v5203_v29 }
 0xfd3   : > { %v1956_v10 = vmul.f32 %v1943_v2, %v5157_v30  ;;  %v1955_v3 = vmul.f32 %v1943_v2, %v5173_v55  ;;  %v1954_v13 = vmul.f32 %v1943_v2, %v5159_v48  ;;  %v1948_v4 = vmul.f32 %v1943_v2, %v5176_v57 }
 0xfd4   : > { %v1953_v15 = vmul.f32 %v1943_v2, %v5171_v54  ;;  %v1950_v30 = vmul.f32 %v1943_v2, %v5186_v26  ;;  %v1951_v48 = vmul.f32 %v1942_v62, %v5186_v26  ;;  %v1946_v55 = vmul.f32 %v1943_v2, %v5191_v5 }
 0xfd5   : > { %2001 = vrot.lane.b32.xlu0 %v1956_v10, %s4463_s19  ;;  %1997 = vrot.lane.b32.xlu2 %v1955_v3, %s4464_s26  ;;  %v4014_v0 = vpack.i.bf16 %v1949_v6, %v1948_v4  ;;  %v1944_v34 = vmul.f32 %v1943_v2, %v5203_v29  ;;  %v3660_v10 = vld [vmem:[#allocation10 + $0x20] sm:$0xff]  ;;  %v3659_v3 = vld [vmem:[#allocation10 + $0x18] sm:$0xff]  ;;  %v3657_v4 = vld [vmem:[#allocation10 + $0x8] sm:$0xff]  ;;  %s3192_s26 = scalar_lea.hbm %s5563_s10, %s4554_s17 }
 0xfd6   : > { %1993 = vrot.lane.b32.xlu1 %v1954_v13, %s4462_s15  ;;  %v4019_v57 = vpack.i.bf16 %v1951_v48, %v1950_v30  ;;  %v4024_v61 = vpack.i.bf16 %v1947_v17, %v1946_v55  ;;  %2129 = vmatpush.bf16.msrb.mxu1 %v3660_v10  ;;  %v3658_v13 = vld [vmem:[#allocation10 + $0x10] sm:$0xff]  ;;  %v2178_v17 = vld [vmem:[#allocation5 + $0x26] ss:$0 sm:$0xff] }
 0xfda   : > { %2130 = vmatpush.bf16.msrb.mxu1 %v3659_v3 }
 0xfdd   : > { %4015 = vrot.lane.b32.xlu2 %v4014_v0, %s4435_s12  ;;  %1985 = vrot.lane.b32.xlu0 %v1952_v11, %s4449_s16  ;;  %v3656_v11 = vld [vmem:[#allocation10] sm:$0xff]  ;;  %s4467_s16 = smov 16  }
 0xfde   : > { %1989 = vrot.lane.b32.xlu1 %v1953_v15, %s4451_s25  ;;  %2131 = vmatpush.bf16.msrb.mxu1 %v3658_v13  ;;  %s4468_s25 = smov 15   ;;  %v3544_v13 = vld [vmem:[#allocation2 + $0x14] sm:$0xf] }
 0xfe2   : > { %2132 = vmatpush.bf16.msrb.mxu1 %v3657_v4  ;;  %v3661_v4 = vld [vmem:[#allocation2 + $0x48] sm:$0xf0] }
 0xfe5   : > { %4020 = vrot.lane.b32.xlu0 %v4019_v57, %s4465_s29 }
 0xfe6   : > { %4025 = vrot.lane.b32.xlu1 %v4024_v61, %s4433_s24  ;;  %2133 = vmatpush.bf16.msrb.mxu1 %v3656_v11  ;;  %v2158_v61 = vld [vmem:[#allocation5 + $0x22] ss:$0 sm:$0xff] }
0x102f   : > { %v1998_v54 = vpop.permute.xlu2 %1997 }
0x1037   : > { %v4016_v14 = vpop.permute.xlu2 %4015 }
0x1038   : > { %v4018_v5 = vunpack.i.h.bf16 %v4016_v14  ;;  %v4017_v31 = vunpack.i.l.bf16 %v4016_v14 }
0x103a   : > { %v1972_v35 = vsel %vm1277_vm11, %v4017_v31, %v4018_v5  ;;  %vm2527_vm11 = vcmask 130048  }
0x1047   : > { %v2002_v53 = vpop.permute.xlu0 %2001 }
0x1048   : > { %v2011_v18 = vpack.c.bf16 1.0, %v2002_v53  ;;  %v1994_v20 = vpop.permute.xlu1 %1993  ;;  %v2190_v53 = vld [vmem:[#allocation5 + $0x58] ss:$0 sm:$0xff] }
0x1049   : > { %v2010_v23 = vpack.c.bf16 %v1998_v54, %v1994_v20  ;;  %v2172_v54 = vld [vmem:[#allocation5 + $0x25] ss:$0 sm:$0xff] }
0x104a   : > { %2031 = vrot.lane.b32.xlu2 %v2011_v18, %s4466_s30  ;;  %v2152_v18 = vld [vmem:[#allocation5 + $0x21] ss:$0 sm:$0xff] }
0x104b   : > { %2029 = vrot.lane.b32.xlu0 %v2010_v23, %s4466_s30 }
0x104f   : > { %v1986_v26 = vpop.permute.xlu0 %1985 }
0x1050   : > { %v1990_v21 = vpop.permute.xlu1 %1989 }
0x1051   : > { %v2009_v25 = vpack.c.bf16 %v1990_v21, %v1986_v26  ;;  %v2184_v26 = vld [vmem:[#allocation5 + $0x27] ss:$0 sm:$0xff]  ;;  %v2164_v21 = vld [vmem:[#allocation5 + $0x23] ss:$0 sm:$0xff] }
0x1053   : > { %2027 = vrot.lane.b32.xlu1 %v2009_v25, %s4466_s30 }
0x1057   : > { %v4021_v27 = vpop.permute.xlu0 %4020 }
0x1058   : > { %v4026_v9 = vpop.permute.xlu1 %4025  ;;  %v4023_v63 = vunpack.i.h.bf16 %v4021_v27  ;;  %v4022_v16 = vunpack.i.l.bf16 %v4021_v27 }
0x1059   : > { %v4028_v28 = vunpack.i.h.bf16 %v4026_v9  ;;  %v4027_v24 = vunpack.i.l.bf16 %v4026_v9 }
0x105a   : > { %v2008_v33 = vpack.c.bf16 %v4023_v63, %v4018_v5  ;;  %v1981_v39 = vsel %vm1856_vm4, %v4022_v16, %v4023_v63  ;;  %vm3032_vm4 = vcmask 15360  }
0x105b   : > { %v1963_v41 = vsel %vm1253_vm9, %v4027_v24, %v4028_v28  ;;  %v2007_v7 = vpack.c.bf16 %v1981_v39, %v1972_v35  ;;  %v2006_v12 = vpack.c.bf16 %v4028_v28, %v1945_v38  ;;  %vm2139_vm9 = vcmask 1047680   ;;  %v5292_v24 = vld [vmem:[#allocation5 + $0x24] ss:$0 sm:$0xff] }
0x105c   : > { %2025 = vrot.lane.b32.xlu0 %v2008_v33, %s4466_s30  ;;  %v2005_v8 = vpack.c.bf16 %v1963_v41, %v1944_v34 }
0x105d   : > { %2023 = vrot.lane.b32.xlu2 %v2007_v7, %s4466_s30 }
0x105e   : > { %2019 = vrot.lane.b32.xlu1 %v2005_v8, %s4466_s30  ;;  %v2146_v8 = vld [vmem:[#allocation5 + $0x20] ss:$0 sm:$0xff] }
0x1065   : > { %2021 = vrot.lane.b32.xlu2 %v2006_v12, %s4466_s30 }
0x10a4   : > { %v2032_v42 = vpop.permute.xlu2 %2031 }
0x10a5   : > { %v2043_v32 = vand.u32 %v2032_v42, %v5218_v43 }
0x10a7   : > { %2048 = vmatpush.bf16.msrb.mxu0 %v2043_v32 }
0x10b7   : > { %v2024_v44 = vpop.permute.xlu2 %2023 }
0x10bd   : > { %v2030_v1 = vpop.permute.xlu0 %2029 }
0x10be   : > { %2049 = vmatpush.bf16.msrb.mxu0 %v2030_v1 }
0x10bf   : > { %v2022_v19 = vpop.permute.xlu2 %2021 }
0x10c5   : > { %v2028_v40 = vpop.permute.xlu1 %2027 }
0x10c6   : > { %2050 = vmatpush.bf16.msrb.mxu0 %v2028_v40 }
0x10ce   : > { %v2026_v36 = vpop.permute.xlu0 %2025 }
0x10cf   : > { %v2034_v45 = vsel %vm1909_vm8, %v2024_v44, %v2026_v36 }
0x10d0   : > { %v2020_v59 = vpop.permute.xlu1 %2019  ;;  %2051 = vmatpush.bf16.msrb.mxu0 %v2034_v45 }
0x10d1   : > { %v2033_v29 = vsel %vm1909_vm8, %v2020_v59, %v2022_v19  ;;  %vm5592_vm8 = vcmask 89088  }
0x10d4   : > { %2052 = vmatpush.bf16.msrb.mxu0 %v2033_v29 }
0x10d7   : > { %3520 = vmatmul.msk.bf16.vlgmr.msrb.gmra.mxu0 %vm1377_vm13, %v2004_v37 }
0x1154   : > { %v2054_v46 = vpop.f32.mrf.mxu0 }
0x1155   : > { %v2058_v47 = vmax.f32 %v2054_v46, 0.0 }
0x1157   : > { %2059 = vrot.lane.b32.xlu0 %v2058_v47, %s4455_s28 }
0x115c   : > { %v2056_v49 = vpop.f32.mrf.mxu0 }
0x11c9   : > { %v2060_v50 = vpop.permute.xlu0 %2059 }
0x11ca   : > { %v2061_v51 = vsel %vm1771_vm14, %v2060_v50, %v2058_v47 }
0x11cb   : > { %2062 = vrot.lane.b32.xlu1 %v2061_v51, %s4455_s28 }
0x123d   : > { %v2063_v52 = vpop.permute.xlu1 %2062 }
0x123e   : > { %v2064_v56 = vsel %vm1771_vm14, %v2063_v52, %v2058_v47 }
0x123f   : > { %2066 = vrot.lane.b32.xlu2 %v2064_v56, %s4433_s24 }
0x1299   : > { %v2067_v58 = vpop.permute.xlu2 %2066 }
0x129a   : > { %v2069_v60 = vmax.f32 %v2058_v47, %v2067_v58 }
0x129c   : > { %2070 = vrot.lane.b32.xlu0 %v2069_v60, %s4455_s28 }
0x130e   : > { %v2071_v62 = vpop.permute.xlu0 %2070 }
0x130f   : > { %v2072_v2 = vsel %vm1771_vm14, %v2071_v62, %v2069_v60 }
0x1310   : > { %2073 = vrot.lane.b32.xlu1 %v2072_v2, %s4455_s28  ;;  %s4469_s28 = smov 3  }
0x1382   : > { %v2074_v6 = vpop.permute.xlu1 %2073 }
0x1383   : > { %v2075_v0 = vsel %vm1771_vm14, %v2074_v6, %v2069_v60  ;;  %vm2955_vm14 = vcmask 793600  }
0x1384   : > { %2077 = vrot.lane.b32.xlu2 %v2075_v0, %s4465_s29  ;;  %v3545_v0 = vor.u32 %v3661_v4, %v3544_v13 }
0x138c   : > { %2192 = vrot.lane.b32.xlu2 %v2190_v53, %s4469_s28 }
0x1394   : > { %2174 = vrot.lane.b32.xlu2 %v2172_v54, %s4446_s1 }
0x139c   : > { %2154 = vrot.lane.b32.xlu2 %v2152_v18, %s4470_s27 }
0x13de   : > { %v2078_v15 = vpop.permute.xlu2 %2077 }
0x13df   : > { %v2080_v30 = vmax.f32 %v2069_v60, %v2078_v15 }
0x13e1   : > { %v2081_v48 = vpack.c.bf16 %v2080_v30, %v2080_v30 }
0x13e3   : > { %3541 = vmatmul.msk.bf16.vlgmr.msrb.gmra.mxu1 %vm2122_vm6, %v2081_v48 }
0x13e6   : > { %v5280_v25 = vpop.permute.xlu2 %2192 }
0x13ee   : > { %v5282_v5 = vpop.permute.xlu2 %2174 }
0x13f6   : > { %v5302_v41 = vpop.permute.xlu2 %2154 }
0x1460   : > { %v2135_v55 = vpop.f32.mrf.mxu1 }
0x1461   : > { %2140 = vrot.lane.b32.xlu0 %v2135_v55, %s4467_s16  ;;  %v2171_v35 = vmul.f32 %v5292_v24, %v2135_v55 }
0x1468   : > { %v2137_v57 = vpop.f32.mrf.mxu1 }
0x1469   : > { %2180 = vrot.lane.b32.xlu0 %v2178_v17, %s4446_s1 }
0x1471   : > { %2160 = vrot.lane.b32.xlu0 %v2158_v61, %s4468_s25 }
0x14d3   : > { %v2141_v20 = vpop.permute.xlu0 %2140 }
0x14d4   : > { %v2142_v23 = vsel %vm2139_vm9, %v2141_v20, %v2135_v55 }
0x14d5   : > { %2143 = vrot.lane.b32.xlu1 %v2142_v23, %s4467_s16 }
0x14db   : > { %v5285_v27 = vpop.permute.xlu0 %2180 }
0x14dd   : > { %2186 = vrot.lane.b32.xlu1 %v2184_v26, %s4471_s2 }
0x14e3   : > { %v5300_v39 = vpop.permute.xlu0 %2160 }
0x14e5   : > { %2166 = vrot.lane.b32.xlu1 %v2164_v21, %s4468_s25 }
0x1547   : > { %v2144_v14 = vpop.permute.xlu1 %2143 }
0x1548   : > { %v2145_v31 = vsel %vm2139_vm9, %v2144_v14, %v2135_v55 }
0x1549   : > { %v2195_v9 = vmul.f32 %v5280_v25, %v2145_v31  ;;  %v2177_v63 = vmul.f32 %v5282_v5, %v2145_v31  ;;  %v2183_v16 = vmul.f32 %v5285_v27, %v2145_v31  ;;  %v2163_v38 = vmul.f32 %v5300_v39, %v2145_v31 }
0x154a   : > { %v2157_v42 = vmul.f32 %v5302_v41, %v2145_v31 }
0x154b   : > { %2225 = vrot.lane.b32.xlu0 %v2195_v9, %s4436_s21  ;;  %v4029_v28 = vpack.i.bf16 %v2177_v63, %v2183_v16 }
0x154d   : > { %4030 = vrot.lane.b32.xlu1 %v4029_v28, %s4447_s13 }
0x154f   : > { %v5294_v33 = vpop.permute.xlu1 %2186 }
0x1550   : > { %v2189_v34 = vmul.f32 %v5294_v33, %v2145_v31 }
0x1552   : > { %2221 = vrot.lane.b32.xlu2 %v2189_v34, %s4445_s18 }
0x1553   : > { %2209 = vrot.lane.b32.xlu0 %v2171_v35, %s4472_s11 }
0x1557   : > { %v5304_v7 = vpop.permute.xlu1 %2166 }
0x1558   : > { %v2169_v12 = vmul.f32 %v5304_v7, %v2145_v31 }
0x155a   : > { %2148 = vrot.lane.b32.xlu2 %v2146_v8, %s4472_s11  ;;  %v4034_v32 = vpack.i.bf16 %v2169_v12, %v2163_v38 }
0x155b   : > { %2197 = vrot.lane.b32.xlu0 %v2157_v42, %s4433_s24 }
0x155c   : > { %4035 = vrot.lane.b32.xlu1 %v4034_v32, %s4435_s12 }
0x15ac   : > { %v2222_v44 = vpop.permute.xlu2 %2221 }
0x15b4   : > { %v2149_v46 = vpop.permute.xlu2 %2148 }
0x15b5   : > { %v2151_v47 = vmul.f32 %v2149_v46, %v2145_v31 }
0x15bd   : > { %v2226_v1 = vpop.permute.xlu0 %2225 }
0x15be   : > { %v2234_v40 = vpack.c.bf16 1.0, %v2226_v1 }
0x15bf   : > { %v4031_v36 = vpop.permute.xlu1 %4030 }
0x15c0   : > { %2253 = vrot.lane.b32.xlu1 %v2234_v40, %s4473_s5  ;;  %v4032_v45 = vunpack.i.l.bf16 %v4031_v36  ;;  %v4033_v19 = vunpack.i.h.bf16 %v4031_v36 }
0x15c2   : > { %v2233_v59 = vpack.c.bf16 %v2222_v44, %v4032_v45 }
0x15c4   : > { %2251 = vrot.lane.b32.xlu2 %v2233_v59, %s4473_s5 }
0x15c5   : > { %v2210_v29 = vpop.permute.xlu0 %2209 }
0x15c6   : > { %v2232_v37 = vpack.c.bf16 %v4033_v19, %v2210_v29 }
0x15c8   : > { %2249 = vrot.lane.b32.xlu0 %v2232_v37, %s4473_s5 }
0x15cd   : > { %v2198_v49 = vpop.permute.xlu0 %2197 }
0x15ce   : > { %v2230_v50 = vpack.c.bf16 %v2198_v49, %v2151_v47  ;;  %v4036_v51 = vpop.permute.xlu1 %4035 }
0x15cf   : > { %v4038_v52 = vunpack.i.h.bf16 %v4036_v51  ;;  %v4037_v56 = vunpack.i.l.bf16 %v4036_v51 }
0x15d0   : > { %2245 = vrot.lane.b32.xlu2 %v2230_v50, %s4473_s5 }
0x15d1   : > { %v2231_v58 = vpack.c.bf16 %v4038_v52, %v4037_v56 }
0x15d3   : > { %2247 = vrot.lane.b32.xlu1 %v2231_v58, %s4473_s5 }
0x161e   : > { %v2252_v2 = vpop.permute.xlu2 %2251 }
0x162a   : > { %v2246_v6 = vpop.permute.xlu2 %2245 }
0x1632   : > { %v2254_v60 = vpop.permute.xlu1 %2253 }
0x1633   : > { %v2263_v62 = vand.u32 %v2254_v60, %v5218_v43 }
0x1635   : > { %2268 = vmatpush.bf16.msra.mxu2 %v2263_v62 }
0x1639   : > { %2269 = vmatpush.bf16.msra.mxu2 %v2252_v2 }
0x163a   : > { %v2250_v10 = vpop.permute.xlu0 %2249 }
0x163d   : > { %2270 = vmatpush.bf16.msra.mxu2 %v2250_v10 }
0x1645   : > { %v2248_v3 = vpop.permute.xlu1 %2247 }
0x1646   : > { %2271 = vmatpush.bf16.msra.mxu2 %v2248_v3 }
0x164a   : > { %2272 = vmatpush.bf16.msra.mxu2 %v2246_v6 }
0x164d   : > { %3546 = vmatmul.msk.bf16.vlgmr.msra.gmra.mxu2 %vm1377_vm13, %v3545_v0  ;;  %vm2435_vm13 = vcmask 138240  }
0x16d0   : > { %v2274_v11 = vpop.f32.mrf.mxu2 }
0x16d1   : > { %v2279_v15 = vmax.f32 %v2274_v11, 0.0 }
0x16d3   : > { %2281 = vrot.lane.b32.xlu0 %v2279_v15, %s4467_s16 }
0x16d8   : > { %v2276_v30 = vpop.f32.mrf.mxu2 }
0x16d9   : > { %v2280_v43 = vmax.f32 %v2276_v30, 0.0 }
0x16db   : > { %2284 = vrot.lane.b32.xlu1 %v2280_v43, %s4467_s16 }
0x1745   : > { %v2282_v48 = vpop.permute.xlu0 %2281 }
0x1746   : > { %v2283_v55 = vsel %vm2139_vm9, %v2282_v48, %v2279_v15 }
0x1747   : > { %2287 = vrot.lane.b32.xlu2 %v2283_v55, %s4467_s16  ;;  %v4474_v55 = vmov 1.0|1.0  }
0x174d   : > { %v2285_v17 = vpop.permute.xlu1 %2284 }
0x174e   : > { %v2286_v57 = vsel %vm2139_vm9, %v2285_v17, %v2280_v43 }
0x174f   : > { %2289 = vrot.lane.b32.xlu0 %v2286_v57, %s4467_s16 }
0x17a1   : > { %v2288_v61 = vpop.permute.xlu2 %2287 }
0x17a2   : > { %v2291_v53 = vsel %vm2139_vm9, %v2288_v61, %v2279_v15 }
0x17a3   : > { %v2307_v20 = vmul.f32 %v2291_v53, %v5294_v33  ;;  %v2305_v23 = vmul.f32 %v2291_v53, %v5285_v27  ;;  %v2303_v14 = vmul.f32 %v2291_v53, %v5282_v5  ;;  %v2293_v9 = vmul.f32 %v2291_v53, %v2149_v46 }
0x17a4   : > { %v2299_v38 = vmul.f32 %v2291_v53, %v5304_v7  ;;  %v2297_v12 = vmul.f32 %v2291_v53, %v5300_v39  ;;  %v2309_v36 = vmul.f32 %v2291_v53, %v5280_v25 }
0x17c1   : > { %v2290_v54 = vpop.permute.xlu0 %2289 }
0x17c2   : > { %v2292_v18 = vsel %vm2139_vm9, %v2290_v54, %v2280_v43 }
0x17c3   : > { %v2308_v26 = vmul.f32 %v2292_v18, %v5294_v33  ;;  %v2306_v21 = vmul.f32 %v2292_v18, %v5285_v27  ;;  %v2304_v31 = vmul.f32 %v2292_v18, %v5282_v5  ;;  %v2294_v63 = vmul.f32 %v2292_v18, %v2149_v46 }
0x17c4   : > { %v2302_v33 = vmul.f32 %v2280_v43, %v5292_v24  ;;  %v2300_v27 = vmul.f32 %v2292_v18, %v5304_v7  ;;  %v2298_v8 = vmul.f32 %v2292_v18, %v5300_v39  ;;  %v2301_v5 = vmul.f32 %v2279_v15, %v5292_v24 }
0x17c5   : > { %v4039_v16 = vpack.i.bf16 %v2308_v26, %v2307_v20  ;;  %v4044_v28 = vpack.i.bf16 %v2306_v21, %v2305_v23  ;;  %v4049_v34 = vpack.i.bf16 %v2304_v31, %v2303_v14  ;;  %v2377_v35 = vpack.c.bf16 %v2294_v63, %v2293_v9 }
0x17c6   : > { %v4059_v42 = vpack.i.bf16 %v2300_v27, %v2299_v38  ;;  %v4054_v32 = vpack.i.bf16 %v2302_v33, %v2301_v5  ;;  %v4064_v1 = vpack.i.bf16 %v2298_v8, %v2297_v12  ;;  %v2310_v40 = vmul.f32 %v2292_v18, %v5280_v25  ;;  %v3549_v33 = vld [vmem:[#allocation2 + $0x18] sm:$0xf]  ;;  %v3663_v27 = vld [vmem:[#allocation2 + $0x4c] sm:$0xf0] }
0x17c7   : > { %4040 = vrot.lane.b32.xlu1 %v4039_v16, %s4445_s18  ;;  %4045 = vrot.lane.b32.xlu2 %v4044_v28, %s4447_s13  ;;  %v2296_v44 = vmul.f32 %v2292_v18, %v5302_v41  ;;  %v2295_v24 = vmul.f32 %v2291_v53, %v5302_v41  ;;  %v4475_v18 = vmov 0   ;;  %v3662_v16 = vld [vmem:[#allocation2 + $0x1c] sm:$0xf]  ;;  %v3551_v28 = vld [vmem:[#allocation2 + $0x50] sm:$0xf0]  ;;  %v3550_v5 = vor.u32 %v3663_v27, %v3549_v33 }
0x17c8   : > { %4050 = vrot.lane.b32.xlu0 %v4049_v34, %s4447_s13  ;;  %v4074_v7 = vpack.i.bf16 %v2310_v40, %v2309_v36  ;;  %4189 = vset.pattern.permute.xlu1 %v4475_v18  ;;  %v5363_v20 = vsel %vm1400_vm10, 65535, %v4475_v18 }
0x17c9   : > { %v4069_v45 = vpack.i.bf16 %v2296_v44, %v2295_v24  ;;  %4190 = vset.pattern.permute.xlu2 %v4475_v18  ;;  %4191 = vset.pattern.permute.xlu0 %v4475_v18 }
0x17cf   : > { %4060 = vrot.lane.b32.xlu2 %v4059_v42, %s4435_s12  ;;  %4055 = vrot.lane.b32.xlu1 %v4054_v32, %s4472_s11  ;;  %s4366_s11 = scalar_lea.hbm %s5563_s10, 2 }
0x17d0   : > { %4065 = vrot.lane.b32.xlu0 %v4064_v1, %s4435_s12 }
0x17d7   : > { %4075 = vrot.lane.b32.xlu2 %v4074_v7, %s4436_s21  ;;  %4070 = vrot.lane.b32.xlu1 %v4069_v45, %s4433_s24 }
0x1821   : > { %v4046_v39 = vpop.permute.xlu2 %4045 }
0x1822   : > { %v4048_v59 = vunpack.i.h.bf16 %v4046_v39  ;;  %v4047_v19 = vunpack.i.l.bf16 %v4046_v39 }
0x1824   : > { %v2383_v29 = vpack.c.bf16 %v4048_v59, %v4047_v19 }
0x1826   : > { %2418 = vrot.lane.b32.xlu1 %v2383_v29, %s4473_s5 }
0x1829   : > { %v4061_v37 = vpop.permute.xlu2 %4060 }
0x182a   : > { %v4063_v46 = vunpack.i.h.bf16 %v4061_v37  ;;  %v4062_v47 = vunpack.i.l.bf16 %v4061_v37 }
0x182c   : > { %v2380_v49 = vpack.c.bf16 %v4063_v46, %v4062_v47 }
0x182e   : > { %2412 = vrot.lane.b32.xlu1 %v2380_v49, %s4473_s5 }
0x1831   : > { %v4076_v48 = vpop.permute.xlu2 %4075 }
0x1832   : > { %v4078_v17 = vunpack.i.h.bf16 %v4076_v48  ;;  %v4077_v57 = vunpack.i.l.bf16 %v4076_v48  ;;  %v3664_v48 = vld [vmem:[%s5560_s7] sm:$0xff] }
0x1833   : > { %2538 = vmatpush.bf16.msra.mxu1 %v3664_v48 }
0x1834   : > { %v2385_v61 = vpack.c.bf16 %v4078_v17, %v4077_v57 }
0x1836   : > { %2406 = vrot.lane.b32.xlu1 %v2377_v35, %s4473_s5  ;;  %v3554_v35 = vor.u32 %v3662_v16, %v3551_v28 }
0x1839   : > { %v4041_v25 = vpop.permute.xlu1 %4040 }
0x183a   : > { %v4043_v41 = vunpack.i.h.bf16 %v4041_v25  ;;  %v4042_v50 = vunpack.i.l.bf16 %v4041_v25  ;;  %v4051_v51 = vpop.permute.xlu0 %4050 }
0x183b   : > { %v4053_v52 = vunpack.i.h.bf16 %v4051_v51  ;;  %v4052_v56 = vunpack.i.l.bf16 %v4051_v51 }
0x183c   : > { %v2384_v58 = vpack.c.bf16 %v4043_v41, %v4042_v50 }
0x183d   : > { %v2382_v60 = vpack.c.bf16 %v4053_v52, %v4052_v56 }
0x183e   : > { %2420 = vrot.lane.b32.xlu0 %v2384_v58, %s4473_s5 }
0x183f   : > { %2416 = vrot.lane.b32.xlu2 %v2382_v60, %s4473_s5 }
0x1841   : > { %v4056_v62 = vpop.permute.xlu1 %4055 }
0x1842   : > { %v4066_v2 = vpop.permute.xlu0 %4065  ;;  %v4058_v10 = vunpack.i.h.bf16 %v4056_v62  ;;  %v4057_v3 = vunpack.i.l.bf16 %v4056_v62 }
0x1843   : > { %v4068_v13 = vunpack.i.h.bf16 %v4066_v2  ;;  %v4067_v4 = vunpack.i.l.bf16 %v4066_v2 }
0x1844   : > { %v2381_v6 = vpack.c.bf16 %v4058_v10, %v4057_v3 }
0x1845   : > { %v2379_v0 = vpack.c.bf16 %v4068_v13, %v4067_v4 }
0x1846   : > { %2414 = vrot.lane.b32.xlu0 %v2381_v6, %s4473_s5 }
0x1847   : > { %2410 = vrot.lane.b32.xlu2 %v2379_v0, %s4473_s5 }
0x1849   : > { %v4071_v11 = vpop.permute.xlu1 %4070 }
0x184a   : > { %v4073_v15 = vunpack.i.h.bf16 %v4071_v11  ;;  %v4072_v30 = vunpack.i.l.bf16 %v4071_v11 }
0x184c   : > { %v2378_v43 = vpack.c.bf16 %v4073_v15, %v4072_v30 }
0x184e   : > { %2408 = vrot.lane.b32.xlu0 %v2378_v43, %s4473_s5 }
0x184f   : > { %2424 = vrot.lane.b32.xlu2 %v4474_v55, %s4473_s5 }
0x1856   : > { %2422 = vrot.lane.b32.xlu0 %v2385_v61, %s4473_s5 }
0x1898   : > { %v2419_v14 = vpop.permute.xlu1 %2418 }
0x1899   : > { %v2417_v53 = vpop.permute.xlu2 %2416 }
0x18a0   : > { %v2413_v9 = vpop.permute.xlu1 %2412 }
0x18a1   : > { %v2411_v54 = vpop.permute.xlu2 %2410 }
0x18a8   : > { %v2407_v8 = vpop.permute.xlu1 %2406 }
0x18a9   : > { %v2425_v23 = vpop.permute.xlu2 %2424 }
0x18aa   : > { %v2442_v26 = vand.u32 %v5363_v20, %v2425_v23 }
0x18ac   : > { %2464 = vmatpush.bf16.msra.mxu0 %v2442_v26 }
0x18b0   : > { %v2421_v21 = vpop.permute.xlu0 %2420 }
0x18b1   : > { %2444 = vmatpush.bf16.msrb.mxu3 %v2421_v21  ;;  %v2568_v21 = vld [vmem:[#allocation5 + $0x2a] ss:$0 sm:$0xff] }
0x18b5   : > { %2445 = vmatpush.bf16.msrb.mxu3 %v2419_v14  ;;  %v2558_v14 = vld [vmem:[#allocation5 + $0x28] ss:$0 sm:$0xff] }
0x18b8   : > { %v2415_v31 = vpop.permute.xlu0 %2414 }
0x18b9   : > { %2446 = vmatpush.bf16.msrb.mxu3 %v2417_v53 }
0x18bd   : > { %2447 = vmatpush.bf16.msrb.mxu3 %v2415_v31 }
0x18c0   : > { %v2409_v63 = vpop.permute.xlu0 %2408 }
0x18c1   : > { %2448 = vmatpush.bf16.msrb.mxu3 %v2413_v9 }
0x18c5   : > { %2449 = vmatpush.bf16.msrb.mxu3 %v2411_v54 }
0x18c8   : > { %v2423_v34 = vpop.permute.xlu0 %2422 }
0x18c9   : > { %2450 = vmatpush.bf16.msrb.mxu3 %v2409_v63  ;;  %2465 = vmatpush.bf16.msra.mxu0 %v2423_v34  ;;  %v2565_v63 = vld [vmem:[#allocation5 + $0x29] ss:$0 sm:$0xff] }
0x18cc   : > { %3555 = vmatmul.msk.bf16.vlgmr.msra.gmra.mxu0 %vm2435_vm13, %v3554_v35 }
0x18cd   : > { %2451 = vmatpush.bf16.msrb.mxu3 %v2407_v8 }
0x18d0   : > { %2452 = vmatmul.bf16.vlgmr.msrb.gmra.mxu3 %v3550_v5 }
0x1949   : > { %v2467_v38 = vpop.f32.mrf.mxu0 }
0x1951   : > { %v2469_v1 = vpop.f32.mrf.mxu0 }
0x1953   : > { %v2453_v12 = vpop.f32.mrf.mxu3 }
0x1954   : > { %v2468_v42 = vadd.f32 %v2467_v38, %v2453_v12 }
0x1956   : > { %v2472_v44 = vmax.f32 %v2468_v42, 0.0 }
0x195b   : > { %v2455_v32 = vpop.f32.mrf.mxu3 }
0x195c   : > { %v2470_v40 = vadd.f32 %v2469_v1, %v2455_v32 }
0x195e   : > { %v2473_v36 = vmax.f32 %v2470_v40, 0.0 }
0x1960   : > { %v4079_v24 = vpack.i.bf16 %v2473_v36, %v2472_v44 }
0x1962   : > { %4080 = vrot.lane.b32.xlu1 %v4079_v24, %s4467_s16 }
0x19d4   : > { %v4081_v7 = vpop.permute.xlu1 %4080 }
0x19d5   : > { %v4083_v45 = vunpack.i.h.bf16 %v4081_v7  ;;  %v4082_v39 = vunpack.i.l.bf16 %v4081_v7 }
0x19d7   : > { %v2479_v59 = vsel %vm2139_vm9, %v4083_v45, %v2473_v36  ;;  %v2476_v19 = vsel %vm2139_vm9, %v4082_v39, %v2472_v44 }
0x19d8   : > { %v4084_v29 = vpack.i.bf16 %v2479_v59, %v2476_v19 }
0x19da   : > { %4085 = vrot.lane.b32.xlu2 %v4084_v29, %s4467_s16 }
0x1a34   : > { %v4086_v37 = vpop.permute.xlu2 %4085 }
0x1a35   : > { %v4088_v46 = vunpack.i.h.bf16 %v4086_v37  ;;  %v4087_v47 = vunpack.i.l.bf16 %v4086_v37 }
0x1a37   : > { %v2485_v49 = vsel %vm2139_vm9, %v4088_v46, %v2473_v36  ;;  %v2484_v25 = vsel %vm2139_vm9, %v4087_v47, %v2472_v44 }
0x1a38   : > { %v4089_v41 = vpack.i.bf16 %v2485_v49, %v2484_v25 }
0x1a3a   : > { %4090 = vrot.lane.b32.xlu0 %v4089_v41, %s4433_s24 }
0x1aac   : > { %v4091_v50 = vpop.permute.xlu0 %4090 }
0x1aad   : > { %v4093_v51 = vunpack.i.h.bf16 %v4091_v50  ;;  %v4092_v52 = vunpack.i.l.bf16 %v4091_v50  ;;  %v3563_v50 = vld [vmem:[#allocation2 + $0x20] sm:$0xf] }
0x1aaf   : > { %v2495_v56 = vmax.f32 %v2473_v36, %v4093_v51  ;;  %v2494_v58 = vmax.f32 %v2472_v44, %v4092_v52  ;;  %v3665_v51 = vld [vmem:[#allocation2 + $0x54] sm:$0xf0] }
0x1ab1   : > { %v4094_v60 = vpack.i.bf16 %v2495_v56, %v2494_v58 }
0x1ab3   : > { %4095 = vrot.lane.b32.xlu1 %v4094_v60, %s4467_s16 }
0x1b25   : > { %v4096_v62 = vpop.permute.xlu1 %4095 }
0x1b26   : > { %v4098_v2 = vunpack.i.h.bf16 %v4096_v62  ;;  %v4097_v10 = vunpack.i.l.bf16 %v4096_v62 }
0x1b28   : > { %v2501_v3 = vsel %vm2139_vm9, %v4098_v2, %v2495_v56  ;;  %v2498_v13 = vsel %vm2139_vm9, %v4097_v10, %v2494_v58 }
0x1b29   : > { %v4099_v4 = vpack.i.bf16 %v2501_v3, %v2498_v13 }
0x1b2b   : > { %4100 = vrot.lane.b32.xlu2 %v4099_v4, %s4467_s16  ;;  %s3196_s16 = sshll.u32 %s3192_s26, 4  ;;  %s3197_s16 = int_to_ptr.hbm [resolvable:$true] %s3196_s16 }
0x1b85   : > { %v4101_v6 = vpop.permute.xlu2 %4100 }
0x1b86   : > { %v4103_v0 = vunpack.i.h.bf16 %v4101_v6  ;;  %v4102_v11 = vunpack.i.l.bf16 %v4101_v6 }
0x1b88   : > { %v2507_v15 = vsel %vm2139_vm9, %v4103_v0, %v2495_v56  ;;  %v2506_v30 = vsel %vm2139_vm9, %v4102_v11, %v2494_v58 }
0x1b89   : > { %v4104_v43 = vpack.i.bf16 %v2507_v15, %v2506_v30 }
0x1b8b   : > { %4105 = vrot.lane.b32.xlu0 %v4104_v43, %s4435_s12  ;;  %s4476_s12 = smov 125  }
0x1bfd   : > { %v4106_v17 = vpop.permute.xlu0 %4105 }
0x1bfe   : > { %v4108_v57 = vunpack.i.h.bf16 %v4106_v17  ;;  %v4107_v61 = vunpack.i.l.bf16 %v4106_v17 }
0x1c00   : > { %v2517_v53 = vmax.f32 %v2495_v56, %v4108_v57  ;;  %v2516_v54 = vmax.f32 %v2494_v58, %v4107_v61  ;;  %v3564_v56 = vor.u32 %v3665_v51, %v3563_v50 }
0x1c02   : > { %v2518_v18 = vpack.c.bf16 %v2517_v53, %v2516_v54 }
0x1c04   : > { %3560 = vmatmul.msk.bf16.vlgmr.msra.gmra.mxu1 %vm2527_vm11, %v2518_v18  ;;  %vm3181_vm11 = vcmask 73728  }
0x1c81   : > { %v2540_v23 = vpop.f32.mrf.mxu1 }
0x1c82   : > { %2546 = vrot.lane.b32.xlu1 %v2540_v23, %s4456_s20  ;;  %v2566_v28 = vmul.f32 %v2565_v63, %v2540_v23 }
0x1c89   : > { %v2542_v26 = vpop.f32.mrf.mxu1 }
0x1c8a   : > { %2549 = vrot.lane.b32.xlu2 %v2542_v26, %s4456_s20  ;;  %v2567_v16 = vmul.f32 %v2565_v63, %v2542_v26 }
0x1c8c   : > { %v4114_v34 = vpack.i.bf16 %v2567_v16, %v2566_v28 }
0x1c92   : > { %2570 = vrot.lane.b32.xlu2 %v2568_v21, %s4446_s1 }
0x1c9a   : > { %2560 = vrot.lane.b32.xlu2 %v2558_v14, %s4469_s28 }
0x1ce4   : > { %v2550_v31 = vpop.permute.xlu2 %2549 }
0x1ce5   : > { %v2551_v9 = vsel %vm2545_vm7, %v2550_v31, %v2542_v26 }
0x1ce6   : > { %2554 = vrot.lane.b32.xlu1 %v2551_v9, %s4456_s20 }
0x1cec   : > { %v2571_v1 = vpop.permute.xlu2 %2570 }
0x1cee   : > { %4115 = vrot.lane.b32.xlu1 %v4114_v34, %s4469_s28 }
0x1cf4   : > { %v2547_v35 = vpop.permute.xlu1 %2546  ;;  %v2561_v7 = vpop.permute.xlu2 %2560 }
0x1cf5   : > { %v2548_v33 = vsel %vm2545_vm7, %v2547_v35, %v2540_v23  ;;  %v3568_v35 = vld [vmem:[#allocation2 + $0x24] sm:$0xf] }
0x1cf6   : > { %2552 = vrot.lane.b32.xlu0 %v2548_v33, %s4456_s20  ;;  %v3666_v33 = vld [vmem:[#allocation2 + $0x58] sm:$0xf0] }
0x1d58   : > { %v2555_v27 = vpop.permute.xlu1 %2554 }
0x1d59   : > { %v2557_v42 = vsel %vm2545_vm7, %v2555_v27, %v2542_v26 }
0x1d5a   : > { %v2574_v44 = vmul.f32 %v2571_v1, %v2557_v42  ;;  %v2564_v39 = vmul.f32 %v2561_v7, %v2557_v42 }
0x1d60   : > { %v4116_v8 = vpop.permute.xlu1 %4115 }
0x1d61   : > { %v4118_v5 = vunpack.i.h.bf16 %v4116_v8  ;;  %v4117_v38 = vunpack.i.l.bf16 %v4116_v8  ;;  %v3569_v8 = vor.u32 %v3666_v33, %v3568_v35  ;;  %v3667_v35 = vld [vmem:[#allocation2 + $0x5c] sm:$0xf0] }
0x1d63   : > { %v2594_v12 = vpack.c.bf16 %v4118_v5, %v4117_v38 }
0x1d65   : > { %2606 = vrot.lane.b32.xlu2 %v2594_v12, %s4476_s12 }
0x1d68   : > { %v2553_v32 = vpop.permute.xlu0 %2552 }
0x1d69   : > { %v2556_v40 = vsel %vm2545_vm7, %v2553_v32, %v2540_v23 }
0x1d6a   : > { %v2573_v36 = vmul.f32 %v2571_v1, %v2556_v40  ;;  %v2563_v45 = vmul.f32 %v2561_v7, %v2556_v40 }
0x1d6c   : > { %v4109_v24 = vpack.i.bf16 %v2574_v44, %v2573_v36  ;;  %v2593_v59 = vpack.c.bf16 %v2564_v39, %v2563_v45 }
0x1d6e   : > { %4110 = vrot.lane.b32.xlu0 %v4109_v24, %s4471_s2 }
0x1d76   : > { %2610 = vrot.lane.b32.xlu0 %v4474_v55, %s4476_s12 }
0x1d7e   : > { %2604 = vrot.lane.b32.xlu0 %v2593_v59, %s4476_s12 }
0x1dbf   : > { %v2607_v41 = vpop.permute.xlu2 %2606 }
0x1de0   : > { %v4111_v19 = vpop.permute.xlu0 %4110 }
0x1de1   : > { %v4113_v29 = vunpack.i.h.bf16 %v4111_v19  ;;  %v4112_v37 = vunpack.i.l.bf16 %v4111_v19 }
0x1de3   : > { %v2595_v46 = vpack.c.bf16 %v4113_v29, %v4112_v37 }
0x1de5   : > { %2608 = vrot.lane.b32.xlu1 %v2595_v46, %s4476_s12  ;;  %v2736_v46 = vld [vmem:[%s5561_s8] sm:$0x3] }
0x1de8   : > { %v2611_v47 = vpop.permute.xlu0 %2610 }
0x1de9   : > { %v2620_v49 = vand.u32 %v2611_v47, %v5363_v20  ;;  %v2742_v47 = vsel %vm553_vm5, %v2736_v46, 0 }
0x1dea   : > { %2751 = vmatpush.bf16.msrb.mxu1 %v2742_v47 }
0x1deb   : > { %2626 = vmatpush.bf16.msrb.mxu2 %v2620_v49  ;;  %2701 = vmatpush.bf16.msrb.mxu0 %v2620_v49 }
0x1df0   : > { %v2605_v52 = vpop.permute.xlu0 %2604 }
0x1e57   : > { %v2609_v25 = vpop.permute.xlu1 %2608 }
0x1e58   : > { %2627 = vmatpush.bf16.msrb.mxu2 %v2609_v25 }
0x1e5c   : > { %2628 = vmatpush.bf16.msrb.mxu2 %v2607_v41 }
0x1e60   : > { %2629 = vmatpush.bf16.msrb.mxu2 %v2605_v52 }
0x1e63   : > { %3565 = vmatmul.msk.bf16.vlgmr.msrb.gmra.mxu2 %vm2615_vm12, %v3564_v56 }
0x1ee6   : > { %v2631_v58 = vpop.f32.mrf.mxu2 }
0x1ee7   : > { %v2636_v60 = vmax.f32 %v2631_v58, 0.0 }
0x1ee9   : > { %2638 = vrot.lane.b32.xlu1 %v2636_v60, %s4456_s20  ;;  %v2652_v0 = vmul.f32 %v2636_v60, %v2565_v63 }
0x1eee   : > { %v2633_v62 = vpop.f32.mrf.mxu2 }
0x1eef   : > { %v2637_v2 = vmax.f32 %v2633_v62, 0.0 }
0x1ef1   : > { %2641 = vrot.lane.b32.xlu2 %v2637_v2, %s4456_s20  ;;  %v2653_v6 = vmul.f32 %v2637_v2, %v2565_v63 }
0x1ef3   : > { %v4124_v11 = vpack.i.bf16 %v2653_v6, %v2652_v0 }
0x1f4b   : > { %v2642_v10 = vpop.permute.xlu2 %2641 }
0x1f4c   : > { %v2643_v3 = vsel %vm2545_vm7, %v2642_v10, %v2637_v2  ;;  %v2771_v10 = vld [vmem:[#allocation5 + $0x30] ss:$0 sm:$0xff] }
0x1f4d   : > { %2646 = vrot.lane.b32.xlu1 %v2643_v3, %s4456_s20 }
0x1f5b   : > { %v2639_v13 = vpop.permute.xlu1 %2638 }
0x1f5c   : > { %v2640_v4 = vsel %vm2545_vm7, %v2639_v13, %v2636_v60 }
0x1f5d   : > { %2644 = vrot.lane.b32.xlu0 %v2640_v4, %s4456_s20  ;;  %v5437_v4 = vld [vmem:[#allocation5 + $0x31] ss:$0 sm:$0xff] }
0x1f65   : > { %4125 = vrot.lane.b32.xlu0 %v4124_v11, %s4469_s28  ;;  %s4360_s28 = sshra.s32 %s3197_s16, 4  ;;  %s4361_s28 = int_to_ptr.hbm [resolvable:$true] %s4360_s28 }
0x1f66   : > { %s4362_s17 = scalar_lea.hbm %s4361_s28, 1  ;;  %p4367_p3 = scmp.lt.s32.totalorder %s4361_s28, %s5563_s10 }
0x1f67   : > { %p4363_p0 = scmp.ne.s32.totalorder %s4361_s28, %s4362_s17  ;;  %p4368_p4 = scmp.lt.s32.totalorder %s4366_s11, %s4362_s17 }
0x1f69   : > { %p4364_p1 = pnand %p4363_p0, %p4571_p5  ;;  %p4369_p7 = por %p4368_p4, %p4367_p3 }
0x1f6b   : > { %p4365_p2 = pneg %p4364_p1 }
0x1f6d   : > { %p4370_p8 = pnand %p4369_p7, %p4365_p2 }
0x1fbf   : > { %v2647_v15 = vpop.permute.xlu1 %2646 }
0x1fc0   : > { %v2649_v30 = vsel %vm2545_vm7, %v2647_v15, %v2637_v2 }
0x1fc1   : > { %v2651_v17 = vmul.f32 %v2649_v30, %v2561_v7  ;;  %v2655_v57 = vmul.f32 %v2649_v30, %v2571_v1 }
0x1fcf   : > { %v2645_v43 = vpop.permute.xlu0 %2644 }
0x1fd0   : > { %v2648_v48 = vsel %vm2545_vm7, %v2645_v43, %v2636_v60  ;;  %v2781_v60 = vld [vmem:[#allocation5 + $0x32] ss:$0 sm:$0xff] }
0x1fd1   : > { %v2650_v61 = vmul.f32 %v2648_v48, %v2561_v7  ;;  %v2654_v53 = vmul.f32 %v2648_v48, %v2571_v1 }
0x1fd3   : > { %v4119_v54 = vpack.i.bf16 %v2655_v57, %v2654_v53  ;;  %v2674_v18 = vpack.c.bf16 %v2651_v17, %v2650_v61 }
0x1fd5   : > { %4120 = vrot.lane.b32.xlu2 %v4119_v54, %s4471_s2  ;;  %2685 = vrot.lane.b32.xlu0 %v2674_v18, %s4476_s12 }
0x1fd7   : > { %v4126_v23 = vpop.permute.xlu0 %4125 }
0x1fd8   : > { %v4128_v26 = vunpack.i.h.bf16 %v4126_v23  ;;  %v4127_v21 = vunpack.i.l.bf16 %v4126_v23 }
0x1fda   : > { %v2675_v14 = vpack.c.bf16 %v4128_v26, %v4127_v21 }
0x1fdd   : > { %2687 = vrot.lane.b32.xlu2 %v2675_v14, %s4476_s12 }
0x202f   : > { %v4121_v31 = vpop.permute.xlu2 %4120 }
0x2030   : > { %v4123_v9 = vunpack.i.h.bf16 %v4121_v31  ;;  %v4122_v63 = vunpack.i.l.bf16 %v4121_v31 }
0x2032   : > { %v2676_v16 = vpack.c.bf16 %v4123_v9, %v4122_v63 }
0x2034   : > { %2689 = vrot.lane.b32.xlu1 %v2676_v16, %s4476_s12 }
0x2037   : > { %v2688_v34 = vpop.permute.xlu2 %2687 }
0x2047   : > { %v2686_v27 = vpop.permute.xlu0 %2685 }
0x20a6   : > { %v2690_v28 = vpop.permute.xlu1 %2689 }
0x20a7   : > { %2702 = vmatpush.bf16.msrb.mxu0 %v2690_v28 }
0x20ab   : > { %2703 = vmatpush.bf16.msrb.mxu0 %v2688_v34  ;;  %v3574_v34 = vld [vmem:[#allocation2 + $0x28] sm:$0xf] }
0x20af   : > { %2704 = vmatpush.bf16.msrb.mxu0 %v2686_v27  ;;  %v3575_v27 = vor.u32 %v3667_v35, %v3574_v34  ;;  %v3584_v35 = vld [vmem:[#allocation2 + $0x2c] sm:$0xf] }
0x20b2   : > { %3570 = vmatmul.msk.bf16.vlgmr.msrb.gmra.mxu0 %vm2615_vm12, %v3569_v8  ;;  %v3578_v8 = vld [vmem:[#allocation2 + $0x98] sm:$0xf] }
0x212f   : > { %v2706_v5 = vpop.f32.mrf.mxu0 }
0x2130   : > { %v2711_v12 = vmax.f32 %v2706_v5, 0.0  ;;  %v3668_v5 = vld [vmem:[#allocation2 + $0xcc] sm:$0xf0] }
0x2137   : > { %v2708_v38 = vpop.f32.mrf.mxu0 }
0x2138   : > { %v2712_v42 = vmax.f32 %v2708_v38, 0.0  ;;  %v3579_v38 = vor.u32 %v3668_v5, %v3578_v8  ;;  %v3670_v5 = vld [vmem:[#allocation2 + $0xd0] sm:$0xf0] }
0x213a   : > { %v4129_v32 = vpack.i.bf16 %v2712_v42, %v2711_v12 }
0x213c   : > { %4130 = vrot.lane.b32.xlu1 %v4129_v32, %s4456_s20 }
0x21ae   : > { %v4131_v1 = vpop.permute.xlu1 %4130 }
0x21af   : > { %v4133_v40 = vunpack.i.h.bf16 %v4131_v1  ;;  %v4132_v44 = vunpack.i.l.bf16 %v4131_v1 }
0x21b1   : > { %v2718_v36 = vsel %vm2545_vm7, %v4133_v40, %v2712_v42  ;;  %v2715_v24 = vsel %vm2545_vm7, %v4132_v44, %v2711_v12 }
0x21b2   : > { %v4134_v7 = vpack.i.bf16 %v2718_v36, %v2715_v24 }
0x21b4   : > { %4135 = vrot.lane.b32.xlu2 %v4134_v7, %s4456_s20 }
0x220e   : > { %v4136_v45 = vpop.permute.xlu2 %4135 }
0x220f   : > { %v4138_v39 = vunpack.i.h.bf16 %v4136_v45  ;;  %v4137_v59 = vunpack.i.l.bf16 %v4136_v45 }
0x2211   : > { %v2724_v19 = vsel %vm2545_vm7, %v4138_v39, %v2712_v42  ;;  %v2723_v29 = vsel %vm2545_vm7, %v4137_v59, %v2711_v12 }
0x2212   : > { %v4139_v37 = vpack.i.bf16 %v2724_v19, %v2723_v29 }
0x2214   : > { %4140 = vrot.lane.b32.xlu0 %v4139_v37, %s4433_s24 }
0x2286   : > { %v4141_v49 = vpop.permute.xlu0 %4140 }
0x2287   : > { %v4143_v25 = vunpack.i.h.bf16 %v4141_v49  ;;  %v4142_v41 = vunpack.i.l.bf16 %v4141_v49 }
0x2289   : > { %v2734_v50 = vmax.f32 %v2712_v42, %v4143_v25  ;;  %v2733_v51 = vmax.f32 %v2711_v12, %v4142_v41 }
0x228b   : > { %v2735_v52 = vpack.c.bf16 %v2734_v50, %v2733_v51 }
0x228d   : > { %3571 = vmatmul.msk.bf16.vlgmr.msrb.gmra.mxu1 %vm2737_vm2, %v2735_v52 }
0x230a   : > { %v2753_v56 = vpop.f32.mrf.mxu1 }
0x230b   : > { %2759 = vrot.lane.b32.xlu1 %v2753_v56, %s4471_s2  ;;  %v2779_v0 = vmul.f32 %v5437_v4, %v2753_v56 }
0x2312   : > { %v2755_v58 = vpop.f32.mrf.mxu1 }
0x2313   : > { %2762 = vrot.lane.b32.xlu2 %v2755_v58, %s4471_s2  ;;  %v2780_v6 = vmul.f32 %v5437_v4, %v2755_v58 }
0x2315   : > { %v4144_v11 = vpack.i.bf16 %v2780_v6, %v2779_v0 }
0x231b   : > { %2783 = vrot.lane.b32.xlu2 %v2781_v60, %s4446_s1 }
0x2323   : > { %2822 = vrot.lane.b32.xlu2 %v4474_v55, %s4433_s24 }
0x236d   : > { %v2763_v62 = vpop.permute.xlu2 %2762 }
0x236e   : > { %v2764_v2 = vsel %vm2758_vm1, %v2763_v62, %v2755_v58 }
0x236f   : > { %2767 = vrot.lane.b32.xlu1 %v2764_v2, %s4471_s2 }
0x2375   : > { %v5442_v15 = vpop.permute.xlu2 %2783 }
0x2377   : > { %2773 = vrot.lane.b32.xlu1 %v2771_v10, %s4446_s1 }
0x237d   : > { %v2760_v3 = vpop.permute.xlu1 %2759  ;;  %v2823_v55 = vpop.permute.xlu2 %2822 }
0x237e   : > { %v2761_v13 = vsel %vm2758_vm1, %v2760_v3, %v2753_v56  ;;  %v2834_v30 = vand.u32 %v2823_v55, %v5363_v20 }
0x237f   : > { %2765 = vrot.lane.b32.xlu0 %v2761_v13, %s4471_s2 }
0x2380   : > { %2840 = vmatpush.bf16.msra.mxu2 %v2834_v30  ;;  %2963 = vmatpush.bf16.msra.mxu3 %v2834_v30 }
0x2387   : > { %4145 = vrot.lane.b32.xlu0 %v4144_v11, %s4446_s1 }
0x23e1   : > { %v2768_v43 = vpop.permute.xlu1 %2767 }
0x23e2   : > { %v2770_v48 = vsel %vm2758_vm1, %v2768_v43, %v2755_v58 }
0x23e3   : > { %v2787_v23 = vmul.f32 %v5442_v15, %v2770_v48 }
0x23e9   : > { %v5446_v17 = vpop.permute.xlu1 %2773 }
0x23ea   : > { %v2777_v54 = vmul.f32 %v5446_v17, %v2770_v48 }
0x23f1   : > { %v2766_v57 = vpop.permute.xlu0 %2765 }
0x23f2   : > { %v2769_v61 = vsel %vm2758_vm1, %v2766_v57, %v2753_v56 }
0x23f3   : > { %v2776_v53 = vmul.f32 %v5446_v17, %v2769_v61  ;;  %v2786_v18 = vmul.f32 %v5442_v15, %v2769_v61 }
0x23f5   : > { %v2800_v26 = vpack.c.bf16 %v2777_v54, %v2776_v53  ;;  %v2802_v21 = vpack.c.bf16 %v2787_v23, %v2786_v18 }
0x23f7   : > { %2816 = vrot.lane.b32.xlu2 %v2800_v26, %s4433_s24  ;;  %2820 = vrot.lane.b32.xlu0 %v2802_v21, %s4433_s24 }
0x23f9   : > { %v4146_v14 = vpop.permute.xlu0 %4145 }
0x23fa   : > { %v4148_v31 = vunpack.i.h.bf16 %v4146_v14  ;;  %v4147_v9 = vunpack.i.l.bf16 %v4146_v14 }
0x23fc   : > { %v2801_v63 = vpack.c.bf16 %v4148_v31, %v4147_v9 }
0x23fe   : > { %2818 = vrot.lane.b32.xlu1 %v2801_v63, %s4433_s24 }
0x2451   : > { %v2817_v33 = vpop.permute.xlu2 %2816 }
0x2469   : > { %v2821_v16 = vpop.permute.xlu0 %2820 }
0x246a   : > { %2841 = vmatpush.bf16.msra.mxu2 %v2821_v16 }
0x2470   : > { %v2819_v28 = vpop.permute.xlu1 %2818 }
0x2471   : > { %2842 = vmatpush.bf16.msra.mxu2 %v2819_v28 }
0x2475   : > { %2843 = vmatpush.bf16.msra.mxu2 %v2817_v33  ;;  %v3669_v33 = vld [vmem:[#allocation2 + $0x60] sm:$0xf0] }
0x2476   : > { %v3585_v8 = vor.u32 %v3669_v33, %v3584_v35  ;;  %v3671_v35 = vld [vmem:[#allocation2 + $0x64] sm:$0x10] }
0x2478   : > { %3580 = vmatmul.msk.bf16.vlgmr.msra.gmra.mxu2 %vm2615_vm12, %v3575_v27 }
0x2488   : > { %3581 = vmatmul.msk.bf16.gmra.mxu2 %vm2615_vm12, %v3579_v38 }
0x24fb   : > { %v2845_v12 = vpop.f32.mrf.mxu2 }
0x24fc   : > { %v2855_v42 = vmax.f32 %v2845_v12, 0.0 }
0x24fe   : > { %2859 = vrot.lane.b32.xlu2 %v2855_v42, %s4471_s2  ;;  %v2887_v59 = vmul.f32 %v2855_v42, %v5437_v4 }
0x2503   : > { %v2847_v32 = vpop.f32.mrf.mxu2 }
0x2504   : > { %v2856_v36 = vmax.f32 %v2847_v32, 0.0 }
0x2506   : > { %v2888_v39 = vmul.f32 %v2856_v36, %v5437_v4 }
0x2508   : > { %v4154_v19 = vpack.i.bf16 %v2888_v39, %v2887_v59 }
0x250b   : > { %v2850_v1 = vpop.f32.mrf.mxu2 }
0x250c   : > { %v2857_v40 = vmax.f32 %v2850_v1, 0.0 }
0x250e   : > { %2865 = vrot.lane.b32.xlu0 %v2857_v40, %s4471_s2  ;;  %v2889_v50 = vmul.f32 %v2857_v40, %v5437_v4 }
0x2513   : > { %v2852_v44 = vpop.f32.mrf.mxu2 }
0x2514   : > { %v2858_v24 = vmax.f32 %v2852_v44, 0.0 }
0x2516   : > { %2862 = vrot.lane.b32.xlu0 %v2856_v36, %s4471_s2  ;;  %2868 = vrot.lane.b32.xlu1 %v2858_v24, %s4471_s2  ;;  %v2890_v41 = vmul.f32 %v2858_v24, %v5437_v4 }
0x2518   : > { %v4149_v51 = vpack.i.bf16 %v2890_v41, %v2889_v50 }
0x2558   : > { %v2860_v7 = vpop.permute.xlu2 %2859 }
0x2559   : > { %v2861_v45 = vsel %vm2758_vm1, %v2860_v7, %v2855_v42 }
0x255a   : > { %2871 = vrot.lane.b32.xlu0 %v2861_v45, %s4471_s2 }
0x2562   : > { %4155 = vrot.lane.b32.xlu0 %v4154_v19, %s4446_s1 }
0x2580   : > { %v2866_v29 = vpop.permute.xlu0 %2865 }
0x2581   : > { %v2867_v37 = vsel %vm2758_vm1, %v2866_v29, %v2857_v40 }
0x2582   : > { %2875 = vrot.lane.b32.xlu1 %v2867_v37, %s4471_s2 }
0x2588   : > { %v2863_v46 = vpop.permute.xlu0 %2862  ;;  %v2869_v47 = vpop.permute.xlu1 %2868 }
0x2589   : > { %v2864_v49 = vsel %vm2758_vm1, %v2863_v46, %v2856_v36  ;;  %v2870_v25 = vsel %vm2758_vm1, %v2869_v47, %v2858_v24 }
0x258a   : > { %2873 = vrot.lane.b32.xlu1 %v2864_v49, %s4471_s2  ;;  %2877 = vrot.lane.b32.xlu2 %v2870_v25, %s4471_s2 }
0x2592   : > { %4150 = vrot.lane.b32.xlu2 %v4149_v51, %s4446_s1 }
0x25cc   : > { %v2872_v62 = vpop.permute.xlu0 %2871 }
0x25cd   : > { %v2879_v55 = vsel %vm2758_vm1, %v2872_v62, %v2855_v42 }
0x25ce   : > { %v2883_v61 = vmul.f32 %v2879_v55, %v5446_v17  ;;  %v2891_v53 = vmul.f32 %v2879_v55, %v5442_v15 }
0x25d4   : > { %v4156_v11 = vpop.permute.xlu0 %4155 }
0x25d5   : > { %v4158_v30 = vunpack.i.h.bf16 %v4156_v11  ;;  %v4157_v43 = vunpack.i.l.bf16 %v4156_v11  ;;  %v3031_v11 = vld [vmem:[%s5562_s9] sm:$0x1] }
0x25d6   : > { %v3040_v55 = vsel %vm1400_vm10, %v3031_v11, 0  ;;  %vm3070_vm10 = vcmask 269312  }
0x25d7   : > { %v2917_v23 = vpack.c.bf16 %v4158_v30, %v4157_v43  ;;  %3049 = vmatpush.bf16.msra.mxu0 %v3040_v55 }
0x25e4   : > { %v2878_v52 = vpop.permute.xlu2 %2877 }
0x25e5   : > { %v2882_v10 = vsel %vm2758_vm1, %v2878_v52, %v2858_v24 }
0x25e6   : > { %v2894_v6 = vmul.f32 %v2882_v10, %v5442_v15  ;;  %v2886_v31 = vmul.f32 %v2882_v10, %v5446_v17 }
0x25ec   : > { %v4151_v56 = vpop.permute.xlu2 %4150 }
0x25ed   : > { %v4153_v58 = vunpack.i.h.bf16 %v4151_v56  ;;  %v4152_v60 = vunpack.i.l.bf16 %v4151_v56 }
0x25ef   : > { %v2918_v2 = vpack.c.bf16 %v4153_v58, %v4152_v60 }
0x25f1   : > { %2943 = vrot.lane.b32.xlu0 %v2918_v2, %s4433_s24 }
0x25f4   : > { %v2876_v3 = vpop.permute.xlu1 %2875 }
0x25f5   : > { %v2881_v13 = vsel %vm2758_vm1, %v2876_v3, %v2857_v40 }
0x25f6   : > { %v2893_v4 = vmul.f32 %v2881_v13, %v5442_v15  ;;  %v2885_v14 = vmul.f32 %v2881_v13, %v5446_v17 }
0x25f8   : > { %v2920_v0 = vpack.c.bf16 %v2894_v6, %v2893_v4  ;;  %v2916_v9 = vpack.c.bf16 %v2886_v31, %v2885_v14  ;;  %v3075_v31 = vand.u32 1.0|1.0, %v5363_v20 }
0x25fa   : > { %2947 = vrot.lane.b32.xlu1 %v2920_v0, %s4433_s24  ;;  %3082 = vmatpush.bf16.msra.mxu1 %v3075_v31 }
0x25fc   : > { %v2874_v48 = vpop.permute.xlu1 %2873 }
0x25fd   : > { %v2880_v57 = vsel %vm2758_vm1, %v2874_v48, %v2856_v36 }
0x25fe   : > { %v2884_v54 = vmul.f32 %v2880_v57, %v5446_v17  ;;  %v2892_v18 = vmul.f32 %v2880_v57, %v5442_v15  ;;  %v3588_v17 = vld [vmem:[#allocation2 + $0x9c] sm:$0xf] }
0x25ff   : > { %v3589_v38 = vor.u32 %v3670_v5, %v3588_v17  ;;  %v3105_v17 = vsel %vm454_vm0, 4294967295, %v4437_v22  ;;  %v3124_v22 = vlaneseq }
0x2600   : > { %v2915_v26 = vpack.c.bf16 %v2884_v54, %v2883_v61  ;;  %v2919_v21 = vpack.c.bf16 %v2892_v18, %v2891_v53 }
0x2602   : > { %2941 = vrot.lane.b32.xlu1 %v2917_v23, %s4433_s24  ;;  %2945 = vrot.lane.b32.xlu2 %v2919_v21, %s4433_s24 }
0x2603   : > { %2937 = vrot.lane.b32.xlu0 %v2915_v26, %s4433_s24 }
0x260a   : > { %2939 = vrot.lane.b32.xlu2 %v2916_v9, %s4433_s24 }
0x265c   : > { %v2946_v16 = vpop.permute.xlu2 %2945 }
0x2663   : > { %v2944_v15 = vpop.permute.xlu0 %2943 }
0x2664   : > { %v2940_v34 = vpop.permute.xlu2 %2939 }
0x266c   : > { %v2948_v63 = vpop.permute.xlu1 %2947 }
0x266d   : > { %2964 = vmatpush.bf16.msra.mxu3 %v2948_v63 }
0x2671   : > { %2965 = vmatpush.bf16.msra.mxu3 %v2946_v16 }
0x2674   : > { %v2942_v28 = vpop.permute.xlu1 %2941 }
0x2675   : > { %2966 = vmatpush.bf16.msra.mxu3 %v2944_v15  ;;  %v2938_v27 = vpop.permute.xlu0 %2937 }
0x2679   : > { %2967 = vmatpush.bf16.msra.mxu3 %v2942_v28 }
0x267d   : > { %2968 = vmatpush.bf16.msra.mxu3 %v2940_v34  ;;  %v3596_v34 = vld [vmem:[#allocation2 + $0x30] sm:$0xf] }
0x2681   : > { %2969 = vmatpush.bf16.msra.mxu3 %v2938_v27  ;;  %v3597_v27 = vor.u32 %v3671_v35, %v3596_v34 }
0x2684   : > { %3590 = vmatmul.msk.bf16.vlgmr.msra.gmra.mxu3 %vm2955_vm14, %v3585_v8 }
0x2694   : > { %3591 = vmatmul.msk.bf16.gmra.mxu3 %vm2955_vm14, %v3589_v38 }
0x2707   : > { %v2971_v12 = vpop.f32.mrf.mxu3 }
0x2708   : > { %v2981_v32 = vmax.f32 %v2971_v12, 0.0 }
0x270f   : > { %v2973_v42 = vpop.f32.mrf.mxu3 }
0x2710   : > { %v2982_v1 = vmax.f32 %v2973_v42, 0.0  ;;  %v3106_v42 = vsel %vm1421_vm15, %v3105_v17, 0  ;;  %vm3148_vm15 = vcmask 74752  }
0x2712   : > { %v4159_v40 = vpack.i.bf16 %v2982_v1, %v2981_v32 }
0x2714   : > { %4160 = vrot.lane.b32.xlu1 %v4159_v40, %s4471_s2  ;;  %v3672_v40 = vld [vmem:[#allocation2 + $0x68] sm:$0x10] }
0x2717   : > { %v2976_v44 = vpop.f32.mrf.mxu3 }
0x2718   : > { %v2983_v24 = vmax.f32 %v2976_v44, 0.0 }
0x271f   : > { %v2978_v36 = vpop.f32.mrf.mxu3 }
0x2720   : > { %v2984_v7 = vmax.f32 %v2978_v36, 0.0 }
0x2722   : > { %v4164_v45 = vpack.i.bf16 %v2984_v7, %v2983_v24 }
0x2724   : > { %4165 = vrot.lane.b32.xlu2 %v4164_v45, %s4471_s2  ;;  %v3125_v45 = vshrl.u32 %v3124_v22, 7 }
0x277e   : > { %v4166_v39 = vpop.permute.xlu2 %4165 }
0x277f   : > { %v4168_v59 = vunpack.i.h.bf16 %v4166_v39  ;;  %v4167_v19 = vunpack.i.l.bf16 %v4166_v39  ;;  %v3128_v39 = vand.u32 127, %v3124_v22 }
0x2781   : > { %v2996_v29 = vsel %vm2758_vm1, %v4168_v59, %v2984_v7  ;;  %v2993_v37 = vsel %vm2758_vm1, %v4167_v19, %v2983_v24  ;;  %v3126_v59 = vadd.s32 8, %v3125_v45  ;;  %v4477_v19 = vmov 0.0  }
0x2782   : > { %v4174_v46 = vpack.i.bf16 %v2996_v29, %v2993_v37 }
0x2783   : > { %vm3130_vm0 = vcmp.eq.s32.totalorder %v3126_v59, %v3128_v39 }
0x2784   : > { %4175 = vrot.lane.b32.xlu1 %v4174_v46, %s4471_s2  ;;  %v3605_v29 = vsel %vm3130_vm0, 1.0, %v4477_v19 }
0x2786   : > { %v4161_v47 = vpop.permute.xlu1 %4160 }
0x2787   : > { %v4163_v49 = vunpack.i.h.bf16 %v4161_v47  ;;  %v4162_v25 = vunpack.i.l.bf16 %v4161_v47 }
0x2789   : > { %v2990_v41 = vsel %vm2758_vm1, %v4163_v49, %v2982_v1  ;;  %v2987_v50 = vsel %vm2758_vm1, %v4162_v25, %v2981_v32 }
0x278a   : > { %v4169_v51 = vpack.i.bf16 %v2990_v41, %v2987_v50 }
0x278c   : > { %4170 = vrot.lane.b32.xlu0 %v4169_v51, %s4471_s2 }
0x27f6   : > { %v4176_v52 = vpop.permute.xlu1 %4175 }
0x27f7   : > { %v4178_v56 = vunpack.i.h.bf16 %v4176_v52  ;;  %v4177_v58 = vunpack.i.l.bf16 %v4176_v52 }
0x27f9   : > { %v3008_v60 = vsel %vm2758_vm1, %v4178_v56, %v2984_v7  ;;  %v3007_v62 = vsel %vm2758_vm1, %v4177_v58, %v2983_v24 }
0x27fa   : > { %v4184_v2 = vpack.i.bf16 %v3008_v60, %v3007_v62 }
0x27fc   : > { %4185 = vrot.lane.b32.xlu0 %v4184_v2, %s4433_s24 }
0x27fe   : > { %v4171_v10 = vpop.permute.xlu0 %4170 }
0x27ff   : > { %v4173_v3 = vunpack.i.h.bf16 %v4171_v10  ;;  %v4172_v13 = vunpack.i.l.bf16 %v4171_v10 }
0x2801   : > { %v3006_v6 = vsel %vm2758_vm1, %v4173_v3, %v2982_v1  ;;  %v3005_v4 = vsel %vm2758_vm1, %v4172_v13, %v2981_v32 }
0x2802   : > { %v4179_v0 = vpack.i.bf16 %v3006_v6, %v3005_v4 }
0x2804   : > { %4180 = vrot.lane.b32.xlu2 %v4179_v0, %s4433_s24  ;;  %s433_s24 = sand.u32 1, %s4412_s14  }
0x2805   : > { %s434_s29 = scalar_lea.vmem [#allocation11], %s433_s24  ;;  %s3184_s25 = scalar_lea.sflag [#allocation4], %s433_s24 }
0x2806   : > { %s3194_s30 = sshll.u32 %s434_s29, 4  ;;  %s3195_s30 = int_to_ptr.vmem [resolvable:$true] %s3194_s30 }
0x285e   : > { %v4181_v30 = vpop.permute.xlu2 %4180 }
0x285f   : > { %v4183_v43 = vunpack.i.h.bf16 %v4181_v30  ;;  %v4182_v48 = vunpack.i.l.bf16 %v4181_v30 }
0x2861   : > { %v3026_v57 = vmax.f32 %v2982_v1, %v4183_v43  ;;  %v3025_v61 = vmax.f32 %v2981_v32, %v4182_v48  ;;  %v3601_v1 = vld [vmem:[#allocation2 + $0x34] sm:$0xf] }
0x2862   : > { %v3602_v36 = vor.u32 %v3672_v40, %v3601_v1 }
0x2863   : > { %v3029_v53 = vpack.c.bf16 %v3026_v57, %v3025_v61 }
0x2865   : > { %3592 = vmatmul.msk.bf16.vlgmr.msra.gmra.mxu0 %vm3032_vm4, %v3029_v53 }
0x286e   : > { %v4186_v54 = vpop.permute.xlu0 %4185 }
0x286f   : > { %v4188_v18 = vunpack.i.h.bf16 %v4186_v54  ;;  %v4187_v23 = vunpack.i.l.bf16 %v4186_v54 }
0x2871   : > { %v3028_v26 = vmax.f32 %v2984_v7, %v4188_v18  ;;  %v3027_v21 = vmax.f32 %v2983_v24, %v4187_v23 }
0x2873   : > { %v3030_v14 = vpack.c.bf16 %v3028_v26, %v3027_v21 }
0x2875   : > { %3593 = vmatmul.msk.bf16.gmra.mxu0 %vm3032_vm4, %v3030_v14 }
0x28e2   : > { %v3051_v9 = vpop.f32.mrf.mxu0 }
0x28ea   : > { %v3053_v63 = vpop.f32.mrf.mxu0 }
0x28eb   : > { %v3063_v33 = vpack.c.bf16 %v3053_v63, %v3051_v9 }
0x28f2   : > { %v3056_v16 = vpop.f32.mrf.mxu0 }
0x28fa   : > { %v3058_v15 = vpop.f32.mrf.mxu0 }
0x28fb   : > { %v3064_v28 = vpack.c.bf16 %v3058_v15, %v3056_v16 }
0x28fd   : > { %3083 = vmatpush.bf16.msra.mxu1 %v3064_v28 }
0x2901   : > { %3084 = vmatpush.bf16.msra.mxu1 %v3063_v33 }
0x2904   : > { %3598 = vmatmul.msk.bf16.vlgmr.msra.gmra.mxu1 %vm3070_vm10, %v3597_v27 }
0x2981   : > { %v3086_v8 = vpop.f32.mrf.mxu1 }
0x2982   : > { %v3091_v38 = vmax.f32 %v3086_v8, 0.0 }
0x2989   : > { %v3088_v5 = vpop.f32.mrf.mxu1 }
0x298a   : > { %v3092_v20 = vmax.f32 %v3088_v5, 0.0 }
0x298c   : > { %v3093_v12 = vsel %vm553_vm5, %v3092_v20, 1.0  ;;  %vm3129_vm5 = vcmp.eq.s32.totalorder %v3125_v45, %v3128_v39 }
0x298d   : > { %v3096_v32 = vpack.c.bf16 %v3093_v12, %v3091_v38  ;;  %v3604_v46 = vsel %vm3129_vm5, 1.0, %v4477_v19 }
0x298f   : > { %v3108_v44 = vand.u32 %v3106_v42, %v3096_v32 }
0x2991   : > { %3117 = vmatpush.bf16.msrb.mxu1 %v3108_v44 }
0x2994   : > { %3603 = vmatmul.msk.bf16.vlgmr.msrb.gmra.mxu1 %vm5592_vm8, %v3602_v36 }
0x2a11   : > { %v3119_v24 = vpop.f32.mrf.mxu1 }
0x2a12   : > { %3137 = vperm.xlu1 %4189, %v3119_v24  }
0x2a19   : > { %v3121_v7 = vpop.f32.mrf.mxu1 }
0x2a1a   : > { %3142 = vperm.xlu2 %4190, %v3121_v7  }
0x2a74   : > { %v3143_v37 = vpop.permute.xlu2 %3142 }
0x2a75   : > { %v3146_v47 = vmul.f32 %v3605_v29, %v3143_v37 }
0x2a77   : > { %v3149_v50 = vsel %vm3148_vm15, %v3146_v47, 0.0 }
0x2a84   : > { %v3138_v49 = vpop.permute.xlu1 %3137 }
0x2a85   : > { %v3145_v25 = vmul.f32 %v3604_v46, %v3138_v49 }
0x2a87   : > { %v3147_v41 = vsel %vm460_vm3, %v3145_v25, 0.0 }
0x2a88   : > { %v3150_v51 = vadd.f32 %v3149_v50, %v3147_v41 }
0x2a8a   : > { %v3151_v52 = vrot.slane %v3150_v51, 4 }
0x2a8c   : > { %v3152_v56 = vadd.f32 %v3151_v52, %v3150_v51 }
0x2a8e   : > { %v3153_v58 = vrot.slane %v3152_v56, 2 }
0x2a90   : > { %v3154_v60 = vadd.f32 %v3153_v58, %v3152_v56 }
0x2a92   : > { %v3155_v62 = vrot.slane %v3154_v60, 1 }
0x2a94   : > { %v3156_v2 = vadd.f32 %v3155_v62, %v3154_v60 }
0x2a96   : > { %v3157_v10 = vsel %vm460_vm3, %v3156_v2, -inf }
0x2a97   : > { %3158 = vmax.xlane.f32.xlu0 %v3157_v10 }
0x2b0a   : > { %v3159_v3 = vpop.xlane.xlu0 %3158 }
0x2b0b   : > { %v3160_v13 = vsub.f32 %v3156_v2, %v3159_v3 }
0x2b0d   : > { %v3161_v6 = vmul.f32 1.442695, %v3160_v13 }
0x2b0f   : > { %4192 = vpow2.f32 %v3161_v6 }
0x2b15   : > { %v4193_v4 = vpop.eup %4192 }
0x2b16   : > { %v3163_v0 = vsel %vm460_vm3, %v4193_v4, 0.0 }
0x2b17   : > { %3164 = vadd.xlane.f32.xlu1 %v3163_v0 }
0x2b8a   : > { %v3165_v11 = vpop.xlane.xlu1 %3164 }
0x2b8b   : > { %4194 = vrcp.f32 %v3165_v11  ;;  %v3177_v48 = vand.u32 2147483648, %v3165_v11  ;;  %v3175_v61 = vand.u32 2147483647, %v3165_v11  ;;  %vm3171_vm9 = vweird.f32 %v3165_v11 }
0x2b8d   : > { %v3178_v54 = vor.u32 1.1754944e-38, %v3177_v48  ;;  %vm3176_vm3 = vcmp.eq.f32.partialorder %v3175_v61, 8.507059e+37 }
0x2b91   : > { %v4195_v55 = vpop.eup %4194 }
0x2b92   : > { %v3167_v30 = vmul.f32 %v4195_v55, %v3165_v11  ;;  %vm3172_vm6 = vweird.f32 %v4195_v55 }
0x2b93   : > { %vm3173_vm13 = vmor %vm3171_vm9, %vm3172_vm6 }
0x2b94   : > { %v3168_v43 = vsub.f32 1.0, %v3167_v30 }
0x2b96   : > { %v3169_v57 = vmul.f32 %v4195_v55, %v3168_v43 }
0x2b98   : > { %v3170_v53 = vadd.f32 %v4195_v55, %v3169_v57 }
0x2b9a   : > { %v3174_v18 = vsel %vm3173_vm13, %v4195_v55, %v3170_v53 }
0x2b9b   : > { %v3179_v23 = vsel %vm3176_vm3, %v3178_v54, %v3174_v18 }
0x2b9c   : > { %v3180_v26 = vmul.f32 %v4193_v4, %v3179_v23 }
0x2b9e   : > { %3182 = vst.msk [vmem:[%s434_s29] sm:$0x1] %vm3181_vm11, %v3180_v26 }
0x2b9f   : > { %4373 = shalt.err (!%p4370_p8)
}
0x2ba0   : > { %3693 = dma.vmem_to_hbm [thread:$0]  (%p4571_p5), %s3195_s30, 16, %s3197_s16, %s3184_s25  }
0x2ba1 PF: > { %s5593_s18 = sld [smem:[#allocation18_spill]] }
0x2ba2   : > { %s5594_s12 = sld [smem:[#allocation16_spill]] }
0x2ba7   : > { %p3725_p9 = scmp.ge.s32.totalorder %s5593_s18, 2 }
0x2ba8   : > { %s3208_s22 = sand.u32 1, %s5594_s12  }
0x2ba9   : > { %p3712_p10 = pnand %p3725_p9, %p4575_p6  ;;  %s3209_s1 = scalar_lea.sflag [#allocation4], %s3208_s22 }
0x2bab   : > { %p3713_p11 = pneg %p3712_p10 }
0x2bad   : > { %4403 = dma.done.wait (%p3713_p11), %s3209_s1, 16  }
0x2bae   : > { %4405 = vsyncadd (%p3713_p11), %s3209_s1, 4294967280  ;;  %s5596_s16 = sld [smem:[#allocation19_spill]]  ;;  %s5599_s13 = smov %s4412_s14 }
0x2baf   : > { %s5597_s20 = sld [smem:[#allocation17_spill]] }
0x2bb0   : > { %s5598_s15 = sld [smem:[#allocation20_spill]] }
0x2bb4   : > { %p23_p12 = scmp.ge.s32.totalorder %s5596_s16, 4  }
0x2bb5   : > { %s5600_s14 = smov %s5597_s20 }
0x2bb6   :  { %25 = sbr.rel (!%p23_p12) target bundleno = 10 (0xa), region = 124 }
0x2bbb   :  { %3214 = vsyncpa [#allocation3], 1 }
0x2bbc   :  { %3216 = vsyncpa [#allocation3 + $0x1], 1 }
0x2bbd   :  { %3217 = vsyncpa [#allocation6], 1 }
0x2bbe   :  { %3218 = vsyncpa [#allocation9], 1 }
0x2bbf   :  { %3219 = vsyncpa [#allocation4], 1 }
0x2bc0   :  { %3221 = vsyncpa [#allocation4 + $0x1], 1 }

</bundles_post_ra>
